<compile_context>
chip_gen: v7x
topology: tpu7x:2x2x1
jax: 0.10.0
libtpu: 0.0.40
codegen_flags: <defaults>
</compile_context>

<pallas_src>
import functools

import jax
import jax.numpy as jnp
from jax.experimental import pallas as pl
from jax.experimental.pallas import tpu as pltpu


def _round_up(x, m):
    return ((x + m - 1) // m) * m


def _pick_tile_m(m, c):
    """Pixel-tile size for kernel 1."""
    if m >= 2048:
        # v5e guidance: drop to 512 when Cin is very wide (scoped VMEM ~16MiB).
        return 512 if c >= 1024 else 1024
    return max(8, _round_up(-(-m // 2), 8))


def _pick_batch_block(n, max_b=8):
    """Images per kernel-2 grid step: prefer >=2 grid steps (megacore/v7x),
    then the largest divisor of n that is <= max_b."""
    for min_steps in (2, 1):
        for b in range(min(n, max_b), 0, -1):
            if n % b == 0 and n // b >= min_steps:
                return b
    return 1


# ---------------------------------------------------------------------------
# Kernel 1: fused BN1 + ReLU + 1x1 conv (matmul over channels)
#           + partial per-channel sum / sumsq of h for BN2 statistics.
# ---------------------------------------------------------------------------
def _bn_relu_conv1x1_kernel(x_ref, scale_ref, shift_ref, w_ref,
                            h_ref, stats_ref, *, tm, m_total):
    # x_ref:     (TM, Cin) f32     scale/shift: (1, Cin) f32
    # w_ref:     (Cin, Ch) bf16    h_ref: (TM, Ch) bf16
    # stats_ref: (1, 2, Ch) f32    [0] = sum(h), [1] = sum(h*h) over this tile
    a = jnp.maximum(x_ref[...] * scale_ref[...] + shift_ref[...], 0.0)
    h = jnp.dot(a.astype(jnp.bfloat16), w_ref[...],
                preferred_element_type=jnp.float32)
    h_ref[...] = h.astype(h_ref.dtype)

    if m_total % tm != 0:
        # Mask ragged-last-tile garbage rows out of the statistics only
        # (Pallas already masks the ragged h store).
        base = pl.program_id(0) * tm
        rid = base + jax.lax.broadcasted_iota(jnp.int32, (tm, 1), 0)
        h = jnp.where(rid < m_total, h, 0.0)

    stats_ref[0, 0:1, :] = jnp.sum(h, axis=0, keepdims=True)
    stats_ref[0, 1:2, :] = jnp.sum(h * h, axis=0, keepdims=True)


def bn_relu_conv1x1(x2d, scale, shift, w_bf16):
    m, c = x2d.shape
    hidden = w_bf16.shape[1]
    tm = _pick_tile_m(m, c)
    grid_m = -(-m // tm)

    kernel = functools.partial(_bn_relu_conv1x1_kernel, tm=tm, m_total=m)
    h, stats = pl.pallas_call(
        kernel,
        out_shape=(jax.ShapeDtypeStruct((m, hidden), jnp.bfloat16),
                   jax.ShapeDtypeStruct((grid_m, 2, hidden), jnp.float32)),
        grid_spec=pltpu.PrefetchScalarGridSpec(
            num_scalar_prefetch=0,
            grid=(grid_m,),
            in_specs=[pl.BlockSpec((tm, c), lambda i: (i, 0)),
                      pl.BlockSpec((1, c), lambda i: (0, 0)),
                      pl.BlockSpec((1, c), lambda i: (0, 0)),
                      pl.BlockSpec((c, hidden), lambda i: (0, 0))],
            out_specs=[pl.BlockSpec((tm, hidden), lambda i: (i, 0)),
                       pl.BlockSpec((1, 2, hidden), lambda i: (i, 0, 0))]),
        compiler_params=pltpu.CompilerParams(
            dimension_semantics=("parallel",),
            vmem_limit_bytes=32 * 1024 * 1024),
        cost_estimate=pl.CostEstimate(
            flops=2 * m * c * hidden,
            transcendentals=0,
            bytes_accessed=m * c * 4 + m * hidden * 2 + c * hidden * 2),
    )(x2d, scale.reshape(1, c), shift.reshape(1, c), w_bf16)
    return h, stats


# ---------------------------------------------------------------------------
# Kernel 2: fused BN2 + ReLU + 3x3 conv (padding=1).
# B images per grid step share one flat bf16 padded scratch:
#   padrow 0                       : zeros (top halo)
#   padrows 1+b*(H+1) .. +H-1      : image b interior rows ([0, act_row, 0])
#   padrow (b+1)*(H+1)             : zeros (bottom halo of b / top halo of b+1)
# Each padrow is W+2 flat positions.  Tap (dy,dx) for output o reads flat
# position o + dy*(W+2) + dx, so all 9 taps are contiguous offset slices and
# one matmul each over the whole batch block.  Accumulation is a row-chunked
# value accumulator stored once per chunk (no o_ref RMW).
# ---------------------------------------------------------------------------
def _bn_relu_conv3x3_kernel(h_ref, scale_ref, shift_ref, w_ref, o_ref, pad_ref,
                            *, bb, hh, ww, tr, l_alloc):
    # h_ref:   (B, H*W, Ch) bf16   scale/shift: (1, Ch) f32
    # w_ref:   (3, 3, Ch, G) bf16  o_ref: (1, l_alloc, G) f32
    # pad_ref: (pad_pos, Ch) bf16 scratch
    wp = ww + 2
    g = o_ref.shape[-1]
    scale = scale_ref[...]
    shift = shift_ref[...]

    # Single bulk zero covers all halo rows/columns + slack (megacore-safe,
    # redone every step; interior positions are overwritten below).
    pad_ref[...] = jnp.zeros_like(pad_ref)

    # BN2 + ReLU (f32 math), cast to bf16, write interior rows.
    for b in range(bb):
        a = jnp.maximum(h_ref[b].astype(jnp.float32) * scale + shift, 0.0)
        a = a.astype(pad_ref.dtype)
        base = (1 + b * (hh + 1)) * wp + 1
        for y in range(hh):
            pad_ref[pl.ds(base + y * wp, ww), :] = a[y * ww:(y + 1) * ww]

    # 9 shifted matmuls, value accumulation, row-chunked stores.
    nchunks = l_alloc // tr
    for r in range(nchunks):
        row0 = r * tr
        acc = jnp.zeros((tr, g), jnp.float32)
        for dy in range(3):
            for dx in range(3):
                off = dy * wp + dx
                patch = pad_ref[pl.ds(row0 + off, tr), :]       # (tr, Ch) bf16
                acc = acc + jnp.dot(patch, w_ref[dy, dx],
                                    preferred_element_type=jnp.float32)
        o_ref[0, pl.ds(row0, tr), :] = acc


def bn_relu_conv3x3(h, scale, shift, w_bf16, hh, ww, bb):
    n, hw, ch = h.shape
    g = w_bf16.shape[-1]
    nsteps = n // bb
    wp = ww + 2
    l = bb * (hh + 1) * wp                       # flat output rows per step
    tr = 256 if l >= 256 else _round_up(l, 8)    # row-chunk size (vreg budget)
    l_alloc = _round_up(l, tr)
    pad_pos = _round_up(l_alloc + 2 * wp + 2, 8)  # covers largest tap offset

    kernel = functools.partial(_bn_relu_conv3x3_kernel,
                               bb=bb, hh=hh, ww=ww, tr=tr, l_alloc=l_alloc)
    # TODO(synk): for lane-dense output stores, write into a pre-concatenated
    # NHWC (N,H,W,C+G) slab via input_output_aliases instead of a G-wide block.
    return pl.pallas_call(
        kernel,
        out_shape=jax.ShapeDtypeStruct((nsteps, l_alloc, g), jnp.float32),
        grid_spec=pltpu.PrefetchScalarGridSpec(
            num_scalar_prefetch=0,
            grid=(nsteps,),
            in_specs=[pl.BlockSpec((bb, hw, ch), lambda i: (i, 0, 0)),
                      pl.BlockSpec((1, ch), lambda i: (0, 0)),
                      pl.BlockSpec((1, ch), lambda i: (0, 0)),
                      pl.BlockSpec((3, 3, ch, g), lambda i: (0, 0, 0, 0))],
            out_specs=pl.BlockSpec((1, l_alloc, g), lambda i: (i, 0, 0)),
            scratch_shapes=[pltpu.VMEM((pad_pos, ch), jnp.bfloat16)]),
        compiler_params=pltpu.CompilerParams(
            dimension_semantics=("parallel",),
            vmem_limit_bytes=32 * 1024 * 1024),
        cost_estimate=pl.CostEstimate(
            flops=2 * nsteps * l_alloc * 9 * ch * g,
            transcendentals=0,
            bytes_accessed=(n * hw * ch * 2 + 9 * ch * g * 2
                            + nsteps * l_alloc * g * 4)),
    )(h, scale.reshape(1, ch), shift.reshape(1, ch), w_bf16)


# ---------------------------------------------------------------------------
# Bottleneck forward (PyTorch training-mode BN semantics; NCHW external API)
# ---------------------------------------------------------------------------
@functools.partial(jax.jit, static_argnames=("eps",))
def bottleneck_forward(x_nchw, gamma1, beta1, w1, gamma2, beta2, w2, eps=1e-5):
    n, c, hh, ww = x_nchw.shape
    hidden = w1.shape[1]
    g = w2.shape[-1]
    m = n * hh * ww

    # BN1 batch statistics: single fused sum / sum-of-squares pass on NCHW x.
    s1 = jnp.sum(x_nchw, axis=(0, 2, 3))
    s2 = jnp.sum(x_nchw * x_nchw, axis=(0, 2, 3))
    mean1 = s1 / m
    var1 = s2 / m - mean1 * mean1
    scale1 = gamma1 / jnp.sqrt(var1 + eps)
    shift1 = beta1 - mean1 * scale1

    # TODO(synk): fuse this NCHW->NHWC transpose with the BN1 statistics into
    # one Pallas pass (or keep NHWC end-to-end in a full DenseNet).
    x2d = jnp.transpose(x_nchw, (0, 2, 3, 1)).reshape(m, c)

    # Kernel 1: BN1+ReLU+1x1 conv, fused partial BN2 statistics.
    h2d, stats = bn_relu_conv1x1(x2d, scale1, shift1, w1.astype(jnp.bfloat16))
    hsum = jnp.sum(stats[:, 0, :], axis=0)
    hssq = jnp.sum(stats[:, 1, :], axis=0)
    mean2 = hsum / m
    var2 = hssq / m - mean2 * mean2
    scale2 = gamma2 / jnp.sqrt(var2 + eps)
    shift2 = beta2 - mean2 * scale2

    # Kernel 2: BN2+ReLU+3x3 conv (pad=1), batch-blocked.
    bb = _pick_batch_block(n)
    h3 = h2d.reshape(n, hh * ww, hidden)
    out_steps = bn_relu_conv3x3(h3, scale2, shift2, w2.astype(jnp.bfloat16),
                                hh, ww, bb)

    # Epilogue: drop separator rows / halo columns, back to NCHW, concat.
    wp = ww + 2
    l = bb * (hh + 1) * wp
    out = out_steps[:, :l, :].reshape(n // bb, bb, hh + 1, wp, g)
    out = out[:, :, :hh, :ww, :].reshape(n, hh, ww, g)
    out_nchw = jnp.transpose(out, (0, 3, 1, 2)).astype(x_nchw.dtype)
    return jnp.concatenate([x_nchw, out_nchw], axis=1)


# ---------------------------------------------------------------------------
# Pure-JAX reference (for correctness check only)
# ---------------------------------------------------------------------------
def _ref_forward(x_nchw, gamma1, beta1, w1, gamma2, beta2, w2, eps=1e-5):
    mean1 = jnp.mean(x_nchw, axis=(0, 2, 3), keepdims=True)
    var1 = jnp.var(x_nchw, axis=(0, 2, 3), keepdims=True)
    a1 = jax.nn.relu((x_nchw - mean1) / jnp.sqrt(var1 + eps)
                     * gamma1[None, :, None, None] + beta1[None, :, None, None])
    k1 = jnp.transpose(w1, (1, 0))[:, :, None, None]              # OIHW
    h = jax.lax.conv_general_dilated(
        a1, k1, (1, 1), "VALID", dimension_numbers=("NCHW", "OIHW", "NCHW"))
    mean2 = jnp.mean(h, axis=(0, 2, 3), keepdims=True)
    var2 = jnp.var(h, axis=(0, 2, 3), keepdims=True)
    a2 = jax.nn.relu((h - mean2) / jnp.sqrt(var2 + eps)
                     * gamma2[None, :, None, None] + beta2[None, :, None, None])
    k2 = jnp.transpose(w2, (3, 2, 0, 1))                          # HWIO -> OIHW
    out = jax.lax.conv_general_dilated(
        a2, k2, (1, 1), "SAME", dimension_numbers=("NCHW", "OIHW", "NCHW"))
    return jnp.concatenate([x_nchw, out], axis=1)


if __name__ == "__main__":
    N, C, H, W = 2, 4, 16, 16        # nChannels = 4
    growth = 4                        # growthrate = 4 -> hidden_dim = 16
    hidden = 4 * growth

    key = jax.random.PRNGKey(0)
    ks = jax.random.split(key, 7)
    x = jax.random.normal(ks[0], (N, C, H, W), jnp.float32)
    gamma1 = jax.random.uniform(ks[1], (C,), jnp.float32, 0.5, 1.5)
    beta1 = 0.1 * jax.random.normal(ks[2], (C,), jnp.float32)
    w1 = 0.1 * jax.random.normal(ks[3], (C, hidden), jnp.float32)            # (Cin, Cout) 1x1
    gamma2 = jax.random.uniform(ks[4], (hidden,), jnp.float32, 0.5, 1.5)
    beta2 = 0.1 * jax.random.normal(ks[5], (hidden,), jnp.float32)
    w2 = 0.1 * jax.random.normal(ks[6], (3, 3, hidden, growth), jnp.float32)  # HWIO 3x3

    out = bottleneck_forward(x, gamma1, beta1, w1, gamma2, beta2, w2)
    out = jax.block_until_ready(out)

    ref = _ref_forward(x, gamma1, beta1, w1, gamma2, beta2, w2)
    assert out.shape == (N, C + growth, H, W), out.shape
    err = float(jnp.max(jnp.abs(out - ref)))
    # bf16 MXU operands / bf16 hidden & conv2 activations -> looser tolerance
    assert bool(jnp.allclose(out, ref, atol=5e-2, rtol=5e-2)), err

    print("KERNEL_OK")
</pallas_src>

<mosaic_0001>
module attributes {stable_mosaic.version = 11 : i64} {
  func.func @_bn_relu_conv1x1_kernel(%arg0: i32, %arg1: memref<256x4xf32, #tpu.memory_space<vmem>>, %arg2: memref<1x4xf32, #tpu.memory_space<vmem>>, %arg3: memref<1x4xf32, #tpu.memory_space<vmem>>, %arg4: memref<4x16xbf16, #tpu.memory_space<vmem>>, %arg5: memref<256x16xbf16, #tpu.memory_space<vmem>>, %arg6: memref<1x2x16xf32, #tpu.memory_space<vmem>>) attributes {dimension_semantics = [#tpu.dimension_semantics<parallel>], iteration_bounds = array<i64: 2>, scalar_prefetch = 0 : i64, scratch_operands = 0 : i64, tpu.core_type = #tpu.core_type<tc>, window_params = [{transform_indices = @transform_0, window_bounds = array<i64: 256, 4>}, {pipeline_mode = #tpu.pipeline_mode<synchronous>, transform_indices = @transform_1, window_bounds = array<i64: 1, 4>}, {pipeline_mode = #tpu.pipeline_mode<synchronous>, transform_indices = @transform_2, window_bounds = array<i64: 1, 4>}, {pipeline_mode = #tpu.pipeline_mode<synchronous>, transform_indices = @transform_3, window_bounds = array<i64: 4, 16>}, {transform_indices = @transform_4, window_bounds = array<i64: 256, 16>}, {transform_indices = @transform_5, window_bounds = array<i64: 1, 2, 16>}]} {
    %c0 = arith.constant 0 : index
    %c0_0 = arith.constant 0 : index
    %0 = vector.load %arg1[%c0, %c0_0] : memref<256x4xf32, #tpu.memory_space<vmem>>, vector<256x4xf32>
    %c0_1 = arith.constant 0 : index
    %c0_2 = arith.constant 0 : index
    %1 = vector.load %arg2[%c0_1, %c0_2] : memref<1x4xf32, #tpu.memory_space<vmem>>, vector<1x4xf32>
    %2 = vector.broadcast %1 : vector<1x4xf32> to vector<256x4xf32>
    %3 = arith.mulf %0, %2 : vector<256x4xf32>
    %c0_3 = arith.constant 0 : index
    %c0_4 = arith.constant 0 : index
    %4 = vector.load %arg3[%c0_3, %c0_4] : memref<1x4xf32, #tpu.memory_space<vmem>>, vector<1x4xf32>
    %5 = vector.broadcast %4 : vector<1x4xf32> to vector<256x4xf32>
    %6 = arith.addf %3, %5 : vector<256x4xf32>
    %cst = arith.constant 0.000000e+00 : f32
    %7 = vector.broadcast %cst : f32 to vector<256x4xf32>
    %8 = arith.maximumf %6, %7 : vector<256x4xf32>
    %9 = arith.truncf %8 : vector<256x4xf32> to vector<256x4xbf16>
    %c0_5 = arith.constant 0 : index
    %c0_6 = arith.constant 0 : index
    %10 = vector.load %arg4[%c0_5, %c0_6] : memref<4x16xbf16, #tpu.memory_space<vmem>>, vector<4x16xbf16>
    %cst_7 = arith.constant dense<0.000000e+00> : vector<256x16xf32>
    %11 = tpu.matmul %9, %10, %cst_7 {dimension_numbers = #tpu.dot_dimension_numbers<[1], [0], [0], [1], [0, 0, 1, 1], [], []>} : vector<256x4xbf16>, vector<4x16xbf16>, vector<256x16xf32> -> vector<256x16xf32>
    %12 = arith.truncf %11 : vector<256x16xf32> to vector<256x16xbf16>
    %c0_8 = arith.constant 0 : index
    %c0_9 = arith.constant 0 : index
    %13 = vector.load %arg5[%c0_8, %c0_9] : memref<256x16xbf16, #tpu.memory_space<vmem>>, vector<256x16xbf16>
    tpu.vector_store %arg5[%c0_8, %c0_9], %12 {strides = array<i32>} : memref<256x16xbf16, #tpu.memory_space<vmem>>, vector<256x16xbf16>,
    %cst_10 = arith.constant dense<0.000000e+00> : vector<16xf32>
    %14 = vector.multi_reduction <add>, %11, %cst_10 [0] : vector<256x16xf32> to vector<16xf32>
    %15 = vector.shape_cast %14 : vector<16xf32> to vector<1x16xf32>
    %c0_11 = arith.constant 0 : index
    %c0_12 = arith.constant 0 : index
    %c0_13 = arith.constant 0 : index
    %16 = vector.load %arg6[%c0_11, %c0_12, %c0_13] : memref<1x2x16xf32, #tpu.memory_space<vmem>>, vector<1x1x16xf32>
    %17 = vector.shape_cast %16 : vector<1x1x16xf32> to vector<1x16xf32>
    %18 = vector.shape_cast %15 : vector<1x16xf32> to vector<1x1x16xf32>
    tpu.vector_store %arg6[%c0_11, %c0_12, %c0_13], %18 {strides = array<i32>} : memref<1x2x16xf32, #tpu.memory_space<vmem>>, vector<1x1x16xf32>,
    %19 = arith.mulf %11, %11 : vector<256x16xf32>
    %cst_14 = arith.constant dense<0.000000e+00> : vector<16xf32>
    %20 = vector.multi_reduction <add>, %19, %cst_14 [0] : vector<256x16xf32> to vector<16xf32>
    %21 = vector.shape_cast %20 : vector<16xf32> to vector<1x16xf32>
    %c0_15 = arith.constant 0 : index
    %c1 = arith.constant 1 : index
    %c0_16 = arith.constant 0 : index
    %22 = vector.load %arg6[%c0_15, %c1, %c0_16] : memref<1x2x16xf32, #tpu.memory_space<vmem>>, vector<1x1x16xf32>
    %23 = vector.shape_cast %22 : vector<1x1x16xf32> to vector<1x16xf32>
    %24 = vector.shape_cast %21 : vector<1x16xf32> to vector<1x1x16xf32>
    tpu.vector_store %arg6[%c0_15, %c1, %c0_16], %24 {strides = array<i32>} : memref<1x2x16xf32, #tpu.memory_space<vmem>>, vector<1x1x16xf32>,
    return
  }
  func.func @transform_0(%arg0: i32) -> (i32, i32) {
    %c0_i32 = arith.constant 0 : i32
    %c0_i32_0 = arith.constant 0 : i32
    return %arg0, %c0_i32 : i32, i32
  }
  func.func @transform_1(%arg0: i32) -> (i32, i32) {
    %c0_i32 = arith.constant 0 : i32
    %c0_i32_0 = arith.constant 0 : i32
    %c0_i32_1 = arith.constant 0 : i32
    return %c0_i32, %c0_i32_0 : i32, i32
  }
  func.func @transform_2(%arg0: i32) -> (i32, i32) {
    %c0_i32 = arith.constant 0 : i32
    %c0_i32_0 = arith.constant 0 : i32
    %c0_i32_1 = arith.constant 0 : i32
    return %c0_i32, %c0_i32_0 : i32, i32
  }
  func.func @transform_3(%arg0: i32) -> (i32, i32) {
    %c0_i32 = arith.constant 0 : i32
    %c0_i32_0 = arith.constant 0 : i32
    %c0_i32_1 = arith.constant 0 : i32
    return %c0_i32, %c0_i32_0 : i32, i32
  }
  func.func @transform_4(%arg0: i32) -> (i32, i32) {
    %c0_i32 = arith.constant 0 : i32
    %c0_i32_0 = arith.constant 0 : i32
    return %arg0, %c0_i32 : i32, i32
  }
  func.func @transform_5(%arg0: i32) -> (i32, i32, i32) {
    %c0_i32 = arith.constant 0 : i32
    %c0_i32_0 = arith.constant 0 : i32
    %c0_i32_1 = arith.constant 0 : i32
    return %arg0, %c0_i32, %c0_i32_0 : i32, i32, i32
  }
}

module attributes {stable_mosaic.version = 11 : i64} {
  func.func @_bn_relu_conv3x3_kernel(%arg0: i32, %arg1: memref<1x256x16xbf16, #tpu.memory_space<vmem>>, %arg2: memref<1x16xf32, #tpu.memory_space<vmem>>, %arg3: memref<1x16xf32, #tpu.memory_space<vmem>>, %arg4: memref<3x3x16x4xbf16, #tpu.memory_space<vmem>>, %arg5: memref<1x512x4xf32, #tpu.memory_space<vmem>>, %arg6: memref<552x16xbf16, #tpu.memory_space<vmem>>) attributes {dimension_semantics = [#tpu.dimension_semantics<parallel>], iteration_bounds = array<i64: 2>, scalar_prefetch = 0 : i64, scratch_operands = 1 : i64, tpu.core_type = #tpu.core_type<tc>, window_params = [{transform_indices = @transform_0, window_bounds = array<i64: 1, 256, 16>}, {pipeline_mode = #tpu.pipeline_mode<synchronous>, transform_indices = @transform_1, window_bounds = array<i64: 1, 16>}, {pipeline_mode = #tpu.pipeline_mode<synchronous>, transform_indices = @transform_2, window_bounds = array<i64: 1, 16>}, {pipeline_mode = #tpu.pipeline_mode<synchronous>, transform_indices = @transform_3, window_bounds = array<i64: 3, 3, 16, 4>}, {transform_indices = @transform_4, window_bounds = array<i64: 1, 512, 4>}]} {
    %c0 = arith.constant 0 : index
    %c0_0 = arith.constant 0 : index
    %0 = vector.load %arg2[%c0, %c0_0] : memref<1x16xf32, #tpu.memory_space<vmem>>, vector<1x16xf32>
    %c0_1 = arith.constant 0 : index
    %c0_2 = arith.constant 0 : index
    %1 = vector.load %arg3[%c0_1, %c0_2] : memref<1x16xf32, #tpu.memory_space<vmem>>, vector<1x16xf32>
    %cst = arith.constant 0.000000e+00 : bf16
    %2 = vector.broadcast %cst : bf16 to vector<552x16xbf16>
    %c0_3 = arith.constant 0 : index
    %c0_4 = arith.constant 0 : index
    %3 = vector.load %arg6[%c0_3, %c0_4] : memref<552x16xbf16, #tpu.memory_space<vmem>>, vector<552x16xbf16>
    tpu.vector_store %arg6[%c0_3, %c0_4], %2 {strides = array<i32>} : memref<552x16xbf16, #tpu.memory_space<vmem>>, vector<552x16xbf16>,
    %c0_5 = arith.constant 0 : index
    %c0_6 = arith.constant 0 : index
    %c0_7 = arith.constant 0 : index
    %4 = vector.load %arg1[%c0_5, %c0_6, %c0_7] : memref<1x256x16xbf16, #tpu.memory_space<vmem>>, vector<1x256x16xbf16>
    %5 = vector.shape_cast %4 : vector<1x256x16xbf16> to vector<256x16xbf16>
    %6 = arith.extf %5 : vector<256x16xbf16> to vector<256x16xf32>
    %7 = vector.broadcast %0 : vector<1x16xf32> to vector<256x16xf32>
    %8 = arith.mulf %6, %7 : vector<256x16xf32>
    %9 = vector.broadcast %1 : vector<1x16xf32> to vector<256x16xf32>
    %10 = arith.addf %8, %9 : vector<256x16xf32>
    %cst_8 = arith.constant 0.000000e+00 : f32
    %11 = vector.broadcast %cst_8 : f32 to vector<256x16xf32>
    %12 = arith.maximumf %10, %11 : vector<256x16xf32>
    %13 = arith.truncf %12 : vector<256x16xf32> to vector<256x16xbf16>
    %14 = vector.extract_strided_slice %13 {offsets = [0, 0], sizes = [16, 16], strides = [1, 1]} : vector<256x16xbf16> to vector<16x16xbf16>
    %c19 = arith.constant 19 : index
    %c0_9 = arith.constant 0 : index
    %15 = vector.load %arg6[%c19, %c0_9] : memref<552x16xbf16, #tpu.memory_space<vmem>>, vector<16x16xbf16>
    tpu.vector_store %arg6[%c19, %c0_9], %14 {strides = array<i32>} : memref<552x16xbf16, #tpu.memory_space<vmem>>, vector<16x16xbf16>,
    %16 = vector.extract_strided_slice %13 {offsets = [16, 0], sizes = [16, 16], strides = [1, 1]} : vector<256x16xbf16> to vector<16x16xbf16>
    %c37 = arith.constant 37 : index
    %c0_10 = arith.constant 0 : index
    %17 = vector.load %arg6[%c37, %c0_10] : memref<552x16xbf16, #tpu.memory_space<vmem>>, vector<16x16xbf16>
    tpu.vector_store %arg6[%c37, %c0_10], %16 {strides = array<i32>} : memref<552x16xbf16, #tpu.memory_space<vmem>>, vector<16x16xbf16>,
    %18 = vector.extract_strided_slice %13 {offsets = [32, 0], sizes = [16, 16], strides = [1, 1]} : vector<256x16xbf16> to vector<16x16xbf16>
    %c55 = arith.constant 55 : index
    %c0_11 = arith.constant 0 : index
    %19 = vector.load %arg6[%c55, %c0_11] : memref<552x16xbf16, #tpu.memory_space<vmem>>, vector<16x16xbf16>
    tpu.vector_store %arg6[%c55, %c0_11], %18 {strides = array<i32>} : memref<552x16xbf16, #tpu.memory_space<vmem>>, vector<16x16xbf16>,
    %20 = vector.extract_strided_slice %13 {offsets = [48, 0], sizes = [16, 16], strides = [1, 1]} : vector<256x16xbf16> to vector<16x16xbf16>
    %c73 = arith.constant 73 : index
    %c0_12 = arith.constant 0 : index
    %21 = vector.load %arg6[%c73, %c0_12] : memref<552x16xbf16, #tpu.memory_space<vmem>>, vector<16x16xbf16>
    tpu.vector_store %arg6[%c73, %c0_12], %20 {strides = array<i32>} : memref<552x16xbf16, #tpu.memory_space<vmem>>, vector<16x16xbf16>,
    %22 = vector.extract_strided_slice %13 {offsets = [64, 0], sizes = [16, 16], strides = [1, 1]} : vector<256x16xbf16> to vector<16x16xbf16>
    %c91 = arith.constant 91 : index
    %c0_13 = arith.constant 0 : index
    %23 = vector.load %arg6[%c91, %c0_13] : memref<552x16xbf16, #tpu.memory_space<vmem>>, vector<16x16xbf16>
    tpu.vector_store %arg6[%c91, %c0_13], %22 {strides = array<i32>} : memref<552x16xbf16, #tpu.memory_space<vmem>>, vector<16x16xbf16>,
    %24 = vector.extract_strided_slice %13 {offsets = [80, 0], sizes = [16, 16], strides = [1, 1]} : vector<256x16xbf16> to vector<16x16xbf16>
    %c109 = arith.constant 109 : index
    %c0_14 = arith.constant 0 : index
    %25 = vector.load %arg6[%c109, %c0_14] : memref<552x16xbf16, #tpu.memory_space<vmem>>, vector<16x16xbf16>
    tpu.vector_store %arg6[%c109, %c0_14], %24 {strides = array<i32>} : memref<552x16xbf16, #tpu.memory_space<vmem>>, vector<16x16xbf16>,
    %26 = vector.extract_strided_slice %13 {offsets = [96, 0], sizes = [16, 16], strides = [1, 1]} : vector<256x16xbf16> to vector<16x16xbf16>
    %c127 = arith.constant 127 : index
    %c0_15 = arith.constant 0 : index
    %27 = vector.load %arg6[%c127, %c0_15] : memref<552x16xbf16, #tpu.memory_space<vmem>>, vector<16x16xbf16>
    tpu.vector_store %arg6[%c127, %c0_15], %26 {strides = array<i32>} : memref<552x16xbf16, #tpu.memory_space<vmem>>, vector<16x16xbf16>,
    %28 = vector.extract_strided_slice %13 {offsets = [112, 0], sizes = [16, 16], strides = [1, 1]} : vector<256x16xbf16> to vector<16x16xbf16>
    %c145 = arith.constant 145 : index
    %c0_16 = arith.constant 0 : index
    %29 = vector.load %arg6[%c145, %c0_16] : memref<552x16xbf16, #tpu.memory_space<vmem>>, vector<16x16xbf16>
    tpu.vector_store %arg6[%c145, %c0_16], %28 {strides = array<i32>} : memref<552x16xbf16, #tpu.memory_space<vmem>>, vector<16x16xbf16>,
    %30 = vector.extract_strided_slice %13 {offsets = [128, 0], sizes = [16, 16], strides = [1, 1]} : vector<256x16xbf16> to vector<16x16xbf16>
    %c163 = arith.constant 163 : index
    %c0_17 = arith.constant 0 : index
    %31 = vector.load %arg6[%c163, %c0_17] : memref<552x16xbf16, #tpu.memory_space<vmem>>, vector<16x16xbf16>
    tpu.vector_store %arg6[%c163, %c0_17], %30 {strides = array<i32>} : memref<552x16xbf16, #tpu.memory_space<vmem>>, vector<16x16xbf16>,
    %32 = vector.extract_strided_slice %13 {offsets = [144, 0], sizes = [16, 16], strides = [1, 1]} : vector<256x16xbf16> to vector<16x16xbf16>
    %c181 = arith.constant 181 : index
    %c0_18 = arith.constant 0 : index
    %33 = vector.load %arg6[%c181, %c0_18] : memref<552x16xbf16, #tpu.memory_space<vmem>>, vector<16x16xbf16>
    tpu.vector_store %arg6[%c181, %c0_18], %32 {strides = array<i32>} : memref<552x16xbf16, #tpu.memory_space<vmem>>, vector<16x16xbf16>,
    %34 = vector.extract_strided_slice %13 {offsets = [160, 0], sizes = [16, 16], strides = [1, 1]} : vector<256x16xbf16> to vector<16x16xbf16>
    %c199 = arith.constant 199 : index
    %c0_19 = arith.constant 0 : index
    %35 = vector.load %arg6[%c199, %c0_19] : memref<552x16xbf16, #tpu.memory_space<vmem>>, vector<16x16xbf16>
    tpu.vector_store %arg6[%c199, %c0_19], %34 {strides = array<i32>} : memref<552x16xbf16, #tpu.memory_space<vmem>>, vector<16x16xbf16>,
    %36 = vector.extract_strided_slice %13 {offsets = [176, 0], sizes = [16, 16], strides = [1, 1]} : vector<256x16xbf16> to vector<16x16xbf16>
    %c217 = arith.constant 217 : index
    %c0_20 = arith.constant 0 : index
    %37 = vector.load %arg6[%c217, %c0_20] : memref<552x16xbf16, #tpu.memory_space<vmem>>, vector<16x16xbf16>
    tpu.vector_store %arg6[%c217, %c0_20], %36 {strides = array<i32>} : memref<552x16xbf16, #tpu.memory_space<vmem>>, vector<16x16xbf16>,
    %38 = vector.extract_strided_slice %13 {offsets = [192, 0], sizes = [16, 16], strides = [1, 1]} : vector<256x16xbf16> to vector<16x16xbf16>
    %c235 = arith.constant 235 : index
    %c0_21 = arith.constant 0 : index
    %39 = vector.load %arg6[%c235, %c0_21] : memref<552x16xbf16, #tpu.memory_space<vmem>>, vector<16x16xbf16>
    tpu.vector_store %arg6[%c235, %c0_21], %38 {strides = array<i32>} : memref<552x16xbf16, #tpu.memory_space<vmem>>, vector<16x16xbf16>,
    %40 = vector.extract_strided_slice %13 {offsets = [208, 0], sizes = [16, 16], strides = [1, 1]} : vector<256x16xbf16> to vector<16x16xbf16>
    %c253 = arith.constant 253 : index
    %c0_22 = arith.constant 0 : index
    %41 = vector.load %arg6[%c253, %c0_22] : memref<552x16xbf16, #tpu.memory_space<vmem>>, vector<16x16xbf16>
    tpu.vector_store %arg6[%c253, %c0_22], %40 {strides = array<i32>} : memref<552x16xbf16, #tpu.memory_space<vmem>>, vector<16x16xbf16>,
    %42 = vector.extract_strided_slice %13 {offsets = [224, 0], sizes = [16, 16], strides = [1, 1]} : vector<256x16xbf16> to vector<16x16xbf16>
    %c271 = arith.constant 271 : index
    %c0_23 = arith.constant 0 : index
    %43 = vector.load %arg6[%c271, %c0_23] : memref<552x16xbf16, #tpu.memory_space<vmem>>, vector<16x16xbf16>
    tpu.vector_store %arg6[%c271, %c0_23], %42 {strides = array<i32>} : memref<552x16xbf16, #tpu.memory_space<vmem>>, vector<16x16xbf16>,
    %44 = vector.extract_strided_slice %13 {offsets = [240, 0], sizes = [16, 16], strides = [1, 1]} : vector<256x16xbf16> to vector<16x16xbf16>
    %c289 = arith.constant 289 : index
    %c0_24 = arith.constant 0 : index
    %45 = vector.load %arg6[%c289, %c0_24] : memref<552x16xbf16, #tpu.memory_space<vmem>>, vector<16x16xbf16>
    tpu.vector_store %arg6[%c289, %c0_24], %44 {strides = array<i32>} : memref<552x16xbf16, #tpu.memory_space<vmem>>, vector<16x16xbf16>,
    %cst_25 = arith.constant 0.000000e+00 : f32
    %46 = vector.broadcast %cst_25 : f32 to vector<256x4xf32>
    %c0_26 = arith.constant 0 : index
    %c0_27 = arith.constant 0 : index
    %47 = vector.load %arg6[%c0_26, %c0_27] : memref<552x16xbf16, #tpu.memory_space<vmem>>, vector<256x16xbf16>
    %c0_28 = arith.constant 0 : index
    %c0_29 = arith.constant 0 : index
    %c0_30 = arith.constant 0 : index
    %c0_31 = arith.constant 0 : index
    %48 = vector.load %arg4[%c0_28, %c0_29, %c0_30, %c0_31] : memref<3x3x16x4xbf16, #tpu.memory_space<vmem>>, vector<1x1x16x4xbf16>
    %49 = vector.shape_cast %48 : vector<1x1x16x4xbf16> to vector<16x4xbf16>
    %cst_32 = arith.constant dense<0.000000e+00> : vector<256x4xf32>
    %50 = tpu.matmul %47, %49, %cst_32 {dimension_numbers = #tpu.dot_dimension_numbers<[1], [0], [0], [1], [0, 0, 1, 1], [], []>} : vector<256x16xbf16>, vector<16x4xbf16>, vector<256x4xf32> -> vector<256x4xf32>
    %51 = arith.addf %46, %50 : vector<256x4xf32>
    %c1 = arith.constant 1 : index
    %c0_33 = arith.constant 0 : index
    %52 = vector.load %arg6[%c1, %c0_33] : memref<552x16xbf16, #tpu.memory_space<vmem>>, vector<256x16xbf16>
    %c0_34 = arith.constant 0 : index
    %c1_35 = arith.constant 1 : index
    %c0_36 = arith.constant 0 : index
    %c0_37 = arith.constant 0 : index
    %53 = vector.load %arg4[%c0_34, %c1_35, %c0_36, %c0_37] : memref<3x3x16x4xbf16, #tpu.memory_space<vmem>>, vector<1x1x16x4xbf16>
    %54 = vector.shape_cast %53 : vector<1x1x16x4xbf16> to vector<16x4xbf16>
    %cst_38 = arith.constant dense<0.000000e+00> : vector<256x4xf32>
    %55 = tpu.matmul %52, %54, %cst_38 {dimension_numbers = #tpu.dot_dimension_numbers<[1], [0], [0], [1], [0, 0, 1, 1], [], []>} : vector<256x16xbf16>, vector<16x4xbf16>, vector<256x4xf32> -> vector<256x4xf32>
    %56 = arith.addf %51, %55 : vector<256x4xf32>
    %c2 = arith.constant 2 : index
    %c0_39 = arith.constant 0 : index
    %57 = vector.load %arg6[%c2, %c0_39] : memref<552x16xbf16, #tpu.memory_space<vmem>>, vector<256x16xbf16>
    %c0_40 = arith.constant 0 : index
    %c2_41 = arith.constant 2 : index
    %c0_42 = arith.constant 0 : index
    %c0_43 = arith.constant 0 : index
    %58 = vector.load %arg4[%c0_40, %c2_41, %c0_42, %c0_43] : memref<3x3x16x4xbf16, #tpu.memory_space<vmem>>, vector<1x1x16x4xbf16>
    %59 = vector.shape_cast %58 : vector<1x1x16x4xbf16> to vector<16x4xbf16>
    %cst_44 = arith.constant dense<0.000000e+00> : vector<256x4xf32>
    %60 = tpu.matmul %57, %59, %cst_44 {dimension_numbers = #tpu.dot_dimension_numbers<[1], [0], [0], [1], [0, 0, 1, 1], [], []>} : vector<256x16xbf16>, vector<16x4xbf16>, vector<256x4xf32> -> vector<256x4xf32>
    %61 = arith.addf %56, %60 : vector<256x4xf32>
    %c18 = arith.constant 18 : index
    %c0_45 = arith.constant 0 : index
    %62 = vector.load %arg6[%c18, %c0_45] : memref<552x16xbf16, #tpu.memory_space<vmem>>, vector<256x16xbf16>
    %c1_46 = arith.constant 1 : index
    %c0_47 = arith.constant 0 : index
    %c0_48 = arith.constant 0 : index
    %c0_49 = arith.constant 0 : index
    %63 = vector.load %arg4[%c1_46, %c0_47, %c0_48, %c0_49] : memref<3x3x16x4xbf16, #tpu.memory_space<vmem>>, vector<1x1x16x4xbf16>
    %64 = vector.shape_cast %63 : vector<1x1x16x4xbf16> to vector<16x4xbf16>
    %cst_50 = arith.constant dense<0.000000e+00> : vector<256x4xf32>
    %65 = tpu.matmul %62, %64, %cst_50 {dimension_numbers = #tpu.dot_dimension_numbers<[1], [0], [0], [1], [0, 0, 1, 1], [], []>} : vector<256x16xbf16>, vector<16x4xbf16>, vector<256x4xf32> -> vector<256x4xf32>
    %66 = arith.addf %61, %65 : vector<256x4xf32>
    %c19_51 = arith.constant 19 : index
    %c0_52 = arith.constant 0 : index
    %67 = vector.load %arg6[%c19_51, %c0_52] : memref<552x16xbf16, #tpu.memory_space<vmem>>, vector<256x16xbf16>
    %c1_53 = arith.constant 1 : index
    %c1_54 = arith.constant 1 : index
    %c0_55 = arith.constant 0 : index
    %c0_56 = arith.constant 0 : index
    %68 = vector.load %arg4[%c1_53, %c1_54, %c0_55, %c0_56] : memref<3x3x16x4xbf16, #tpu.memory_space<vmem>>, vector<1x1x16x4xbf16>
    %69 = vector.shape_cast %68 : vector<1x1x16x4xbf16> to vector<16x4xbf16>
    %cst_57 = arith.constant dense<0.000000e+00> : vector<256x4xf32>
    %70 = tpu.matmul %67, %69, %cst_57 {dimension_numbers = #tpu.dot_dimension_numbers<[1], [0], [0], [1], [0, 0, 1, 1], [], []>} : vector<256x16xbf16>, vector<16x4xbf16>, vector<256x4xf32> -> vector<256x4xf32>
    %71 = arith.addf %66, %70 : vector<256x4xf32>
    %c20 = arith.constant 20 : index
    %c0_58 = arith.constant 0 : index
    %72 = vector.load %arg6[%c20, %c0_58] : memref<552x16xbf16, #tpu.memory_space<vmem>>, vector<256x16xbf16>
    %c1_59 = arith.constant 1 : index
    %c2_60 = arith.constant 2 : index
    %c0_61 = arith.constant 0 : index
    %c0_62 = arith.constant 0 : index
    %73 = vector.load %arg4[%c1_59, %c2_60, %c0_61, %c0_62] : memref<3x3x16x4xbf16, #tpu.memory_space<vmem>>, vector<1x1x16x4xbf16>
    %74 = vector.shape_cast %73 : vector<1x1x16x4xbf16> to vector<16x4xbf16>
    %cst_63 = arith.constant dense<0.000000e+00> : vector<256x4xf32>
    %75 = tpu.matmul %72, %74, %cst_63 {dimension_numbers = #tpu.dot_dimension_numbers<[1], [0], [0], [1], [0, 0, 1, 1], [], []>} : vector<256x16xbf16>, vector<16x4xbf16>, vector<256x4xf32> -> vector<256x4xf32>
    %76 = arith.addf %71, %75 : vector<256x4xf32>
    %c36 = arith.constant 36 : index
    %c0_64 = arith.constant 0 : index
    %77 = vector.load %arg6[%c36, %c0_64] : memref<552x16xbf16, #tpu.memory_space<vmem>>, vector<256x16xbf16>
    %c2_65 = arith.constant 2 : index
    %c0_66 = arith.constant 0 : index
    %c0_67 = arith.constant 0 : index
    %c0_68 = arith.constant 0 : index
    %78 = vector.load %arg4[%c2_65, %c0_66, %c0_67, %c0_68] : memref<3x3x16x4xbf16, #tpu.memory_space<vmem>>, vector<1x1x16x4xbf16>
    %79 = vector.shape_cast %78 : vector<1x1x16x4xbf16> to vector<16x4xbf16>
    %cst_69 = arith.constant dense<0.000000e+00> : vector<256x4xf32>
    %80 = tpu.matmul %77, %79, %cst_69 {dimension_numbers = #tpu.dot_dimension_numbers<[1], [0], [0], [1], [0, 0, 1, 1], [], []>} : vector<256x16xbf16>, vector<16x4xbf16>, vector<256x4xf32> -> vector<256x4xf32>
    %81 = arith.addf %76, %80 : vector<256x4xf32>
    %c37_70 = arith.constant 37 : index
    %c0_71 = arith.constant 0 : index
    %82 = vector.load %arg6[%c37_70, %c0_71] : memref<552x16xbf16, #tpu.memory_space<vmem>>, vector<256x16xbf16>
    %c2_72 = arith.constant 2 : index
    %c1_73 = arith.constant 1 : index
    %c0_74 = arith.constant 0 : index
    %c0_75 = arith.constant 0 : index
    %83 = vector.load %arg4[%c2_72, %c1_73, %c0_74, %c0_75] : memref<3x3x16x4xbf16, #tpu.memory_space<vmem>>, vector<1x1x16x4xbf16>
    %84 = vector.shape_cast %83 : vector<1x1x16x4xbf16> to vector<16x4xbf16>
    %cst_76 = arith.constant dense<0.000000e+00> : vector<256x4xf32>
    %85 = tpu.matmul %82, %84, %cst_76 {dimension_numbers = #tpu.dot_dimension_numbers<[1], [0], [0], [1], [0, 0, 1, 1], [], []>} : vector<256x16xbf16>, vector<16x4xbf16>, vector<256x4xf32> -> vector<256x4xf32>
    %86 = arith.addf %81, %85 : vector<256x4xf32>
    %c38 = arith.constant 38 : index
    %c0_77 = arith.constant 0 : index
    %87 = vector.load %arg6[%c38, %c0_77] : memref<552x16xbf16, #tpu.memory_space<vmem>>, vector<256x16xbf16>
    %c2_78 = arith.constant 2 : index
    %c2_79 = arith.constant 2 : index
    %c0_80 = arith.constant 0 : index
    %c0_81 = arith.constant 0 : index
    %88 = vector.load %arg4[%c2_78, %c2_79, %c0_80, %c0_81] : memref<3x3x16x4xbf16, #tpu.memory_space<vmem>>, vector<1x1x16x4xbf16>
    %89 = vector.shape_cast %88 : vector<1x1x16x4xbf16> to vector<16x4xbf16>
    %cst_82 = arith.constant dense<0.000000e+00> : vector<256x4xf32>
    %90 = tpu.matmul %87, %89, %cst_82 {dimension_numbers = #tpu.dot_dimension_numbers<[1], [0], [0], [1], [0, 0, 1, 1], [], []>} : vector<256x16xbf16>, vector<16x4xbf16>, vector<256x4xf32> -> vector<256x4xf32>
    %91 = arith.addf %86, %90 : vector<256x4xf32>
    %c0_83 = arith.constant 0 : index
    %c0_84 = arith.constant 0 : index
    %c0_85 = arith.constant 0 : index
    %92 = vector.load %arg5[%c0_83, %c0_84, %c0_85] : memref<1x512x4xf32, #tpu.memory_space<vmem>>, vector<1x256x4xf32>
    %93 = vector.shape_cast %92 : vector<1x256x4xf32> to vector<256x4xf32>
    %94 = vector.shape_cast %91 : vector<256x4xf32> to vector<1x256x4xf32>
    tpu.vector_store %arg5[%c0_83, %c0_84, %c0_85], %94 {strides = array<i32>} : memref<1x512x4xf32, #tpu.memory_space<vmem>>, vector<1x256x4xf32>,
    %cst_86 = arith.constant 0.000000e+00 : f32
    %95 = vector.broadcast %cst_86 : f32 to vector<256x4xf32>
    %c256 = arith.constant 256 : index
    %c0_87 = arith.constant 0 : index
    %96 = vector.load %arg6[%c256, %c0_87] : memref<552x16xbf16, #tpu.memory_space<vmem>>, vector<256x16xbf16>
    %c0_88 = arith.constant 0 : index
    %c0_89 = arith.constant 0 : index
    %c0_90 = arith.constant 0 : index
    %c0_91 = arith.constant 0 : index
    %97 = vector.load %arg4[%c0_88, %c0_89, %c0_90, %c0_91] : memref<3x3x16x4xbf16, #tpu.memory_space<vmem>>, vector<1x1x16x4xbf16>
    %98 = vector.shape_cast %97 : vector<1x1x16x4xbf16> to vector<16x4xbf16>
    %cst_92 = arith.constant dense<0.000000e+00> : vector<256x4xf32>
    %99 = tpu.matmul %96, %98, %cst_92 {dimension_numbers = #tpu.dot_dimension_numbers<[1], [0], [0], [1], [0, 0, 1, 1], [], []>} : vector<256x16xbf16>, vector<16x4xbf16>, vector<256x4xf32> -> vector<256x4xf32>
    %100 = arith.addf %95, %99 : vector<256x4xf32>
    %c257 = arith.constant 257 : index
    %c0_93 = arith.constant 0 : index
    %101 = vector.load %arg6[%c257, %c0_93] : memref<552x16xbf16, #tpu.memory_space<vmem>>, vector<256x16xbf16>
    %c0_94 = arith.constant 0 : index
    %c1_95 = arith.constant 1 : index
    %c0_96 = arith.constant 0 : index
    %c0_97 = arith.constant 0 : index
    %102 = vector.load %arg4[%c0_94, %c1_95, %c0_96, %c0_97] : memref<3x3x16x4xbf16, #tpu.memory_space<vmem>>, vector<1x1x16x4xbf16>
    %103 = vector.shape_cast %102 : vector<1x1x16x4xbf16> to vector<16x4xbf16>
    %cst_98 = arith.constant dense<0.000000e+00> : vector<256x4xf32>
    %104 = tpu.matmul %101, %103, %cst_98 {dimension_numbers = #tpu.dot_dimension_numbers<[1], [0], [0], [1], [0, 0, 1, 1], [], []>} : vector<256x16xbf16>, vector<16x4xbf16>, vector<256x4xf32> -> vector<256x4xf32>
    %105 = arith.addf %100, %104 : vector<256x4xf32>
    %c258 = arith.constant 258 : index
    %c0_99 = arith.constant 0 : index
    %106 = vector.load %arg6[%c258, %c0_99] : memref<552x16xbf16, #tpu.memory_space<vmem>>, vector<256x16xbf16>
    %c0_100 = arith.constant 0 : index
    %c2_101 = arith.constant 2 : index
    %c0_102 = arith.constant 0 : index
    %c0_103 = arith.constant 0 : index
    %107 = vector.load %arg4[%c0_100, %c2_101, %c0_102, %c0_103] : memref<3x3x16x4xbf16, #tpu.memory_space<vmem>>, vector<1x1x16x4xbf16>
    %108 = vector.shape_cast %107 : vector<1x1x16x4xbf16> to vector<16x4xbf16>
    %cst_104 = arith.constant dense<0.000000e+00> : vector<256x4xf32>
    %109 = tpu.matmul %106, %108, %cst_104 {dimension_numbers = #tpu.dot_dimension_numbers<[1], [0], [0], [1], [0, 0, 1, 1], [], []>} : vector<256x16xbf16>, vector<16x4xbf16>, vector<256x4xf32> -> vector<256x4xf32>
    %110 = arith.addf %105, %109 : vector<256x4xf32>
    %c274 = arith.constant 274 : index
    %c0_105 = arith.constant 0 : index
    %111 = vector.load %arg6[%c274, %c0_105] : memref<552x16xbf16, #tpu.memory_space<vmem>>, vector<256x16xbf16>
    %c1_106 = arith.constant 1 : index
    %c0_107 = arith.constant 0 : index
    %c0_108 = arith.constant 0 : index
    %c0_109 = arith.constant 0 : index
    %112 = vector.load %arg4[%c1_106, %c0_107, %c0_108, %c0_109] : memref<3x3x16x4xbf16, #tpu.memory_space<vmem>>, vector<1x1x16x4xbf16>
    %113 = vector.shape_cast %112 : vector<1x1x16x4xbf16> to vector<16x4xbf16>
    %cst_110 = arith.constant dense<0.000000e+00> : vector<256x4xf32>
    %114 = tpu.matmul %111, %113, %cst_110 {dimension_numbers = #tpu.dot_dimension_numbers<[1], [0], [0], [1], [0, 0, 1, 1], [], []>} : vector<256x16xbf16>, vector<16x4xbf16>, vector<256x4xf32> -> vector<256x4xf32>
    %115 = arith.addf %110, %114 : vector<256x4xf32>
    %c275 = arith.constant 275 : index
    %c0_111 = arith.constant 0 : index
    %116 = vector.load %arg6[%c275, %c0_111] : memref<552x16xbf16, #tpu.memory_space<vmem>>, vector<256x16xbf16>
    %c1_112 = arith.constant 1 : index
    %c1_113 = arith.constant 1 : index
    %c0_114 = arith.constant 0 : index
    %c0_115 = arith.constant 0 : index
    %117 = vector.load %arg4[%c1_112, %c1_113, %c0_114, %c0_115] : memref<3x3x16x4xbf16, #tpu.memory_space<vmem>>, vector<1x1x16x4xbf16>
    %118 = vector.shape_cast %117 : vector<1x1x16x4xbf16> to vector<16x4xbf16>
    %cst_116 = arith.constant dense<0.000000e+00> : vector<256x4xf32>
    %119 = tpu.matmul %116, %118, %cst_116 {dimension_numbers = #tpu.dot_dimension_numbers<[1], [0], [0], [1], [0, 0, 1, 1], [], []>} : vector<256x16xbf16>, vector<16x4xbf16>, vector<256x4xf32> -> vector<256x4xf32>
    %120 = arith.addf %115, %119 : vector<256x4xf32>
    %c276 = arith.constant 276 : index
    %c0_117 = arith.constant 0 : index
    %121 = vector.load %arg6[%c276, %c0_117] : memref<552x16xbf16, #tpu.memory_space<vmem>>, vector<256x16xbf16>
    %c1_118 = arith.constant 1 : index
    %c2_119 = arith.constant 2 : index
    %c0_120 = arith.constant 0 : index
    %c0_121 = arith.constant 0 : index
    %122 = vector.load %arg4[%c1_118, %c2_119, %c0_120, %c0_121] : memref<3x3x16x4xbf16, #tpu.memory_space<vmem>>, vector<1x1x16x4xbf16>
    %123 = vector.shape_cast %122 : vector<1x1x16x4xbf16> to vector<16x4xbf16>
    %cst_122 = arith.constant dense<0.000000e+00> : vector<256x4xf32>
    %124 = tpu.matmul %121, %123, %cst_122 {dimension_numbers = #tpu.dot_dimension_numbers<[1], [0], [0], [1], [0, 0, 1, 1], [], []>} : vector<256x16xbf16>, vector<16x4xbf16>, vector<256x4xf32> -> vector<256x4xf32>
    %125 = arith.addf %120, %124 : vector<256x4xf32>
    %c292 = arith.constant 292 : index
    %c0_123 = arith.constant 0 : index
    %126 = vector.load %arg6[%c292, %c0_123] : memref<552x16xbf16, #tpu.memory_space<vmem>>, vector<256x16xbf16>
    %c2_124 = arith.constant 2 : index
    %c0_125 = arith.constant 0 : index
    %c0_126 = arith.constant 0 : index
    %c0_127 = arith.constant 0 : index
    %127 = vector.load %arg4[%c2_124, %c0_125, %c0_126, %c0_127] : memref<3x3x16x4xbf16, #tpu.memory_space<vmem>>, vector<1x1x16x4xbf16>
    %128 = vector.shape_cast %127 : vector<1x1x16x4xbf16> to vector<16x4xbf16>
    %cst_128 = arith.constant dense<0.000000e+00> : vector<256x4xf32>
    %129 = tpu.matmul %126, %128, %cst_128 {dimension_numbers = #tpu.dot_dimension_numbers<[1], [0], [0], [1], [0, 0, 1, 1], [], []>} : vector<256x16xbf16>, vector<16x4xbf16>, vector<256x4xf32> -> vector<256x4xf32>
    %130 = arith.addf %125, %129 : vector<256x4xf32>
    %c293 = arith.constant 293 : index
    %c0_129 = arith.constant 0 : index
    %131 = vector.load %arg6[%c293, %c0_129] : memref<552x16xbf16, #tpu.memory_space<vmem>>, vector<256x16xbf16>
    %c2_130 = arith.constant 2 : index
    %c1_131 = arith.constant 1 : index
    %c0_132 = arith.constant 0 : index
    %c0_133 = arith.constant 0 : index
    %132 = vector.load %arg4[%c2_130, %c1_131, %c0_132, %c0_133] : memref<3x3x16x4xbf16, #tpu.memory_space<vmem>>, vector<1x1x16x4xbf16>
    %133 = vector.shape_cast %132 : vector<1x1x16x4xbf16> to vector<16x4xbf16>
    %cst_134 = arith.constant dense<0.000000e+00> : vector<256x4xf32>
    %134 = tpu.matmul %131, %133, %cst_134 {dimension_numbers = #tpu.dot_dimension_numbers<[1], [0], [0], [1], [0, 0, 1, 1], [], []>} : vector<256x16xbf16>, vector<16x4xbf16>, vector<256x4xf32> -> vector<256x4xf32>
    %135 = arith.addf %130, %134 : vector<256x4xf32>
    %c294 = arith.constant 294 : index
    %c0_135 = arith.constant 0 : index
    %136 = vector.load %arg6[%c294, %c0_135] : memref<552x16xbf16, #tpu.memory_space<vmem>>, vector<256x16xbf16>
    %c2_136 = arith.constant 2 : index
    %c2_137 = arith.constant 2 : index
    %c0_138 = arith.constant 0 : index
    %c0_139 = arith.constant 0 : index
    %137 = vector.load %arg4[%c2_136, %c2_137, %c0_138, %c0_139] : memref<3x3x16x4xbf16, #tpu.memory_space<vmem>>, vector<1x1x16x4xbf16>
    %138 = vector.shape_cast %137 : vector<1x1x16x4xbf16> to vector<16x4xbf16>
    %cst_140 = arith.constant dense<0.000000e+00> : vector<256x4xf32>
    %139 = tpu.matmul %136, %138, %cst_140 {dimension_numbers = #tpu.dot_dimension_numbers<[1], [0], [0], [1], [0, 0, 1, 1], [], []>} : vector<256x16xbf16>, vector<16x4xbf16>, vector<256x4xf32> -> vector<256x4xf32>
    %140 = arith.addf %135, %139 : vector<256x4xf32>
    %c0_141 = arith.constant 0 : index
    %c256_142 = arith.constant 256 : index
    %c0_143 = arith.constant 0 : index
    %141 = vector.load %arg5[%c0_141, %c256_142, %c0_143] : memref<1x512x4xf32, #tpu.memory_space<vmem>>, vector<1x256x4xf32>
    %142 = vector.shape_cast %141 : vector<1x256x4xf32> to vector<256x4xf32>
    %143 = vector.shape_cast %140 : vector<256x4xf32> to vector<1x256x4xf32>
    tpu.vector_store %arg5[%c0_141, %c256_142, %c0_143], %143 {strides = array<i32>} : memref<1x512x4xf32, #tpu.memory_space<vmem>>, vector<1x256x4xf32>,
    return
  }
  func.func @transform_0(%arg0: i32) -> (i32, i32, i32) {
    %c0_i32 = arith.constant 0 : i32
    %c0_i32_0 = arith.constant 0 : i32
    %c0_i32_1 = arith.constant 0 : i32
    return %arg0, %c0_i32, %c0_i32_0 : i32, i32, i32
  }
  func.func @transform_1(%arg0: i32) -> (i32, i32) {
    %c0_i32 = arith.constant 0 : i32
    %c0_i32_0 = arith.constant 0 : i32
    %c0_i32_1 = arith.constant 0 : i32
    return %c0_i32, %c0_i32_0 : i32, i32
  }
  func.func @transform_2(%arg0: i32) -> (i32, i32) {
    %c0_i32 = arith.constant 0 : i32
    %c0_i32_0 = arith.constant 0 : i32
    %c0_i32_1 = arith.constant 0 : i32
    return %c0_i32, %c0_i32_0 : i32, i32
  }
  func.func @transform_3(%arg0: i32) -> (i32, i32, i32, i32) {
    %c0_i32 = arith.constant 0 : i32
    %c0_i32_0 = arith.constant 0 : i32
    %c0_i32_1 = arith.constant 0 : i32
    %c0_i32_2 = arith.constant 0 : i32
    %c0_i32_3 = arith.constant 0 : i32
    return %c0_i32, %c0_i32_0, %c0_i32_1, %c0_i32_2 : i32, i32, i32, i32
  }
  func.func @transform_4(%arg0: i32) -> (i32, i32, i32) {
    %c0_i32 = arith.constant 0 : i32
    %c0_i32_0 = arith.constant 0 : i32
    %c0_i32_1 = arith.constant 0 : i32
    return %arg0, %c0_i32, %c0_i32_0 : i32, i32, i32
  }
}

</mosaic_0001>

<bundles_post_ra>
// kernel: bottleneck_forward.2
= control target key start
LH: loop header
LB: loop body
LE: loop exit
PB: predicated region body
PF: predicated region fallthrough
CT: control target
= control target key end

     0   :  { %s1230_s18 = smov 0   ;;  %s1617_s0 = inlined_call_operand.vmem [shape: f32[512,4], index: 0, kind: input, shape index: {}]   ;;  %s1618_s1 = inlined_call_operand.vmem [shape: f32[1,4], index: 1, kind: input, shape index: {}]   ;;  %s1619_s2 = inlined_call_operand.vmem [shape: f32[1,4], index: 2, kind: input, shape index: {}]   ;;  %s1620_s3 = inlined_call_operand.vmem [shape: bf16[4,16], index: 3, kind: input, shape index: {}]   ;;  %s1621_s4 = inlined_call_operand.vmem [shape: bf16[512,16], index: 4, kind: output, shape index: {0}]   ;;  %s1622_s5 = inlined_call_operand.vmem [shape: f32[2,2,16], index: 5, kind: output, shape index: {1}]  }
   0x1 LB: > { %s1236_s19 = sadd.s32 4294967295, %s1198_s18   ;;  %p1039_p0 = scmp.ge.s32.totalorder %s1198_s18, 1  ;;  %s1198_s18 = sphi %s1230_s18, %s16_s18  }
   0x2   : > { %p191_p1 = scmp.lt.s32.totalorder %s1198_s18, 3 }
   0x4   : > { %p192_p2 = pnand %p1039_p0, %p191_p1 }
   0x5   : > { %v398_v0 = vld [vmem:[%s1620_s3] sm:$0x3] (!%p192_p2)  ;;  %vm448_vm0 = vcmask (!%p192_p2), 1041408   ;;  %s1040_s22 = sshll.u32 (!%p192_p2), %s1236_s19, 5  ;;  %vm399_vm1 = vcmask (!%p192_p2), 31744   ;;  %vm741_vm2 = vcmask (!%p192_p2), 125952  }
   0x6   : > { %195 = sbr.rel (%p192_p2) target bundleno = 319 (0x13f), region = 36  ;;  %1182 = vmatprep.subr.msk.bf16.mxu0 (!%p192_p2), %vm448_vm0, %v398_v0  ;;  %v450_v1 = vsel (!%p192_p2), %vm448_vm0, %v398_v0, 0  ;;  %p224_p3 = scmp.lt.s32.totalorder (!%p192_p2), %s1040_s22, 63  ;;  %1183 = vmatprep.subr.msk.bf16.mxu1 (!%p192_p2), %vm448_vm0, %v398_v0  ;;  %v1250_v2 = vld [vmem:[%s1618_s1] ss:$0 sm:$0xff] (!%p192_p2)  ;;  %vm774_vm3 = vcmask (!%p192_p2), 130048  }
   0x7   : > { %1147 = vmatpush3.bf16.msra.mxu0 (!%p192_p2), %v450_v1  ;;  %1181 = vmatpush3.bf16.msra.mxu1 (!%p192_p2), %v450_v1  ;;  %v1260_v3 = vld [vmem:[%s1619_s2] ss:$0 sm:$0xff] (!%p192_p2)  ;;  %p235_p4 = scmp.lt.s32.totalorder (!%p192_p2), %s1236_s19, 1  ;;  %vm844_vm4 = vcmask (!%p192_p2), 122880  }
   0xd   : > { %s1624_s22 = smov (!%p224_p3, %s1040_s22), 63  ;;  %s1626_s19 = smov (!%p235_p4, %s1236_s19), 1 }
   0xe   : > { %s1041_s23 = sshll.u32 %s1624_s22, 3  ;;  %s1043_s6 = sshll.u32 %s1624_s22, 2 }
   0xf   : > { %s1255_s28 = scalar_lea.vmem %s1617_s0, %s1041_s23  ;;  %s1381_s9 = scalar_lea.vmem %s1621_s4, %s1043_s6 }
  0x10   : > { %v240_v4 = vld [vmem:[%s1255_s28] sm:$0xff]  ;;  %v241_v5 = vld [vmem:[%s1255_s28 + $0x8] sm:$0xff]  ;;  %v242_v6 = vld [vmem:[%s1255_s28 + $0x10] sm:$0xff]  ;;  %s1044_s10 = sshll.u32 %s1626_s19, 1 }
  0x11   : > { %v279_v7 = vmul.f32 %v1250_v2, %v240_v4  ;;  %v280_v8 = vmul.f32 %v1250_v2, %v241_v5  ;;  %v243_v9 = vld [vmem:[%s1255_s28 + $0x18] sm:$0xff]  ;;  %v281_v10 = vmul.f32 %v1250_v2, %v242_v6  ;;  %v244_v11 = vld [vmem:[%s1255_s28 + $0x20] sm:$0xff]  ;;  %v245_v12 = vld [vmem:[%s1255_s28 + $0x28] sm:$0xff]  ;;  %s238_s13 = scalar_lea.vmem %s1622_s5, %s1044_s10 }
  0x12   : > { %v282_v13 = vmul.f32 %v1250_v2, %v243_v9  ;;  %v283_v14 = vmul.f32 %v1250_v2, %v244_v11  ;;  %v284_v15 = vmul.f32 %v1250_v2, %v245_v12  ;;  %v246_v16 = vld [vmem:[%s1255_s28 + $0x30] sm:$0xff]  ;;  %v247_v17 = vld [vmem:[%s1255_s28 + $0x38] sm:$0xff]  ;;  %v248_v26 = vld [vmem:[%s1255_s28 + $0x40] sm:$0xff] }
  0x13   : > { %v318_v18 = vadd.f32 %v1260_v3, %v279_v7  ;;  %v319_v19 = vadd.f32 %v1260_v3, %v280_v8  ;;  %v320_v20 = vadd.f32 %v1260_v3, %v281_v10  ;;  %v285_v21 = vmul.f32 %v1250_v2, %v246_v16  ;;  %v249_v27 = vld [vmem:[%s1255_s28 + $0x48] sm:$0xff]  ;;  %v250_v32 = vld [vmem:[%s1255_s28 + $0x50] sm:$0xff]  ;;  %v251_v37 = vld [vmem:[%s1255_s28 + $0x58] sm:$0xff] }
  0x14   : > { %v321_v22 = vadd.f32 %v1260_v3, %v282_v13  ;;  %v322_v23 = vadd.f32 %v1260_v3, %v283_v14  ;;  %v323_v24 = vadd.f32 %v1260_v3, %v284_v15  ;;  %v286_v25 = vmul.f32 %v1250_v2, %v247_v17  ;;  %v252_v38 = vld [vmem:[%s1255_s28 + $0x60] sm:$0xff]  ;;  %v253_v43 = vld [vmem:[%s1255_s28 + $0x68] sm:$0xff]  ;;  %v254_v44 = vld [vmem:[%s1255_s28 + $0x70] sm:$0xff] }
  0x15   : > { %v350_v28 = vmax.f32 %v318_v18, 0.0  ;;  %v351_v29 = vmax.f32 %v319_v19, 0.0  ;;  %v352_v30 = vmax.f32 %v320_v20, 0.0  ;;  %v324_v31 = vadd.f32 %v1260_v3, %v285_v21  ;;  %v255_v53 = vld [vmem:[%s1255_s28 + $0x78] sm:$0xff]  ;;  %v256_v57 = vld [vmem:[%s1255_s28 + $0x80] sm:$0xff]  ;;  %v257_v62 = vld [vmem:[%s1255_s28 + $0x88] sm:$0xff] }
  0x16   : > { %v353_v33 = vmax.f32 %v321_v22, 0.0  ;;  %v354_v34 = vmax.f32 %v322_v23, 0.0  ;;  %v355_v35 = vmax.f32 %v323_v24, 0.0  ;;  %v325_v36 = vadd.f32 %v1260_v3, %v286_v25  ;;  %v258_v1 = vld [vmem:[%s1255_s28 + $0x90] sm:$0xff]  ;;  %v259_v4 = vld [vmem:[%s1255_s28 + $0x98] sm:$0xff]  ;;  %v260_v8 = vld [vmem:[%s1255_s28 + $0xa0] sm:$0xff] }
  0x17   : > { %v382_v39 = vpack.c.bf16 %v351_v29, %v350_v28  ;;  %v356_v40 = vmax.f32 %v324_v31, 0.0  ;;  %v287_v41 = vmul.f32 %v1250_v2, %v248_v26  ;;  %v288_v42 = vmul.f32 %v1250_v2, %v249_v27  ;;  %v261_v13 = vld [vmem:[%s1255_s28 + $0xa8] sm:$0xff]  ;;  %v262_v18 = vld [vmem:[%s1255_s28 + $0xb0] sm:$0xff]  ;;  %v263_v23 = vld [vmem:[%s1255_s28 + $0xb8] sm:$0xff] }
  0x18   : > { %v383_v45 = vpack.c.bf16 %v353_v33, %v352_v30  ;;  %v384_v46 = vpack.c.bf16 %v355_v35, %v354_v34  ;;  %v357_v47 = vmax.f32 %v325_v36, 0.0  ;;  %v289_v48 = vmul.f32 %v1250_v2, %v250_v32  ;;  %v264_v28 = vld [vmem:[%s1255_s28 + $0xc0] sm:$0xff]  ;;  %v265_v33 = vld [vmem:[%s1255_s28 + $0xc8] sm:$0xff] }
  0x19   : > { %1148 = vmatprep.mubr.msk.bf16.mxu0 %vm399_vm1, %v382_v39  ;;  %v326_v49 = vadd.f32 %v1260_v3, %v287_v41  ;;  %v327_v50 = vadd.f32 %v1260_v3, %v288_v42  ;;  %v290_v51 = vmul.f32 %v1250_v2, %v251_v37  ;;  %v291_v52 = vmul.f32 %v1250_v2, %v252_v38  ;;  %v266_v38 = vld [vmem:[%s1255_s28 + $0xd0] sm:$0xff] }
  0x1a   : > { %1149 = vmatmul.mubr.msk.bf16.vlgmr.msra.gmra.mrb[0].mxu0 %vm399_vm1, %v383_v45  ;;  %v328_v54 = vadd.f32 %v1260_v3, %v289_v48  ;;  %v292_v55 = vmul.f32 %v1250_v2, %v253_v43  ;;  %v293_v56 = vmul.f32 %v1250_v2, %v254_v44  ;;  %v294_v0 = vmul.f32 %v1250_v2, %v255_v53  ;;  %v267_v43 = vld [vmem:[%s1255_s28 + $0xd8] sm:$0xff]  ;;  %v268_v48 = vld [vmem:[%s1255_s28 + $0xe0] sm:$0xff] }
  0x1b   : > { %1152 = vmatprep.mubr.msk.bf16.mxu0 %vm399_vm1, %v384_v46  ;;  %v358_v58 = vmax.f32 %v326_v49, 0.0  ;;  %v359_v59 = vmax.f32 %v327_v50, 0.0  ;;  %v329_v60 = vadd.f32 %v1260_v3, %v290_v51  ;;  %v330_v61 = vadd.f32 %v1260_v3, %v291_v52  ;;  %v269_v49 = vld [vmem:[%s1255_s28 + $0xe8] sm:$0xff] }
  0x1c   : > { %v331_v63 = vadd.f32 %v1260_v3, %v292_v55  ;;  %v385_v5 = vpack.c.bf16 %v357_v47, %v356_v40  ;;  %v360_v6 = vmax.f32 %v328_v54, 0.0  ;;  %v295_v7 = vmul.f32 %v1250_v2, %v256_v57 }
  0x1d   : > { %v386_v9 = vpack.c.bf16 %v359_v59, %v358_v58  ;;  %v361_v10 = vmax.f32 %v329_v60, 0.0  ;;  %v1318_v11 = vadd.f32 %v1260_v3, %v293_v56  ;;  %v296_v12 = vmul.f32 %v1250_v2, %v257_v62 }
  0x1e   : > { %v362_v14 = vmax.f32 %v330_v61, 0.0  ;;  %v334_v15 = vadd.f32 %v1260_v3, %v295_v7  ;;  %v297_v16 = vmul.f32 %v1250_v2, %v258_v1  ;;  %v298_v17 = vmul.f32 %v1250_v2, %v259_v4 }
  0x1f   : > { %v363_v19 = vmax.f32 %v331_v63, 0.0  ;;  %v333_v20 = vadd.f32 %v1260_v3, %v294_v0  ;;  %v335_v21 = vadd.f32 %v1260_v3, %v296_v12  ;;  %v299_v22 = vmul.f32 %v1250_v2, %v260_v8  ;;  %v270_v8 = vld [vmem:[%s1255_s28 + $0xf0] sm:$0xff] }
  0x20   : > { %v366_v24 = vmax.f32 %v334_v15, 0.0  ;;  %v336_v25 = vadd.f32 %v1260_v3, %v297_v16  ;;  %v337_v26 = vadd.f32 %v1260_v3, %v298_v17  ;;  %v300_v27 = vmul.f32 %v1250_v2, %v261_v13 }
  0x21   : > { %v387_v29 = vpack.c.bf16 %v361_v10, %v360_v6  ;;  %v367_v30 = vmax.f32 %v335_v21, 0.0  ;;  %v338_v31 = vadd.f32 %v1260_v3, %v299_v22  ;;  %v301_v32 = vmul.f32 %v1250_v2, %v262_v18 }
  0x22   : > { %1153 = vmatmul.mubr.msk.bf16.gmra.mrb[4].mxu0 %vm399_vm1, %v385_v5  ;;  %v368_v34 = vmax.f32 %v336_v25, 0.0  ;;  %v369_v35 = vmax.f32 %v337_v26, 0.0  ;;  %v339_v36 = vadd.f32 %v1260_v3, %v300_v27  ;;  %v302_v37 = vmul.f32 %v1250_v2, %v263_v23 }
  0x23   : > { %1156 = vmatprep.mubr.msk.bf16.mxu0 %vm399_vm1, %v386_v9  ;;  %v390_v39 = vpack.c.bf16 %v367_v30, %v366_v24  ;;  %v370_v40 = vmax.f32 %v338_v31, 0.0  ;;  %v340_v41 = vadd.f32 %v1260_v3, %v301_v32  ;;  %v303_v42 = vmul.f32 %v1250_v2, %v264_v28  ;;  %v271_v9 = vld [vmem:[%s1255_s28 + $0xf8] sm:$0xff] }
  0x24   : > { %v391_v44 = vpack.c.bf16 %v369_v35, %v368_v34  ;;  %v371_v45 = vmax.f32 %v339_v36, 0.0  ;;  %v341_v46 = vadd.f32 %v1260_v3, %v302_v37  ;;  %v304_v47 = vmul.f32 %v1250_v2, %v265_v33 }
  0x25   : > { %v388_v50 = vpack.c.bf16 %v363_v19, %v362_v14  ;;  %1164 = vmatprep.mubr.msk.bf16.mxu1 %vm399_vm1, %v390_v39  ;;  %v372_v51 = vmax.f32 %v340_v41, 0.0  ;;  %v342_v52 = vadd.f32 %v1260_v3, %v303_v42  ;;  %v305_v53 = vmul.f32 %v1250_v2, %v266_v38 }
  0x26   : > { %1165 = vmatmul.mubr.msk.bf16.vlgmr.msra.gmra.mrb[0].mxu1 %vm399_vm1, %v391_v44  ;;  %v392_v54 = vpack.c.bf16 %v371_v45, %v370_v40  ;;  %v373_v55 = vmax.f32 %v341_v46, 0.0  ;;  %v343_v56 = vadd.f32 %v1260_v3, %v304_v47  ;;  %v306_v57 = vmul.f32 %v1250_v2, %v267_v43 }
  0x27   : > { %v374_v58 = vmax.f32 %v342_v52, 0.0  ;;  %v307_v59 = vmul.f32 %v1250_v2, %v268_v48  ;;  %v308_v60 = vmul.f32 %v1250_v2, %v269_v49  ;;  %v364_v62 = vmax.f32 %v1318_v11, 0.0 }
  0x28   : > { %1168 = vmatprep.mubr.msk.bf16.mxu1 %vm399_vm1, %v392_v54  ;;  %v375_v61 = vmax.f32 %v343_v56, 0.0  ;;  %v365_v63 = vmax.f32 %v333_v20, 0.0  ;;  %v393_v0 = vpack.c.bf16 %v373_v55, %v372_v51  ;;  %v344_v1 = vadd.f32 %v1260_v3, %v305_v53 }
  0x29   : > { %v345_v4 = vadd.f32 %v1260_v3, %v306_v57  ;;  %v346_v6 = vadd.f32 %v1260_v3, %v307_v59  ;;  %v347_v7 = vadd.f32 %v1260_v3, %v308_v60  ;;  %v309_v13 = vmul.f32 %v1250_v2, %v270_v8 }
  0x2a   : > { %1157 = vmatmul.mubr.msk.bf16.gmra.mrb[8].mxu0 %vm399_vm1, %v387_v29  ;;  %v394_v5 = vpack.c.bf16 %v375_v61, %v374_v58  ;;  %v389_v10 = vpack.c.bf16 %v365_v63, %v364_v62  ;;  %v376_v12 = vmax.f32 %v344_v1, 0.0  ;;  %v310_v14 = vmul.f32 %v1250_v2, %v271_v9 }
  0x2b   : > { %1160 = vmatprep.mubr.msk.bf16.mxu0 %vm399_vm1, %v388_v50  ;;  %v377_v11 = vmax.f32 %v345_v4, 0.0  ;;  %v378_v15 = vmax.f32 %v346_v6, 0.0  ;;  %v379_v16 = vmax.f32 %v347_v7, 0.0  ;;  %v348_v18 = vadd.f32 %v1260_v3, %v309_v13 }
  0x2c   : > { %v349_v19 = vadd.f32 %v1260_v3, %v310_v14 }
  0x2d   : > { %v395_v17 = vpack.c.bf16 %v377_v11, %v376_v12  ;;  %v396_v20 = vpack.c.bf16 %v379_v16, %v378_v15  ;;  %v380_v21 = vmax.f32 %v348_v18, 0.0 }
  0x2e   : > { %1169 = vmatmul.mubr.msk.bf16.gmra.mrb[4].mxu1 %vm399_vm1, %v393_v0  ;;  %v381_v22 = vmax.f32 %v349_v19, 0.0 }
  0x2f   : > { %1172 = vmatprep.mubr.msk.bf16.mxu1 %vm399_vm1, %v394_v5 }
  0x30   : > { %v397_v23 = vpack.c.bf16 %v381_v22, %v380_v21 }
  0x32   : > { %1161 = vmatmul.mubr.msk.bf16.gmra.mrb[12].mxu0 %vm399_vm1, %v389_v10 }
  0x36   : > { %1173 = vmatmul.mubr.msk.bf16.gmra.mrb[8].mxu1 %vm399_vm1, %v395_v17 }
  0x37   : > { %1176 = vmatprep.mubr.msk.bf16.mxu1 %vm399_vm1, %v396_v20 }
  0x3e   : > { %1177 = vmatmul.mubr.msk.bf16.gmra.mrb[12].mxu1 %vm399_vm1, %v397_v23 }
  0xed   : > { %v1150_v2 = vpop.f32.mrb[0].mxu0 }
  0xee   : > { %v1099_v3 = vpack.c.bf16 %v1150_v2, %v1150_v2  ;;  %v486_v24 = vpop.f32.mrb[1].mxu0  ;;  %v848_v28 = vmul.f32 %v1150_v2, %v1150_v2  ;;  %v778_v37 = vsel %vm774_vm3, %v1150_v2, 0.0 }
  0xef   : > { %v1097_v25 = vpack.c.bf16 %v486_v24, %v486_v24  ;;  %v846_v26 = vmul.f32 %v486_v24, %v486_v24  ;;  %v1151_v27 = vpop.f32.mrb[2].mxu0  ;;  %v775_v31 = vsel %vm774_vm3, %v486_v24, 0.0 }
  0xf0   : > { %744 = vst.msk [vmem:[%s1381_s9 + $0x8] sm:$0xf] %vm741_vm2, %v1099_v3  ;;  %v1100_v29 = vpack.c.bf16 %v1151_v27, %v1151_v27  ;;  %v489_v30 = vpop.f32.mrb[3].mxu0  ;;  %v849_v35 = vmul.f32 %v1151_v27, %v1151_v27  ;;  %v881_v42 = vsel %vm774_vm3, %v848_v28, 0.0  ;;  %v780_v44 = vsel %vm774_vm3, %v1151_v27, 0.0 }
  0xf1   : > { %742 = vst.msk [vmem:[%s1381_s9] sm:$0xf] %vm741_vm2, %v1097_v25  ;;  %v1098_v32 = vpack.c.bf16 %v489_v30, %v489_v30  ;;  %v776_v33 = vsel %vm774_vm3, %v489_v30, 0.0  ;;  %v847_v34 = vmul.f32 %v489_v30, %v489_v30  ;;  %v878_v38 = vsel %vm774_vm3, %v846_v26, 0.0 }
  0xf2   : > { %745 = vst.msk [vmem:[%s1381_s9 + $0xc] sm:$0xf] %vm741_vm2, %v1100_v29  ;;  %v777_v36 = vadd.f32 %v776_v33, %v775_v31  ;;  %v883_v45 = vsel %vm774_vm3, %v849_v35, 0.0 }
  0xf3   : > { %743 = vst.msk [vmem:[%s1381_s9 + $0x4] sm:$0xf] %vm741_vm2, %v1098_v32  ;;  %v879_v39 = vsel %vm774_vm3, %v847_v34, 0.0 }
  0xf4   : > { %v779_v40 = vadd.f32 %v778_v37, %v777_v36  ;;  %v880_v41 = vadd.f32 %v879_v39, %v878_v38 }
  0xf5   : > { %v1154_v43 = vpop.f32.mrb[4].mxu0 }
  0xf6   : > { %v882_v46 = vadd.f32 %v881_v42, %v880_v41  ;;  %v1103_v47 = vpack.c.bf16 %v1154_v43, %v1154_v43  ;;  %v502_v48 = vpop.f32.mrb[5].mxu0  ;;  %v781_v50 = vadd.f32 %v780_v44, %v779_v40  ;;  %v852_v60 = vmul.f32 %v1154_v43, %v1154_v43 }
  0xf7   : > { %v1101_v49 = vpack.c.bf16 %v502_v48, %v502_v48  ;;  %v782_v51 = vsel %vm774_vm3, %v502_v48, 0.0  ;;  %v850_v52 = vmul.f32 %v502_v48, %v502_v48  ;;  %v1155_v53 = vpop.f32.mrb[6].mxu0  ;;  %v786_v6 = vsel %vm774_vm3, %v1154_v43, 0.0 }
  0xf8   : > { %748 = vst.msk [vmem:[%s1381_s9 + $0x18] sm:$0xf] %vm741_vm2, %v1103_v47  ;;  %v884_v54 = vadd.f32 %v883_v45, %v882_v46  ;;  %v1104_v55 = vpack.c.bf16 %v1155_v53, %v1155_v53  ;;  %v505_v56 = vpop.f32.mrb[7].mxu0  ;;  %v783_v57 = vadd.f32 %v782_v51, %v781_v50  ;;  %v853_v7 = vmul.f32 %v1155_v53, %v1155_v53 }
  0xf9   : > { %746 = vst.msk [vmem:[%s1381_s9 + $0x10] sm:$0xf] %vm741_vm2, %v1101_v49  ;;  %v885_v58 = vsel %vm774_vm3, %v850_v52, 0.0  ;;  %v1102_v59 = vpack.c.bf16 %v505_v56, %v505_v56  ;;  %v784_v62 = vsel %vm774_vm3, %v505_v56, 0.0  ;;  %v851_v63 = vmul.f32 %v505_v56, %v505_v56  ;;  %v1408_v0 = vpop.f32.mrb[0].mxu1 }
  0xfa   : > { %v886_v61 = vadd.f32 %v885_v58, %v884_v54  ;;  %749 = vst.msk [vmem:[%s1381_s9 + $0x1c] sm:$0xf] %vm741_vm2, %v1104_v55  ;;  %v785_v1 = vadd.f32 %v784_v62, %v783_v57  ;;  %v1115_v4 = vpack.c.bf16 %v1408_v0, %v1408_v0  ;;  %v1414_v5 = vpop.f32.mrb[1].mxu1  ;;  %v889_v16 = vsel %vm774_vm3, %v852_v60, 0.0 }
  0xfb   : > { %747 = vst.msk [vmem:[%s1381_s9 + $0x14] sm:$0xf] %vm741_vm2, %v1102_v59  ;;  %v887_v8 = vsel %vm774_vm3, %v851_v63, 0.0  ;;  %v1113_v9 = vpack.c.bf16 %v1414_v5, %v1414_v5  ;;  %v1420_v10 = vpop.f32.mrb[2].mxu1  ;;  %v788_v17 = vsel %vm774_vm3, %v1155_v53, 0.0  ;;  %v891_v3 = vsel %vm774_vm3, %v853_v7, 0.0 }
  0xfc   : > { %v787_v12 = vadd.f32 %v786_v6, %v785_v1  ;;  %v888_v11 = vadd.f32 %v887_v8, %v886_v61  ;;  %760 = vst.msk [vmem:[%s1381_s9 + $0x48] sm:$0xf] %vm741_vm2, %v1115_v4  ;;  %v1116_v14 = vpack.c.bf16 %v1420_v10, %v1420_v10  ;;  %v1426_v15 = vpop.f32.mrb[3].mxu1 }
  0xfd   : > { %v1158_v13 = vpop.f32.mrb[8].mxu0  ;;  %758 = vst.msk [vmem:[%s1381_s9 + $0x40] sm:$0xf] %vm741_vm2, %v1113_v9  ;;  %v1114_v41 = vpack.c.bf16 %v1426_v15, %v1426_v15 }
  0xfe   : > { %v1107_v18 = vpack.c.bf16 %v1158_v13, %v1158_v13  ;;  %v518_v19 = vpop.f32.mrb[9].mxu0  ;;  %v890_v20 = vadd.f32 %v889_v16, %v888_v11  ;;  %v789_v22 = vadd.f32 %v788_v17, %v787_v12  ;;  %761 = vst.msk [vmem:[%s1381_s9 + $0x4c] sm:$0xf] %vm741_vm2, %v1116_v14  ;;  %v856_v30 = vmul.f32 %v1158_v13, %v1158_v13 }
  0xff   : > { %v1105_v21 = vpack.c.bf16 %v518_v19, %v518_v19  ;;  %v790_v23 = vsel %vm774_vm3, %v518_v19, 0.0  ;;  %v1159_v2 = vpop.f32.mrb[10].mxu0  ;;  %v854_v24 = vmul.f32 %v518_v19, %v518_v19  ;;  %v794_v38 = vsel %vm774_vm3, %v1158_v13, 0.0  ;;  %759 = vst.msk [vmem:[%s1381_s9 + $0x44] sm:$0xf] %vm741_vm2, %v1114_v41 }
 0x100   : > { %752 = vst.msk [vmem:[%s1381_s9 + $0x28] sm:$0xf] %vm741_vm2, %v1107_v18  ;;  %v1108_v25 = vpack.c.bf16 %v1159_v2, %v1159_v2  ;;  %v521_v26 = vpop.f32.mrb[11].mxu0  ;;  %v791_v27 = vadd.f32 %v790_v23, %v789_v22  ;;  %v892_v28 = vadd.f32 %v891_v3, %v890_v20  ;;  %v857_v39 = vmul.f32 %v1159_v2, %v1159_v2 }
 0x101   : > { %750 = vst.msk [vmem:[%s1381_s9 + $0x20] sm:$0xf] %vm741_vm2, %v1105_v21  ;;  %v1106_v29 = vpack.c.bf16 %v521_v26, %v521_v26  ;;  %v893_v31 = vsel %vm774_vm3, %v854_v24, 0.0  ;;  %v792_v32 = vsel %vm774_vm3, %v521_v26, 0.0  ;;  %v855_v33 = vmul.f32 %v521_v26, %v521_v26  ;;  %v1444_v34 = vpop.f32.mrb[4].mxu1 }
 0x102   : > { %753 = vst.msk [vmem:[%s1381_s9 + $0x2c] sm:$0xf] %vm741_vm2, %v1108_v25  ;;  %v894_v35 = vadd.f32 %v893_v31, %v892_v28  ;;  %v793_v36 = vadd.f32 %v792_v32, %v791_v27  ;;  %v1448_v37 = vpop.f32.mrb[5].mxu1  ;;  %v1119_v46 = vpack.c.bf16 %v1444_v34, %v1444_v34  ;;  %v897_v48 = vsel %vm774_vm3, %v856_v30, 0.0 }
 0x103   : > { %751 = vst.msk [vmem:[%s1381_s9 + $0x24] sm:$0xf] %vm741_vm2, %v1106_v29  ;;  %v895_v40 = vsel %vm774_vm3, %v855_v33, 0.0  ;;  %v1454_v42 = vpop.f32.mrb[6].mxu1  ;;  %v796_v49 = vsel %vm774_vm3, %v1159_v2, 0.0  ;;  %v899_v57 = vsel %vm774_vm3, %v857_v39, 0.0  ;;  %v862_v11 = vmul.f32 %v1414_v5, %v1414_v5 }
 0x104   : > { %v795_v43 = vadd.f32 %v794_v38, %v793_v36  ;;  %v896_v44 = vadd.f32 %v895_v40, %v894_v35  ;;  %v1458_v47 = vpop.f32.mrb[7].mxu1  ;;  %764 = vst.msk [vmem:[%s1381_s9 + $0x58] sm:$0xf] %vm741_vm2, %v1119_v46  ;;  %v1117_v18 = vpack.c.bf16 %v1448_v37, %v1448_v37  ;;  %v1120_v22 = vpack.c.bf16 %v1454_v42, %v1454_v42 }
 0x105   : > { %v1162_v45 = vpop.f32.mrb[12].mxu0  ;;  %v806_v24 = vsel %vm774_vm3, %v1414_v5, 0.0  ;;  %v1118_v25 = vpack.c.bf16 %v1458_v47, %v1458_v47  ;;  %v909_v29 = vsel %vm774_vm3, %v862_v11, 0.0  ;;  %v863_v30 = vmul.f32 %v1426_v15, %v1426_v15 }
 0x106   : > { %v1111_v50 = vpack.c.bf16 %v1162_v45, %v1162_v45  ;;  %v534_v51 = vpop.f32.mrb[13].mxu0  ;;  %v898_v52 = vadd.f32 %v897_v48, %v896_v44  ;;  %v797_v54 = vadd.f32 %v796_v49, %v795_v43  ;;  %v860_v1 = vmul.f32 %v1162_v45, %v1162_v45  ;;  %762 = vst.msk [vmem:[%s1381_s9 + $0x50] sm:$0xf] %vm741_vm2, %v1117_v18 }
 0x107   : > { %v1109_v53 = vpack.c.bf16 %v534_v51, %v534_v51  ;;  %v798_v55 = vsel %vm774_vm3, %v534_v51, 0.0  ;;  %v1163_v56 = vpop.f32.mrb[14].mxu0  ;;  %v858_v58 = vmul.f32 %v534_v51, %v534_v51  ;;  %v802_v14 = vsel %vm774_vm3, %v1162_v45, 0.0  ;;  %765 = vst.msk [vmem:[%s1381_s9 + $0x5c] sm:$0xf] %vm741_vm2, %v1120_v22 }
 0x108   : > { %756 = vst.msk [vmem:[%s1381_s9 + $0x38] sm:$0xf] %vm741_vm2, %v1111_v50  ;;  %v1112_v59 = vpack.c.bf16 %v1163_v56, %v1163_v56  ;;  %v537_v60 = vpop.f32.mrb[15].mxu0  ;;  %v799_v61 = vadd.f32 %v798_v55, %v797_v54  ;;  %v900_v62 = vadd.f32 %v899_v57, %v898_v52  ;;  %v861_v16 = vmul.f32 %v1163_v56, %v1163_v56 }
 0x109   : > { %754 = vst.msk [vmem:[%s1381_s9 + $0x30] sm:$0xf] %vm741_vm2, %v1109_v53  ;;  %v1110_v63 = vpack.c.bf16 %v537_v60, %v537_v60  ;;  %v901_v4 = vsel %vm774_vm3, %v858_v58, 0.0  ;;  %v800_v6 = vsel %vm774_vm3, %v537_v60, 0.0  ;;  %v859_v7 = vmul.f32 %v537_v60, %v537_v60  ;;  %v1476_v8 = vpop.f32.mrb[8].mxu1 }
 0x10a   : > { %757 = vst.msk [vmem:[%s1381_s9 + $0x3c] sm:$0xf] %vm741_vm2, %v1112_v59  ;;  %v902_v9 = vadd.f32 %v901_v4, %v900_v62  ;;  %v801_v12 = vadd.f32 %v800_v6, %v799_v61  ;;  %v1482_v13 = vpop.f32.mrb[9].mxu1  ;;  %v905_v2 = vsel %vm774_vm3, %v860_v1, 0.0  ;;  %v804_v3 = vsel %vm774_vm3, %v1163_v56, 0.0 }
 0x10b   : > { %755 = vst.msk [vmem:[%s1381_s9 + $0x34] sm:$0xf] %vm741_vm2, %v1110_v63  ;;  %v903_v17 = vsel %vm774_vm3, %v859_v7, 0.0  ;;  %v1488_v19 = vpop.f32.mrb[10].mxu1  ;;  %v907_v28 = vsel %vm774_vm3, %v861_v16, 0.0  ;;  %v1123_v5 = vpack.c.bf16 %v1476_v8, %v1476_v8  ;;  %v1121_v33 = vpack.c.bf16 %v1482_v13, %v1482_v13 }
 0x10c   : > { %v803_v20 = vadd.f32 %v802_v14, %v801_v12  ;;  %v904_v21 = vadd.f32 %v903_v17, %v902_v9  ;;  %v1492_v23 = vpop.f32.mrb[11].mxu1  ;;  %763 = vst.msk [vmem:[%s1381_s9 + $0x54] sm:$0xf] %vm741_vm2, %v1118_v25  ;;  %v864_v35 = vmul.f32 %v1408_v0, %v1408_v0  ;;  %v808_v36 = vsel %vm774_vm3, %v1426_v15, 0.0 }
 0x10d   : > { %768 = vst.msk [vmem:[%s1381_s9 + $0x68] sm:$0xf] %vm741_vm2, %v1123_v5  ;;  %v1124_v38 = vpack.c.bf16 %v1488_v19, %v1488_v19  ;;  %v810_v40 = vsel %vm774_vm3, %v1408_v0, 0.0  ;;  %766 = vst.msk [vmem:[%s1381_s9 + $0x60] sm:$0xf] %vm741_vm2, %v1121_v33  ;;  %v865_v45 = vmul.f32 %v1420_v10, %v1420_v10  ;;  %v911_v15 = vsel %vm774_vm3, %v863_v30, 0.0 }
 0x10e   : > { %v906_v26 = vadd.f32 %v905_v2, %v904_v21  ;;  %v805_v27 = vadd.f32 %v804_v3, %v803_v20  ;;  %v866_v46 = vmul.f32 %v1448_v37, %v1448_v37  ;;  %v1122_v0 = vpack.c.bf16 %v1492_v23, %v1492_v23 }
 0x10f   : > { %769 = vst.msk [vmem:[%s1381_s9 + $0x6c] sm:$0xf] %vm741_vm2, %v1124_v38  ;;  %v913_v53 = vsel %vm774_vm3, %v864_v35, 0.0  ;;  %v812_v54 = vsel %vm774_vm3, %v1420_v10, 0.0  ;;  %v814_v55 = vsel %vm774_vm3, %v1448_v37, 0.0  ;;  %v915_v59 = vsel %vm774_vm3, %v865_v45, 0.0 }
 0x110   : > { %v807_v31 = vadd.f32 %v806_v24, %v805_v27  ;;  %v908_v32 = vadd.f32 %v907_v28, %v906_v26  ;;  %767 = vst.msk [vmem:[%s1381_s9 + $0x64] sm:$0xf] %vm741_vm2, %v1122_v0  ;;  %v917_v60 = vsel %vm774_vm3, %v866_v46, 0.0  ;;  %v867_v61 = vmul.f32 %v1458_v47, %v1458_v47 }
 0x111   : > { %v1522_v39 = vpop.f32.mrb[12].mxu1  ;;  %v868_v1 = vmul.f32 %v1444_v34, %v1444_v34  ;;  %v816_v4 = vsel %vm774_vm3, %v1458_v47, 0.0  ;;  %v818_v9 = vsel %vm774_vm3, %v1444_v34, 0.0  ;;  %v869_v12 = vmul.f32 %v1454_v42, %v1454_v42 }
 0x112   : > { %v910_v41 = vadd.f32 %v909_v29, %v908_v32  ;;  %v809_v43 = vadd.f32 %v808_v36, %v807_v31  ;;  %v598_v44 = vpop.f32.mrb[13].mxu1  ;;  %v1127_v51 = vpack.c.bf16 %v1522_v39, %v1522_v39  ;;  %v919_v11 = vsel %vm774_vm3, %v867_v61, 0.0 }
 0x113   : > { %v1537_v48 = vpop.f32.mrb[14].mxu1  ;;  %v1125_v56 = vpack.c.bf16 %v598_v44, %v598_v44  ;;  %v870_v14 = vmul.f32 %v1482_v13, %v1482_v13  ;;  %v921_v47 = vsel %vm774_vm3, %v868_v1, 0.0  ;;  %v820_v18 = vsel %vm774_vm3, %v1454_v42, 0.0 }
 0x114   : > { %v811_v49 = vadd.f32 %v810_v40, %v809_v43  ;;  %v912_v50 = vadd.f32 %v911_v15, %v910_v41  ;;  %v601_v52 = vpop.f32.mrb[15].mxu1  ;;  %772 = vst.msk [vmem:[%s1381_s9 + $0x78] sm:$0xf] %vm741_vm2, %v1127_v51  ;;  %v1128_v10 = vpack.c.bf16 %v1537_v48, %v1537_v48  ;;  %v822_v20 = vsel %vm774_vm3, %v1482_v13, 0.0 }
 0x115   : > { %770 = vst.msk [vmem:[%s1381_s9 + $0x70] sm:$0xf] %vm741_vm2, %v1125_v56  ;;  %v1126_v63 = vpack.c.bf16 %v601_v52, %v601_v52  ;;  %v923_v22 = vsel %vm774_vm3, %v869_v12, 0.0  ;;  %v925_v2 = vsel %vm774_vm3, %v870_v14, 0.0  ;;  %v871_v3 = vmul.f32 %v1492_v23, %v1492_v23 }
 0x116   : > { %v914_v57 = vadd.f32 %v913_v53, %v912_v50  ;;  %v813_v58 = vadd.f32 %v812_v54, %v811_v49  ;;  %773 = vst.msk [vmem:[%s1381_s9 + $0x7c] sm:$0xf] %vm741_vm2, %v1128_v10  ;;  %v872_v26 = vmul.f32 %v1476_v8, %v1476_v8  ;;  %v824_v42 = vsel %vm774_vm3, %v1492_v23, 0.0 }
 0x117   : > { %771 = vst.msk [vmem:[%s1381_s9 + $0x74] sm:$0xf] %vm741_vm2, %v1126_v63  ;;  %v826_v13 = vsel %vm774_vm3, %v1476_v8, 0.0  ;;  %v873_v29 = vmul.f32 %v1488_v19, %v1488_v19  ;;  %v927_v30 = vsel %vm774_vm3, %v871_v3, 0.0  ;;  %v874_v5 = vmul.f32 %v598_v44, %v598_v44 }
 0x118   : > { %v815_v37 = vadd.f32 %v814_v55, %v813_v58  ;;  %v916_v62 = vadd.f32 %v915_v59, %v914_v57  ;;  %v929_v33 = vsel %vm774_vm3, %v872_v26, 0.0  ;;  %v828_v35 = vsel %vm774_vm3, %v1488_v19, 0.0 }
 0x119   : > { %v830_v23 = vsel %vm774_vm3, %v598_v44, 0.0  ;;  %v931_v40 = vsel %vm774_vm3, %v873_v29, 0.0  ;;  %v933_v8 = vsel %vm774_vm3, %v874_v5, 0.0  ;;  %v875_v41 = vmul.f32 %v601_v52, %v601_v52 }
 0x11a   : > { %v918_v6 = vadd.f32 %v917_v60, %v916_v62  ;;  %v817_v7 = vadd.f32 %v816_v4, %v815_v37  ;;  %v876_v15 = vmul.f32 %v1522_v39, %v1522_v39  ;;  %v832_v46 = vsel %vm774_vm3, %v601_v52, 0.0 }
 0x11b   : > { %v834_v44 = vsel %vm774_vm3, %v1522_v39, 0.0  ;;  %v877_v49 = vmul.f32 %v1537_v48, %v1537_v48  ;;  %v935_v50 = vsel %vm774_vm3, %v875_v41, 0.0  ;;  %v836_v55 = vsel %vm774_vm3, %v1537_v48, 0.0 }
 0x11c   : > { %v819_v16 = vadd.f32 %v818_v9, %v817_v7  ;;  %v920_v17 = vadd.f32 %v919_v11, %v918_v6  ;;  %v937_v54 = vsel %vm774_vm3, %v876_v15, 0.0 }
 0x11d   : > { %v939_v57 = vsel %vm774_vm3, %v877_v49, 0.0 }
 0x11e   : > { %v922_v21 = vadd.f32 %v921_v47, %v920_v17  ;;  %v821_v34 = vadd.f32 %v820_v18, %v819_v16 }
 0x120   : > { %v823_v24 = vadd.f32 %v822_v20, %v821_v34  ;;  %v924_v25 = vadd.f32 %v923_v22, %v922_v21 }
 0x122   : > { %v926_v27 = vadd.f32 %v925_v2, %v924_v25  ;;  %v825_v28 = vadd.f32 %v824_v42, %v823_v24 }
 0x124   : > { %v827_v31 = vadd.f32 %v826_v13, %v825_v28  ;;  %v928_v32 = vadd.f32 %v927_v30, %v926_v27 }
 0x126   : > { %v930_v36 = vadd.f32 %v929_v33, %v928_v32  ;;  %v829_v38 = vadd.f32 %v828_v35, %v827_v31 }
 0x128   : > { %v831_v43 = vadd.f32 %v830_v23, %v829_v38  ;;  %v932_v45 = vadd.f32 %v931_v40, %v930_v36 }
 0x12a   : > { %v934_v0 = vadd.f32 %v933_v8, %v932_v45  ;;  %v833_v19 = vadd.f32 %v832_v46, %v831_v43 }
 0x12c   : > { %v835_v51 = vadd.f32 %v834_v44, %v833_v19  ;;  %v936_v53 = vadd.f32 %v935_v50, %v934_v0 }
 0x12e   : > { %v837_v52 = vadd.f32 %v836_v55, %v835_v51  ;;  %v938_v56 = vadd.f32 %v937_v54, %v936_v53 }
 0x130   : > { %v838_v58 = vrot.slane %v837_v52, 4  ;;  %v940_v59 = vadd.f32 %v939_v57, %v938_v56 }
 0x132   : > { %v839_v39 = vadd.f32 %v838_v58, %v837_v52  ;;  %v941_v60 = vrot.slane %v940_v59, 4 }
 0x134   : > { %v840_v61 = vrot.slane %v839_v39, 2  ;;  %v942_v10 = vadd.f32 %v941_v60, %v940_v59 }
 0x136   : > { %v841_v37 = vadd.f32 %v840_v61, %v839_v39  ;;  %v943_v62 = vrot.slane %v942_v10, 2 }
 0x138   : > { %v842_v63 = vrot.slane %v841_v37, 1  ;;  %v944_v1 = vadd.f32 %v943_v62, %v942_v10 }
 0x13a   : > { %v843_v48 = vadd.f32 %v842_v63, %v841_v37  ;;  %v945_v4 = vrot.slane %v944_v1, 1 }
 0x13c   : > { %845 = vst.msk [vmem:[%s238_s13] sm:$0x1] %vm844_vm4, %v843_v48  ;;  %v946_v6 = vadd.f32 %v945_v4, %v944_v1 }
 0x13e   : > { %947 = vst.msk [vmem:[%s238_s13 + $0x1] sm:$0x1] %vm844_vm4, %v946_v6 }
 0x13f PF: > { %s16_s18 = sadd.s32 1, %s1198_s18  }
 0x140   : > { %p13_p5 = scmp.ge.s32.totalorder %s16_s18, 4  }
 0x142   :  { %15 = sbr.rel (!%p13_p5) target bundleno = 1 (0x1), region = 78 }

// kernel: bottleneck_forward.3
= control target key start
LH: loop header
LB: loop body
LE: loop exit
PB: predicated region body
PF: predicated region fallthrough
CT: control target
= control target key end

     0   :  { %s9652_s15 = smov 0   ;;  %s11548_s0 = inlined_call_operand.vmem [shape: bf16[2,256,16], index: 0, kind: input, shape index: {}]   ;;  %s11549_s1 = inlined_call_operand.vmem [shape: f32[1,16], index: 1, kind: input, shape index: {}]   ;;  %s11550_s2 = inlined_call_operand.vmem [shape: f32[1,16], index: 2, kind: input, shape index: {}]   ;;  %s11551_s3 = inlined_call_operand.vmem [shape: bf16[3,3,16,4], index: 3, kind: input, shape index: {}]   ;;  %s11552_s4 = inlined_call_operand.vmem [shape: f32[2,512,4], index: 4, kind: output, shape index: {}]  }
   0x1 LB: > { %s7421_s16 = sadd.s32 4294967295, %s9624_s15   ;;  %p7425_p0 = scmp.ge.s32.totalorder %s9624_s15, 1  ;;  %s9624_s15 = sphi %s9652_s15, %s14_s15  }
   0x2   : > { %p162_p1 = scmp.lt.s32.totalorder %s9624_s15, 3 }
   0x4   : > { %p163_p2 = pnand %p7425_p0, %p162_p1 }
   0x5   : > { %v9468_v0 = vld [vmem:[%s11551_s3 + $0x8] sm:$0xff] (!%p163_p2)   ;;  %p188_p3 = scmp.lt.s32.totalorder (!%p163_p2), %s7421_s16, 1  ;;  %vm201_vm0 = vcmask (!%p163_p2), 125952   ;;  %v9626_v2 = vmov (!%p163_p2), 0   ;;  %v9819_v3 = vld [vmem:[%s11549_s1] ss:$0 sm:$0xff] (!%p163_p2) }
   0x6   : > { %166 = sbr.rel (%p163_p2) target bundleno = 910 (0x38e), region = 36  ;;  %v9666_v1 = vld [vmem:[%s11551_s3 + $0x8] sm:$0xff] (!%p163_p2)   ;;  %8335 = vmatprep.subr.bf16.mxu0 (!%p163_p2), %v9468_v0  ;;  %202 = vst.msk [vmem:[#allocation2] sm:$0xf] (!%p163_p2), %vm201_vm0, %v9626_v2  ;;  %203 = vst.msk [vmem:[#allocation2 + $0x4] sm:$0xf] (!%p163_p2), %vm201_vm0, %v9626_v2 }
   0x7   : > { %8641 = vmatprep.subr.bf16.mxu1 (!%p163_p2), %v9666_v1  ;;  %8336 = vmatpush3.bf16.msra.mxu0 (!%p163_p2), %v9468_v0  ;;  %204 = vst.msk [vmem:[#allocation2 + $0x8] sm:$0xf] (!%p163_p2), %vm201_vm0, %v9626_v2  ;;  %205 = vst.msk [vmem:[#allocation2 + $0xc] sm:$0xf] (!%p163_p2), %vm201_vm0, %v9626_v2  ;;  %v9826_v6 = vld [vmem:[%s11550_s2] ss:$0 sm:$0xff] (!%p163_p2) }
   0x8   : > { %206 = vst.msk [vmem:[#allocation2 + $0x10] sm:$0xf] (!%p163_p2), %vm201_vm0, %v9626_v2  ;;  %207 = vst.msk [vmem:[#allocation2 + $0x14] sm:$0xf] (!%p163_p2), %vm201_vm0, %v9626_v2  ;;  %8642 = vmatpush3.bf16.msra.mxu1 (!%p163_p2), %v9666_v1  ;;  %vm464_vm1 = vsmask.f32 (!%p163_p2), 1280 }
   0x9   : > { %208 = vst.msk [vmem:[#allocation2 + $0x18] sm:$0xf] (!%p163_p2), %vm201_vm0, %v9626_v2  ;;  %209 = vst.msk [vmem:[#allocation2 + $0x1c] sm:$0xf] (!%p163_p2), %vm201_vm0, %v9626_v2  ;;  %vm465_vm2 = vsmask.f32 (!%p163_p2), 5392 }
   0xa   : > { %210 = vst.msk [vmem:[#allocation2 + $0x20] sm:$0xf] (!%p163_p2), %vm201_vm0, %v9626_v2  ;;  %211 = vst.msk [vmem:[#allocation2 + $0x24] sm:$0xf] (!%p163_p2), %vm201_vm0, %v9626_v2  ;;  %v9831_v11 = vld [vmem:[%s11551_s3] sm:$0xff] (!%p163_p2)   ;;  %vm489_vm3 = vcmask (!%p163_p2), 125953  }
   0xb   : > { %212 = vst.msk [vmem:[#allocation2 + $0x28] sm:$0xf] (!%p163_p2), %vm201_vm0, %v9626_v2  ;;  %213 = vst.msk [vmem:[#allocation2 + $0x2c] sm:$0xf] (!%p163_p2), %vm201_vm0, %v9626_v2  ;;  %vm490_vm4 = vsmask.f32 (!%p163_p2), 7942  ;;  %8369 = vmatprep.subr.bf16.mxu0 (!%p163_p2), %v9831_v11 }
   0xc   : > { %214 = vst.msk [vmem:[#allocation2 + $0x30] sm:$0xf] (!%p163_p2), %vm201_vm0, %v9626_v2  ;;  %215 = vst.msk [vmem:[#allocation2 + $0x34] sm:$0xf] (!%p163_p2), %vm201_vm0, %v9626_v2  ;;  %vm531_vm5 = vcmask (!%p163_p2), 125954   ;;  %vm496_vm7 = vcmask (!%p163_p2), 123904  }
   0xd   : > { %s11839_s16 = smov (!%p188_p3, %s7421_s16), 1  ;;  %216 = vst.msk [vmem:[#allocation2 + $0x38] sm:$0xf] %vm201_vm0, %v9626_v2  ;;  %217 = vst.msk [vmem:[#allocation2 + $0x3c] sm:$0xf] %vm201_vm0, %v9626_v2  ;;  %v9856_v40 = vld [vmem:[%s11551_s3] sm:$0xff]  }
   0xe   : > { %218 = vst.msk [vmem:[#allocation2 + $0x40] sm:$0xf] %vm201_vm0, %v9626_v2  ;;  %219 = vst.msk [vmem:[#allocation2 + $0x44] sm:$0xf] %vm201_vm0, %v9626_v2  ;;  %s7916_s21 = sshll.u32 %s11839_s16, 7  ;;  %8675 = vmatprep.subr.bf16.mxu1 %v9856_v40  ;;  %vm573_vm10 = vcmask 125955  }
   0xf   : > { %220 = vst.msk [vmem:[#allocation2 + $0x48] sm:$0xf] %vm201_vm0, %v9626_v2  ;;  %221 = vst.msk [vmem:[#allocation2 + $0x4c] sm:$0xf] %vm201_vm0, %v9626_v2  ;;  %s9814_s24 = scalar_lea.vmem %s11548_s0, %s7916_s21  ;;  %v1026_v18 = vld [vmem:[#allocation2] sm:$0xf] }
  0x10   : > { %222 = vst.msk [vmem:[#allocation2 + $0x50] sm:$0xf] %vm201_vm0, %v9626_v2  ;;  %223 = vst.msk [vmem:[#allocation2 + $0x54] sm:$0xf] %vm201_vm0, %v9626_v2  ;;  %v7951_v4 = vld [vmem:[%s9814_s24] sm:$0xff]   ;;  %v8014_v5 = vld [vmem:[%s9814_s24 + $0x8] sm:$0xff]  }
  0x11   : > { %224 = vst.msk [vmem:[#allocation2 + $0x58] sm:$0xf] %vm201_vm0, %v9626_v2  ;;  %225 = vst.msk [vmem:[#allocation2 + $0x5c] sm:$0xf] %vm201_vm0, %v9626_v2  ;;  %v7952_v7 = vunpack.c.l.bf16 %v7951_v4  ;;  %v7953_v8 = vunpack.c.h.bf16 %v7951_v4  ;;  %v7956_v9 = vunpack.c.l.bf16 %v8014_v5  ;;  %v7957_v10 = vunpack.c.h.bf16 %v8014_v5  ;;  %v8026_v12 = vld [vmem:[%s9814_s24 + $0x68] sm:$0xff]   ;;  %v8027_v17 = vld [vmem:[%s9814_s24 + $0x70] sm:$0xff]  }
  0x12   : > { %226 = vst.msk [vmem:[#allocation2 + $0x60] sm:$0xf] %vm201_vm0, %v9626_v2  ;;  %227 = vst.msk [vmem:[#allocation2 + $0x64] sm:$0xf] %vm201_vm0, %v9626_v2  ;;  %v1027_v19 = vld [vmem:[#allocation2 + $0x4] sm:$0xf]  ;;  %v8004_v20 = vunpack.c.l.bf16 %v8026_v12  ;;  %v8005_v21 = vunpack.c.h.bf16 %v8026_v12  ;;  %v8008_v22 = vunpack.c.l.bf16 %v8027_v17  ;;  %v8009_v23 = vunpack.c.h.bf16 %v8027_v17 }
  0x13   : > { %228 = vst.msk [vmem:[#allocation2 + $0x68] sm:$0xf] %vm201_vm0, %v9626_v2  ;;  %229 = vst.msk [vmem:[#allocation2 + $0x6c] sm:$0xf] %vm201_vm0, %v9626_v2  ;;  %v341_v13 = vmul.f32 %v7952_v7, %v9819_v3  ;;  %v342_v14 = vmul.f32 %v7953_v8, %v9819_v3  ;;  %v343_v15 = vmul.f32 %v7956_v9, %v9819_v3  ;;  %vm532_vm6 = vsmask.f32 7946 }
  0x14   : > { %230 = vst.msk [vmem:[#allocation2 + $0x70] sm:$0xf] %vm201_vm0, %v9626_v2  ;;  %231 = vst.msk [vmem:[#allocation2 + $0x74] sm:$0xf] %vm201_vm0, %v9626_v2  ;;  %v344_v16 = vmul.f32 %v7957_v10, %v9819_v3  ;;  %v9842_v26 = vcombine.low %v1026_v18, %v1027_v19  ;;  %v367_v29 = vmul.f32 %v8004_v20, %v9819_v3  ;;  %vm506_vm8 = vsmask.f32 2304 }
  0x15   : > { %232 = vst.msk [vmem:[#allocation2 + $0x78] sm:$0xf] %vm201_vm0, %v9626_v2  ;;  %233 = vst.msk [vmem:[#allocation2 + $0x7c] sm:$0xf] %vm201_vm0, %v9626_v2  ;;  %v379_v24 = vadd.f32 %v9826_v6, %v341_v13  ;;  %v380_v25 = vadd.f32 %v9826_v6, %v342_v14  ;;  %v381_v27 = vadd.f32 %v9826_v6, %v343_v15  ;;  %vm507_vm9 = vsmask.f32 6416 }
  0x16   : > { %234 = vst.msk [vmem:[#allocation2 + $0x80] sm:$0xf] %vm201_vm0, %v9626_v2  ;;  %235 = vst.msk [vmem:[#allocation2 + $0x84] sm:$0xf] %vm201_vm0, %v9626_v2  ;;  %v382_v28 = vadd.f32 %v9826_v6, %v344_v16  ;;  %v368_v30 = vmul.f32 %v8005_v21, %v9819_v3  ;;  %v369_v31 = vmul.f32 %v8008_v22, %v9819_v3  ;;  %v1149_v34 = vshrl.u32 %v9842_v26, 16  ;;  %v10324_v13 = vld [vmem:[%s11551_s3 + $0x18] sm:$0xff]  }
  0x17   : > { %236 = vst.msk [vmem:[#allocation2 + $0x88] sm:$0xf] %vm201_vm0, %v9626_v2  ;;  %237 = vst.msk [vmem:[#allocation2 + $0x8c] sm:$0xf] %vm201_vm0, %v9626_v2  ;;  %v411_v32 = vmax.f32 %v379_v24, 0.0  ;;  %v412_v33 = vmax.f32 %v380_v25, 0.0  ;;  %v370_v38 = vmul.f32 %v8009_v23, %v9819_v3  ;;  %v405_v39 = vadd.f32 %v9826_v6, %v367_v29 }
  0x18   : > { %238 = vst.msk [vmem:[#allocation2 + $0x90] sm:$0xf] %vm201_vm0, %v9626_v2  ;;  %239 = vst.msk [vmem:[#allocation2 + $0x94] sm:$0xf] %vm201_vm0, %v9626_v2  ;;  %v1151_v35 = vshll.u32 %v9842_v26, 16  ;;  %v413_v36 = vmax.f32 %v381_v27, 0.0  ;;  %v406_v44 = vadd.f32 %v9826_v6, %v368_v30  ;;  %v407_v47 = vadd.f32 %v9826_v6, %v369_v31 }
  0x19   : > { %240 = vst.msk [vmem:[#allocation2 + $0x98] sm:$0xf] %vm201_vm0, %v9626_v2  ;;  %241 = vst.msk [vmem:[#allocation2 + $0x9c] sm:$0xf] %vm201_vm0, %v9626_v2  ;;  %v414_v37 = vmax.f32 %v382_v28, 0.0  ;;  %v7918_v41 = vpack.c.bf16 %v411_v32, %v411_v32  ;;  %v7919_v42 = vpack.c.bf16 %v412_v33, %v412_v33  ;;  %v408_v48 = vadd.f32 %v9826_v6, %v370_v38  ;;  %s7917_s21 = sshll.u32 %s11839_s16, 9 }
  0x1a   : > { %242 = vst.msk [vmem:[#allocation2 + $0xa0] sm:$0xf] %vm201_vm0, %v9626_v2  ;;  %243 = vst.msk [vmem:[#allocation2 + $0xa4] sm:$0xf] %vm201_vm0, %v9626_v2  ;;  %v1153_v43 = vrot.slane %v1151_v35, 1  ;;  %v7920_v45 = vpack.c.bf16 %v413_v36, %v413_v36  ;;  %vm538_vm11 = vcmask 124928  }
  0x1b   : > { %244 = vst.msk [vmem:[#allocation2 + $0xa8] sm:$0xf] %vm201_vm0, %v9626_v2  ;;  %245 = vst.msk [vmem:[#allocation2 + $0xac] sm:$0xf] %vm201_vm0, %v9626_v2  ;;  %v7921_v46 = vpack.c.bf16 %v414_v37, %v414_v37  ;;  %v468_v49 = vshrl.u32 %v7918_v41, 16  ;;  %v471_v50 = vshll.u32 %v7918_v41, 16 }
  0x1c   : > { %246 = vst.msk [vmem:[#allocation2 + $0xb0] sm:$0xf] %vm201_vm0, %v9626_v2  ;;  %247 = vst.msk [vmem:[#allocation2 + $0xb4] sm:$0xf] %vm201_vm0, %v9626_v2  ;;  %v477_v51 = vshrl.u32 %v7919_v42, 16  ;;  %v480_v52 = vshll.u32 %v7919_v42, 16  ;;  %v9862_v54 = vor.u32 %v1153_v43, %v1149_v34 }
  0x1d   : > { %248 = vst.msk [vmem:[#allocation2 + $0xb8] sm:$0xf] %vm201_vm0, %v9626_v2  ;;  %249 = vst.msk [vmem:[#allocation2 + $0xbc] sm:$0xf] %vm201_vm0, %v9626_v2  ;;  %v492_v53 = vld [vmem:[#allocation2 + $0x8] sm:$0xe] }
  0x1e   : > { %250 = vst.msk [vmem:[#allocation2 + $0xc0] sm:$0xf] %vm201_vm0, %v9626_v2  ;;  %251 = vst.msk [vmem:[#allocation2 + $0xc4] sm:$0xf] %vm201_vm0, %v9626_v2  ;;  %v510_v55 = vshrl.u32 %v7920_v45, 16  ;;  %v513_v56 = vshll.u32 %v7920_v45, 16 }
  0x1f   : > { %252 = vst.msk [vmem:[#allocation2 + $0xc8] sm:$0xf] %vm201_vm0, %v9626_v2  ;;  %253 = vst.msk [vmem:[#allocation2 + $0xcc] sm:$0xf] %vm201_vm0, %v9626_v2  ;;  %v519_v57 = vshrl.u32 %v7921_v46, 16  ;;  %v470_v59 = vrot.slane %v468_v49, 6 }
  0x20   : > { %254 = vst.msk [vmem:[#allocation2 + $0xd0] sm:$0xf] %vm201_vm0, %v9626_v2  ;;  %255 = vst.msk [vmem:[#allocation2 + $0xd4] sm:$0xf] %vm201_vm0, %v9626_v2  ;;  %v473_v60 = vrot.slane %v471_v50, 7  ;;  %v479_v61 = vrot.slane %v477_v51, 6 }
  0x21   : > { %256 = vst.msk [vmem:[#allocation2 + $0xd8] sm:$0xf] %vm201_vm0, %v9626_v2  ;;  %257 = vst.msk [vmem:[#allocation2 + $0xdc] sm:$0xf] %vm201_vm0, %v9626_v2  ;;  %v482_v62 = vrot.slane %v480_v52, 7  ;;  %v512_v0 = vrot.slane %v510_v55, 5 }
  0x22   : > { %258 = vst.msk [vmem:[#allocation2 + $0xe0] sm:$0xf] %vm201_vm0, %v9626_v2  ;;  %259 = vst.msk [vmem:[#allocation2 + $0xe4] sm:$0xf] %vm201_vm0, %v9626_v2  ;;  %vm548_vm13 = vsmask.f32 3328  ;;  %v474_v5 = vor.u32 %v473_v60, %v470_v59 }
  0x23   : > { %260 = vst.msk [vmem:[#allocation2 + $0xe8] sm:$0xf] %vm201_vm0, %v9626_v2  ;;  %261 = vst.msk [vmem:[#allocation2 + $0xec] sm:$0xf] %vm201_vm0, %v9626_v2  ;;  %vm549_vm14 = vsmask.f32 7440  ;;  %v483_v7 = vor.u32 %v482_v62, %v479_v61 }
  0x24   : > { %262 = vst.msk [vmem:[#allocation2 + $0xf0] sm:$0xf] %vm201_vm0, %v9626_v2  ;;  %263 = vst.msk [vmem:[#allocation2 + $0xf4] sm:$0xf] %vm201_vm0, %v9626_v2  ;;  %v515_v1 = vrot.slane %v513_v56, 6  ;;  %v522_v4 = vshll.u32 %v7921_v46, 16 }
  0x25   : > { %264 = vst.msk [vmem:[#allocation2 + $0xf8] sm:$0xf] %vm201_vm0, %v9626_v2  ;;  %265 = vst.msk [vmem:[#allocation2 + $0xfc] sm:$0xf] %vm201_vm0, %v9626_v2  ;;  %v534_v9 = vld [vmem:[#allocation2 + $0x10] sm:$0xc] }
  0x26   : > { %266 = vst.msk [vmem:[#allocation2 + $0x100] sm:$0xf] %vm201_vm0, %v9626_v2  ;;  %267 = vst.msk [vmem:[#allocation2 + $0x104] sm:$0xf] %vm201_vm0, %v9626_v2  ;;  %v437_v10 = vmax.f32 %v405_v39, 0.0  ;;  %v438_v12 = vmax.f32 %v406_v44, 0.0  ;;  %v516_v15 = vor.u32 %v515_v1, %v512_v0 }
  0x27   : > { %268 = vst.msk [vmem:[#allocation2 + $0x108] sm:$0xf] %vm201_vm0, %v9626_v2  ;;  %269 = vst.msk [vmem:[#allocation2 + $0x10c] sm:$0xf] %vm201_vm0, %v9626_v2  ;;  %v498_v14 = vld [vmem:[#allocation2 + $0x10] sm:$0x3] }
  0x28   : > { %270 = vst.msk [vmem:[#allocation2 + $0x110] sm:$0xf] %vm201_vm0, %v9626_v2  ;;  %vm9866_vm12 = vmor %vm464_vm1, %vm465_vm2  ;;  %v521_v2 = vrot.slane %v519_v57, 5  ;;  %v524_v16 = vrot.slane %v522_v4, 6  ;;  %v439_v17 = vmax.f32 %v407_v47, 0.0  ;;  %v440_v18 = vmax.f32 %v408_v48, 0.0 }
  0x29   : > { %vm9872_vm15 = vmand %vm489_vm3, %vm490_vm4  ;;  %v475_v19 = vrot.slane %v474_v5, 4  ;;  %v485_v20 = vrot.slane %v483_v7, 4  ;;  %vm574_vm4 = vsmask.f32 7950  ;;  %v517_v23 = vrot.slane %v516_v15, 4  ;;  %v8028_v41 = vld [vmem:[%s9814_s24 + $0x78] sm:$0xff]  }
  0x2a   : > { %vm9878_vm2 = vmand %vm531_vm5, %vm532_vm6  ;;  %v493_v21 = vsel %vm9872_vm15, %v474_v5, %v492_v53  ;;  %v9896_v24 = vor.u32 %v524_v16, %v521_v2  ;;  %v7944_v27 = vpack.c.bf16 %v437_v10, %v437_v10  ;;  %v7945_v30 = vpack.c.bf16 %v438_v12, %v438_v12  ;;  %v987_v47 = vld [vmem:[#allocation2 + $0x84] sm:$0x8]  ;;  %v8015_v53 = vld [vmem:[%s9814_s24 + $0x10] sm:$0xff]  }
  0x2b   : > { %vm9884_vm3 = vmand %vm496_vm7, %vm464_vm1  ;;  %494 = vst [vmem:[#allocation2 + $0x8] sm:$0xe] %v493_v21  ;;  %v535_v25 = vsel %vm9878_vm2, %v516_v15, %v534_v9  ;;  %v484_v28 = vsel %vm9866_vm12, %v475_v19, %v483_v7  ;;  %v7946_v31 = vpack.c.bf16 %v439_v17, %v439_v17  ;;  %v7947_v35 = vpack.c.bf16 %v440_v18, %v440_v18  ;;  %v957_v57 = vld [vmem:[#allocation2 + $0x84] sm:$0x7]  ;;  %v991_v2 = vld [vmem:[#allocation2 + $0x8c] sm:$0xf] }
  0x2c   : > { %vm9892_vm5 = vmor %vm506_vm8, %vm507_vm9  ;;  %v499_v29 = vsel %vm9884_vm3, %v485_v20, %v498_v14  ;;  %536 = vst [vmem:[#allocation2 + $0x10] sm:$0xc] %v535_v25  ;;  %v932_v33 = vshrl.u32 %v7944_v27, 16  ;;  %v935_v34 = vshll.u32 %v7944_v27, 16  ;;  %v941_v36 = vshrl.u32 %v7945_v30, 16 }
  0x2d   : > { %495 = vst.msk [vmem:[#allocation2 + $0xc] sm:$0xf] %vm201_vm0, %v484_v28  ;;  %500 = vst [vmem:[#allocation2 + $0x10] sm:$0x3] %v499_v29  ;;  %v526_v32 = vsel %vm9892_vm5, %v517_v23, %v9896_v24  ;;  %v944_v37 = vshll.u32 %v7945_v30, 16  ;;  %v966_v38 = vshll.u32 %v7946_v31, 16  ;;  %v8012_v61 = vunpack.c.l.bf16 %v8028_v41 }
  0x2e   : > { %537 = vst.msk [vmem:[#allocation2 + $0x14] sm:$0xf] %vm201_vm0, %v526_v32  ;;  %v969_v39 = vshrl.u32 %v7946_v31, 16  ;;  %vm1147_vm1 = vsmask.f32 7424  ;;  %vm9912_vm6 = vmand %vm573_vm10, %vm574_vm4  ;;  %v934_v43 = vrot.slane %v932_v33, 5  ;;  %v8013_v4 = vunpack.c.h.bf16 %v8028_v41 }
  0x2f   : > { %v937_v44 = vrot.slane %v935_v34, 6  ;;  %v975_v45 = vshll.u32 %v7947_v35, 16  ;;  %v979_v46 = vshrl.u32 %v7947_v35, 16  ;;  %vm11553_vm7 = vcmask 130048   ;;  %vm9918_vm9 = vmand %vm538_vm11, %vm506_vm8  ;;  %v540_v34 = vld [vmem:[#allocation2 + $0x18] sm:$0x7] }
  0x30   : > { %v943_v49 = vrot.slane %v941_v36, 5  ;;  %v946_v50 = vrot.slane %v944_v37, 6  ;;  %v968_v51 = vrot.slane %v966_v38, 5  ;;  %v971_v52 = vrot.slane %v969_v39, 4  ;;  %vm9925_vm10 = vmor %vm548_vm13, %vm549_vm14 }
  0x31   : > { %v9929_v56 = vor.u32 %v937_v44, %v934_v43  ;;  %v977_v59 = vrot.slane %v975_v45, 5  ;;  %v981_v60 = vrot.slane %v979_v46, 4  ;;  %vm9935_vm8 = vmand %vm201_vm0, %vm548_vm13  ;;  %v371_v10 = vmul.f32 %v8012_v61, %v9819_v3 }
  0x32   : > { %v947_v62 = vor.u32 %v946_v50, %v943_v49  ;;  %v972_v0 = vor.u32 %v971_v52, %v968_v51  ;;  %v988_v1 = vsel %vm9912_vm6, %v968_v51, %v987_v47  ;;  %vm590_vm11 = vsmask.f32 256  ;;  %v9962_v47 = vld [vmem:[#allocation2 + $0xa0] sm:$0xff]  }
  0x33   : > { %v939_v7 = vrot.slane %v9929_v56, 4  ;;  %v982_v9 = vor.u32 %v981_v60, %v977_v59  ;;  %989 = vst [vmem:[#allocation2 + $0x84] sm:$0x8] %v988_v1  ;;  %v372_v15 = vmul.f32 %v8013_v4, %v9819_v3  ;;  %v7960_v16 = vunpack.c.l.bf16 %v8015_v53 }
  0x34   : > { %v9471_v12 = vld [vmem:[#allocation2 + $0x8] sm:$0xff]   ;;  %v949_v14 = vrot.slane %v947_v62, 4  ;;  %v7961_v17 = vunpack.c.h.bf16 %v8015_v53  ;;  %v973_v20 = vrot.slane %v972_v0, 4  ;;  %v409_v23 = vadd.f32 %v9826_v6, %v371_v10  ;;  %v9968_v53 = vld [vmem:[%s9814_s24 + $0x18] sm:$0xff]   ;;  %v1019_v0 = vld [vmem:[#allocation2 + $0x90] sm:$0xf] }
  0x35   : > { %v9942_v18 = vld [vmem:[#allocation2 + $0x10] sm:$0xff]   ;;  %v948_v19 = vsel %vm9892_vm5, %v939_v7, %v947_v62  ;;  %v983_v21 = vrot.slane %v982_v9, 4  ;;  %v1156_v25 = vshll.u32 %v9471_v12, 16  ;;  %v1160_v27 = vshrl.u32 %v9471_v12, 16 }
  0x36   : > { %956 = vst.msk [vmem:[#allocation2 + $0x80] sm:$0xf] %vm201_vm0, %v948_v19  ;;  %v958_v28 = vsel %vm9918_vm9, %v949_v14, %v957_v57  ;;  %v410_v29 = vadd.f32 %v9826_v6, %v372_v15  ;;  %v1164_v30 = vshll.u32 %v9942_v18, 16  ;;  %v978_v31 = vsel %vm9925_vm10, %v973_v20, %v977_v59 }
  0x37   : > { %959 = vst [vmem:[#allocation2 + $0x84] sm:$0x7] %v958_v28  ;;  %v992_v32 = vsel %vm9935_vm8, %v983_v21, %v991_v2  ;;  %v441_v33 = vmax.f32 %v409_v23, 0.0  ;;  %v1158_v35 = vrot.slane %v1156_v25, 1  ;;  %990 = vst.msk [vmem:[#allocation2 + $0x88] sm:$0xf] %vm201_vm0, %v978_v31  ;;  %v345_v39 = vmul.f32 %v7960_v16, %v9819_v3 }
  0x38   : > { %993 = vst [vmem:[#allocation2 + $0x8c] sm:$0xf] %v992_v32  ;;  %v442_v36 = vmax.f32 %v410_v29, 0.0  ;;  %vm591_vm13 = vsmask.f32 4368  ;;  %v1166_v37 = vrot.slane %v1164_v30, 1  ;;  %v346_v41 = vmul.f32 %v7961_v17, %v9819_v3 }
  0x39   : > { %vm613_vm14 = vsmask.f32 7938  ;;  %v7948_v38 = vpack.c.bf16 %v441_v33, %v441_v33  ;;  %v1159_v43 = vsel %vm1147_vm1, %v9862_v54, %v1158_v35  ;;  %v1162_v44 = vor.u32 %v1160_v27, %v1158_v35  ;;  %vm9976_vm4 = vmor %vm590_vm11, %vm591_vm13  ;;  %v576_v30 = vld [vmem:[#allocation2 + $0x18] sm:$0x8]  ;;  %v1023_v31 = vld [vmem:[#allocation2 + $0x98] sm:$0x1] }
  0x3a   : > { %v7949_v45 = vpack.c.bf16 %v442_v36, %v442_v36  ;;  %v527_v46 = vrot.slane %v9896_v24, 4  ;;  %8337 = vmatprep.mubr.msk.bf16.mxu0 %vm11553_vm7, %v1159_v43  ;;  %v383_v51 = vadd.f32 %v9826_v6, %v345_v39  ;;  %v384_v52 = vadd.f32 %v9826_v6, %v346_v41 }
  0x3b   : > { %v1000_v49 = vshrl.u32 %v7948_v38, 16  ;;  %v1003_v50 = vshll.u32 %v7948_v38, 16  ;;  %v1167_v57 = vsel %vm1147_vm1, %v1162_v44, %v1166_v37  ;;  %v1168_v4 = vshrl.u32 %v9942_v18, 16 }
  0x3c   : > { %v1008_v59 = vshrl.u32 %v7949_v45, 16  ;;  %v1011_v54 = vshll.u32 %v7949_v45, 16  ;;  %v541_v60 = vsel %vm9918_vm9, %v527_v46, %v540_v34  ;;  %8338 = vmatmul.mubr.msk.bf16.vlgmr.msra.gmra.mrb[0].mxu0 %vm11553_vm7, %v1167_v57  ;;  %v415_v1 = vmax.f32 %v383_v51, 0.0  ;;  %vm9984_vm7 = vmand %vm201_vm0, %vm613_vm14  ;;  %v8017_v57 = vld [vmem:[%s9814_s24 + $0x20] sm:$0xff]  }
  0x3d   : > { %v4204_v24 = vld [vmem:[#allocation2 + $0x80] sm:$0xf]  ;;  %v1002_v62 = vrot.slane %v1000_v49, 7  ;;  %v416_v2 = vmax.f32 %v384_v52, 0.0  ;;  %542 = vst [vmem:[#allocation2 + $0x18] sm:$0x7] %v541_v60  ;;  %8370 = vmatpush3.bf16.msra.mxu0 %v9831_v11  ;;  %v7964_v12 = vunpack.c.l.bf16 %v9968_v53  ;;  %v9992_v21 = vor.u32 %v1168_v4, %v1166_v37 }
  0x3e   : > { %v4205_v7 = vld [vmem:[#allocation2 + $0x84] sm:$0xf]  ;;  %v1010_v10 = vrot.slane %v1008_v59, 7  ;;  %vm619_vm13 = vcmask 122880   ;;  %v4356_v14 = vshll.u32 %v9962_v47, 16  ;;  %v7922_v19 = vpack.c.bf16 %v415_v1, %v415_v1 }
  0x3f   : > { %v9990_v15 = vcombine.low %v4204_v24, %v4205_v7  ;;  %v9475_v16 = vld [vmem:[#allocation2 + $0x88] sm:$0xff]   ;;  %v1005_v17 = vor.u32 %v1003_v50, %v1002_v62  ;;  %v1006_v18 = vrot.slane %v1002_v62, 4  ;;  %v7923_v11 = vpack.c.bf16 %v416_v2, %v416_v2  ;;  %vm10005_vm14 = vmand %vm619_vm13, %vm590_vm11 }
  0x40   : > { %v1013_v20 = vor.u32 %v1011_v54, %v1010_v10  ;;  %v347_v23 = vmul.f32 %v7964_v12, %v9819_v3  ;;  %v4332_v28 = vshll.u32 %v9475_v16, 16  ;;  %v4336_v29 = vshrl.u32 %v9475_v16, 16  ;;  %v10015_v62 = vld [vmem:[%s9814_s24 + $0x28] sm:$0xff]  }
  0x41   : > { %v4325_v25 = vshrl.u32 %v9990_v15, 16  ;;  %v4327_v27 = vshll.u32 %v9990_v15, 16  ;;  %v1020_v33 = vsel %vm9984_vm7, %v1005_v17, %v1019_v0  ;;  %v552_v34 = vshll.u32 %v7922_v19, 16  ;;  %v9506_v17 = vld [vmem:[%s11551_s3 + $0x10] sm:$0xff]  }
  0x42   : > { %v1014_v32 = vsel %vm9976_vm4, %v1006_v18, %v1013_v20  ;;  %v555_v35 = vshrl.u32 %v7922_v19, 16  ;;  %v4334_v37 = vrot.slane %v4332_v28, 1  ;;  %1021 = vst [vmem:[#allocation2 + $0x90] sm:$0xf] %v1020_v33  ;;  %v561_v38 = vshll.u32 %v7923_v11, 16  ;;  %8403 = vmatprep.subr.bf16.mxu0 %v9506_v17 }
  0x43   : > { %v4329_v36 = vrot.slane %v4327_v27, 1  ;;  %1022 = vst.msk [vmem:[#allocation2 + $0x94] sm:$0xf] %vm201_vm0, %v1014_v32  ;;  %v385_v39 = vadd.f32 %v9826_v6, %v347_v23  ;;  %v554_v43 = vrot.slane %v552_v34, 5  ;;  %v565_v45 = vshrl.u32 %v7923_v11, 16 }
  0x44   : > { %v557_v44 = vrot.slane %v555_v35, 4  ;;  %v1015_v46 = vrot.slane %v1010_v10, 4  ;;  %v4338_v50 = vor.u32 %v4336_v29, %v4334_v37  ;;  %v563_v51 = vrot.slane %v561_v38, 5  ;;  %v582_v18 = vld [vmem:[#allocation2 + $0x20] sm:$0xf]  ;;  %v10040_v38 = vld [vmem:[#allocation2 + $0xa8] sm:$0xff]  }
  0x45   : > { %v4330_v49 = vor.u32 %v4329_v36, %v4325_v25  ;;  %v417_v52 = vmax.f32 %v385_v39, 0.0  ;;  %v577_v54 = vsel %vm9912_vm6, %v554_v43, %v576_v30  ;;  %v567_v60 = vrot.slane %v565_v45, 4  ;;  %v615_v35 = vld [vmem:[#allocation2 + $0x24] sm:$0xf] }
  0x46   : > { %v558_v59 = vor.u32 %v557_v44, %v554_v43  ;;  %v1024_v24 = vsel %vm10005_vm14, %v1015_v46, %v1023_v31  ;;  %578 = vst [vmem:[#allocation2 + $0x18] sm:$0x8] %v577_v54  ;;  %v10018_v2 = vrot.slane %v4356_v14, 1  ;;  %v7965_v4 = vunpack.c.h.bf16 %v9968_v53 }
  0x47   : > { %v4335_v0 = vsel %vm1147_vm1, %v4330_v49, %v4334_v37  ;;  %v7924_v1 = vpack.c.bf16 %v417_v52, %v417_v52  ;;  %1025 = vst [vmem:[#allocation2 + $0x98] sm:$0x1] %v1024_v24  ;;  %vm11578_vm11 = vcmask 130048   ;;  %v568_v10 = vor.u32 %v567_v60, %v563_v51  ;;  %v9507_v24 = vld [vmem:[%s11551_s3 + $0x10] sm:$0xff]  }
  0x48   : > { %8643 = vmatprep.mubr.msk.bf16.mxu1 %vm11578_vm11, %v4335_v0  ;;  %v559_v7 = vrot.slane %v558_v59, 4  ;;  %v7968_v12 = vunpack.c.l.bf16 %v8017_v57  ;;  %v7969_v16 = vunpack.c.h.bf16 %v8017_v57  ;;  %v348_v11 = vmul.f32 %v7965_v4, %v9819_v3  ;;  %vm11579_vm13 = vmmov %vm11578_vm11 }
  0x49   : > { %v594_v19 = vshrl.u32 %v7924_v1, 16  ;;  %v597_v20 = vshll.u32 %v7924_v1, 16  ;;  %v7972_v14 = vunpack.c.l.bf16 %v10015_v62  ;;  %v569_v25 = vrot.slane %v568_v10, 4 }
  0x4a   : > { %v9477_v23 = vld [vmem:[#allocation2 + $0x90] sm:$0xff]   ;;  %v564_v53 = vsel %vm9925_vm10, %v559_v7, %v563_v51  ;;  %v349_v27 = vmul.f32 %v7968_v12, %v9819_v3  ;;  %v350_v28 = vmul.f32 %v7969_v16, %v9819_v3  ;;  %v386_v30 = vadd.f32 %v9826_v6, %v348_v11 }
  0x4b   : > { %579 = vst.msk [vmem:[#allocation2 + $0x1c] sm:$0xf] %vm201_vm0, %v564_v53  ;;  %v10032_v29 = vrot.slane %v594_v19, 7  ;;  %v351_v31 = vmul.f32 %v7972_v14, %v9819_v3  ;;  %v4360_v32 = vshrl.u32 %v9962_v47, 16  ;;  %v4340_v33 = vshll.u32 %v9477_v23, 16 }
  0x4c   : > { %v583_v34 = vsel %vm9935_vm8, %v569_v25, %v582_v18  ;;  %v4344_v36 = vshrl.u32 %v9477_v23, 16  ;;  %v387_v37 = vadd.f32 %v9826_v6, %v349_v27  ;;  %v418_v43 = vmax.f32 %v386_v30, 0.0 }
  0x4d   : > { %584 = vst [vmem:[#allocation2 + $0x20] sm:$0xf] %v583_v34  ;;  %v599_v39 = vor.u32 %v597_v20, %v10032_v29  ;;  %v600_v44 = vrot.slane %v10032_v29, 4  ;;  %v388_v45 = vadd.f32 %v9826_v6, %v350_v28  ;;  %v4342_v46 = vrot.slane %v4340_v33, 1  ;;  %v621_v20 = vld [vmem:[#allocation2 + $0x2c] sm:$0x1] }
  0x4e   : > { %v9480_v47 = vld [vmem:[#allocation2 + $0x98] sm:$0xff]   ;;  %v389_v49 = vadd.f32 %v9826_v6, %v351_v31  ;;  %v10047_v51 = vor.u32 %v4360_v32, %v10018_v2  ;;  %v7973_v52 = vunpack.c.h.bf16 %v10015_v62  ;;  %v419_v59 = vmax.f32 %v387_v37, 0.0 }
  0x4f   : > { %v616_v57 = vsel %vm9984_vm7, %v599_v39, %v615_v35  ;;  %v7925_v54 = vpack.c.bf16 %v418_v43, %v418_v43  ;;  %v420_v60 = vmax.f32 %v388_v45, 0.0  ;;  %v4343_v0 = vsel %vm1147_vm1, %v4338_v50, %v4342_v46  ;;  %v8019_v45 = vld [vmem:[%s9814_s24 + $0x30] sm:$0xff]  }
  0x50   : > { %617 = vst [vmem:[#allocation2 + $0x24] sm:$0xf] %v616_v57  ;;  %v4346_v1 = vor.u32 %v4344_v36, %v4342_v46  ;;  %v4348_v4 = vshll.u32 %v9480_v47, 16  ;;  %v4352_v7 = vshrl.u32 %v9480_v47, 16  ;;  %8644 = vmatmul.mubr.msk.bf16.vlgmr.msra.gmra.mrb[0].mxu1 %vm11579_vm13, %v4343_v0  ;;  %v7926_v16 = vpack.c.bf16 %v419_v59, %v419_v59  ;;  %v10062_v36 = vld [vmem:[#allocation2 + $0xb0] sm:$0xff]   ;;  %vm11580_vm13 = vmmov %vm11578_vm11 }
  0x51   : > { %v602_v10 = vshrl.u32 %v7925_v54, 16  ;;  %v605_v12 = vshll.u32 %v7925_v54, 16  ;;  %v421_v17 = vmax.f32 %v389_v49, 0.0  ;;  %8676 = vmatpush3.bf16.msra.mxu1 %v9856_v40  ;;  %v7927_v11 = vpack.c.bf16 %v420_v60, %v420_v60  ;;  %v651_v40 = vld [vmem:[#allocation2 + $0x2c] sm:$0xe] }
  0x52   : > { %v9478_v18 = vld [vmem:[#allocation2 + $0x18] sm:$0xff]   ;;  %v4350_v19 = vrot.slane %v4348_v4, 1  ;;  %v4364_v14 = vshll.u32 %v10040_v38, 16  ;;  %v4368_v50 = vshrl.u32 %v10040_v38, 16  ;;  %v630_v53 = vshrl.u32 %v7926_v16, 16  ;;  %8709 = vmatprep.subr.bf16.mxu1 %v9507_v24 }
  0x53   : > { %v604_v23 = vrot.slane %v602_v10, 7  ;;  %v633_v25 = vshll.u32 %v7926_v16, 16  ;;  %v7928_v27 = vpack.c.bf16 %v421_v17, %v421_v17  ;;  %v1172_v28 = vshll.u32 %v9478_v18, 16  ;;  %v9488_v17 = vld [vmem:[#allocation2 + $0xb8] sm:$0xff]  }
  0x54   : > { %v1176_v29 = vshrl.u32 %v9478_v18, 16  ;;  %v4351_v30 = vsel %vm1147_vm1, %v4346_v1, %v4350_v19  ;;  %v4354_v31 = vor.u32 %v4352_v7, %v4350_v19  ;;  %v632_v34 = vrot.slane %v630_v53, 6  ;;  %v655_v7 = vld [vmem:[#allocation2 + $0x34] sm:$0x3]  ;;  %v685_v19 = vld [vmem:[#allocation2 + $0x34] sm:$0xc] }
  0x55   : > { %8647 = vmatprep.mubr.msk.bf16.mxu1 %vm11578_vm11, %v4351_v30  ;;  %v607_v32 = vor.u32 %v605_v12, %v604_v23  ;;  %v609_v33 = vrot.slane %v604_v23, 4  ;;  %v635_v35 = vrot.slane %v633_v25, 7  ;;  %v1174_v37 = vrot.slane %v1172_v28, 1 }
  0x56   : > { %v4359_v38 = vsel %vm1147_vm1, %v4354_v31, %v10018_v2  ;;  %v639_v39 = vshrl.u32 %v7927_v11, 16  ;;  %v642_v43 = vshll.u32 %v7927_v11, 16  ;;  %v664_v59 = vshrl.u32 %v7928_v27, 16 }
  0x57   : > { %v9479_v46 = vld [vmem:[#allocation2 + $0x20] sm:$0xff]   ;;  %v608_v47 = vsel %vm9976_vm4, %v600_v44, %v607_v32  ;;  %v622_v49 = vsel %vm10005_vm14, %v609_v33, %v621_v20  ;;  %v636_v57 = vor.u32 %v635_v35, %v632_v34  ;;  %v1175_v54 = vsel %vm1147_vm1, %v9992_v21, %v1174_v37 }
  0x58   : > { %v1178_v60 = vor.u32 %v1176_v29, %v1174_v37  ;;  %618 = vst.msk [vmem:[#allocation2 + $0x28] sm:$0xf] %vm201_vm0, %v608_v47  ;;  %623 = vst [vmem:[#allocation2 + $0x2c] sm:$0x1] %v622_v49  ;;  %v641_v2 = vrot.slane %v639_v39, 6  ;;  %v644_v24 = vrot.slane %v642_v43, 7  ;;  %8341 = vmatprep.mubr.msk.bf16.mxu0 %vm11580_vm13, %v1175_v54  ;;  %8648 = vmatmul.mubr.msk.bf16.gmra.mrb[4].mxu1 %vm11578_vm11, %v4359_v38  ;;  %v7976_v11 = vunpack.c.l.bf16 %v8019_v45 }
  0x59   : > { %v1180_v0 = vshll.u32 %v9479_v46, 16  ;;  %v652_v44 = vsel %vm9872_vm15, %v636_v57, %v651_v40  ;;  %v1184_v1 = vshrl.u32 %v9479_v46, 16  ;;  %v637_v4 = vrot.slane %v636_v57, 4  ;;  %vm11581_vm13 = vmmov %vm11578_vm11 }
  0x5a   : > { %653 = vst [vmem:[#allocation2 + $0x2c] sm:$0xe] %v652_v44  ;;  %v645_v10 = vor.u32 %v644_v24, %v641_v2  ;;  %v666_v21 = vrot.slane %v664_v59, 5  ;;  %v667_v12 = vshll.u32 %v7928_v27, 16  ;;  %v4366_v16 = vrot.slane %v4364_v14, 1  ;;  %v10086_v14 = vld [vmem:[#allocation2 + $0xc0] sm:$0xff]  }
  0x5b   : > { %v1182_v18 = vrot.slane %v1180_v0, 1  ;;  %v4372_v20 = vshll.u32 %v10062_v36, 16  ;;  %v352_v23 = vmul.f32 %v7973_v52, %v9819_v3  ;;  %v8020_v52 = vld [vmem:[%s9814_s24 + $0x38] sm:$0xff]   ;;  %v7977_v35 = vunpack.c.h.bf16 %v8019_v45 }
  0x5c   : > { %v646_v53 = vsel %vm9866_vm12, %v637_v4, %v645_v10  ;;  %v647_v25 = vrot.slane %v645_v10, 4  ;;  %v669_v28 = vrot.slane %v667_v12, 6  ;;  %v4367_v27 = vsel %vm1147_vm1, %v10047_v51, %v4366_v16  ;;  %v719_v12 = vld [vmem:[#allocation2 + $0x3c] sm:$0x8] }
  0x5d   : > { %v1183_v29 = vsel %vm1147_vm1, %v1178_v60, %v1182_v18  ;;  %v1186_v30 = vor.u32 %v1184_v1, %v1182_v18  ;;  %654 = vst.msk [vmem:[#allocation2 + $0x30] sm:$0xf] %vm201_vm0, %v646_v53  ;;  %8651 = vmatprep.mubr.msk.bf16.mxu1 %vm11581_vm13, %v4367_v27  ;;  %v4370_v31 = vor.u32 %v4368_v50, %v4366_v16  ;;  %v4374_v62 = vrot.slane %v4372_v20, 1  ;;  %vm11582_vm13 = vmmov %vm11578_vm11 }
  0x5e   : > { %8342 = vmatmul.mubr.msk.bf16.gmra.mrb[4].mxu0 %vm11578_vm11, %v1183_v29  ;;  %v656_v40 = vsel %vm9884_vm3, %v647_v25, %v655_v7  ;;  %v670_v32 = vor.u32 %v669_v28, %v666_v21  ;;  %v353_v51 = vmul.f32 %v7976_v11, %v9819_v3  ;;  %v390_v33 = vadd.f32 %v9826_v6, %v352_v23  ;;  %v689_v28 = vld [vmem:[#allocation2 + $0x3c] sm:$0x7] }
  0x5f   : > { %657 = vst [vmem:[#allocation2 + $0x34] sm:$0x3] %v656_v40  ;;  %v4375_v34 = vsel %vm1147_vm1, %v4370_v31, %v4374_v62  ;;  %v4376_v37 = vshrl.u32 %v10062_v36, 16  ;;  %v4380_v38 = vshll.u32 %v9488_v17, 16  ;;  %v354_v49 = vmul.f32 %v7977_v35, %v9819_v3 }
  0x60   : > { %v686_v50 = vsel %vm9878_vm2, %v670_v32, %v685_v19  ;;  %v391_v39 = vadd.f32 %v9826_v6, %v353_v51  ;;  %v422_v43 = vmax.f32 %v390_v33, 0.0  ;;  %v671_v46 = vrot.slane %v670_v32, 4  ;;  %8652 = vmatmul.mubr.msk.bf16.gmra.mrb[8].mxu1 %vm11582_vm13, %v4375_v34  ;;  %v8021_v19 = vld [vmem:[%s9814_s24 + $0x40] sm:$0xff]   ;;  %vm11583_vm13 = vmmov %vm11578_vm11 }
  0x61   : > { %v9482_v47 = vld [vmem:[#allocation2 + $0x28] sm:$0xff]   ;;  %687 = vst [vmem:[#allocation2 + $0x34] sm:$0xc] %v686_v50  ;;  %v4378_v57 = vor.u32 %v4376_v37, %v4374_v62  ;;  %v4382_v59 = vrot.slane %v4380_v38, 1  ;;  %v4384_v54 = vshrl.u32 %v9488_v17, 16  ;;  %v4388_v36 = vshll.u32 %v10086_v14, 16 }
  0x62   : > { %v423_v45 = vmax.f32 %v391_v39, 0.0  ;;  %v7929_v60 = vpack.c.bf16 %v422_v43, %v422_v43  ;;  %v7980_v2 = vunpack.c.l.bf16 %v8020_v52  ;;  %v1188_v24 = vshll.u32 %v9482_v47, 16  ;;  %v10120_v32 = vld [vmem:[%s11549_s1] ss:$0 sm:$0xff] }
  0x63   : > { %v1192_v0 = vshrl.u32 %v9482_v47, 16  ;;  %v392_v44 = vadd.f32 %v9826_v6, %v354_v49  ;;  %v4383_v1 = vsel %vm1147_vm1, %v4378_v57, %v4382_v59  ;;  %v4386_v3 = vor.u32 %v4384_v54, %v4382_v59 }
  0x64   : > { %v673_v4 = vshrl.u32 %v7929_v60, 16  ;;  %v676_v7 = vshll.u32 %v7929_v60, 16  ;;  %v7930_v10 = vpack.c.bf16 %v423_v45, %v423_v45  ;;  %8655 = vmatprep.mubr.msk.bf16.mxu1 %vm11578_vm11, %v4383_v1  ;;  %v1190_v21 = vrot.slane %v1188_v24, 1  ;;  %v723_v45 = vld [vmem:[#allocation2 + $0x44] sm:$0xf] }
  0x65   : > { %v424_v16 = vmax.f32 %v392_v44, 0.0  ;;  %v10108_v17 = vrot.slane %v4388_v36, 1  ;;  %v7981_v18 = vunpack.c.h.bf16 %v8020_v52  ;;  %v7984_v35 = vunpack.c.l.bf16 %v8021_v19 }
  0x66   : > { %v675_v20 = vrot.slane %v673_v4, 5  ;;  %v678_v11 = vrot.slane %v676_v7, 6  ;;  %v698_v23 = vshll.u32 %v7930_v10, 16  ;;  %v701_v53 = vshrl.u32 %v7930_v10, 16 }
  0x67   : > { %v1191_v6 = vsel %vm1147_vm1, %v1186_v30, %v1190_v21  ;;  %v1194_v25 = vor.u32 %v1192_v0, %v1190_v21  ;;  %v7931_v27 = vpack.c.bf16 %v424_v16, %v424_v16  ;;  %v4391_v29 = vsel %vm1147_vm1, %v4386_v3, %v10108_v17  ;;  %v10145_v21 = vld [vmem:[#allocation2 + $0xd0] sm:$0xff]  }
  0x68   : > { %8345 = vmatprep.mubr.msk.bf16.mxu0 %vm11583_vm13, %v1191_v6  ;;  %v10115_v31 = vld [vmem:[#allocation2 + $0x30] sm:$0xff]   ;;  %v679_v62 = vor.u32 %v678_v11, %v675_v20  ;;  %v700_v40 = vrot.slane %v698_v23, 5  ;;  %v703_v52 = vrot.slane %v701_v53, 4  ;;  %v355_v30 = vmul.f32 %v10120_v32, %v7980_v2  ;;  %8656 = vmatmul.mubr.msk.bf16.gmra.mrb[12].mxu1 %vm11578_vm11, %v4391_v29  ;;  %v10141_v2 = vld [vmem:[#allocation2 + $0xc8] sm:$0xff]   ;;  %vm11584_vm13 = vmmov %vm11578_vm11 }
  0x69   : > { %v707_v51 = vshll.u32 %v7931_v27, 16  ;;  %v711_v33 = vshrl.u32 %v7931_v27, 16  ;;  %v356_v34 = vmul.f32 %v10120_v32, %v7981_v18  ;;  %v1196_v37 = vshll.u32 %v10115_v31, 16 }
  0x6a   : > { %v680_v38 = vsel %vm9892_vm5, %v671_v46, %v679_v62  ;;  %v681_v50 = vrot.slane %v679_v62, 4  ;;  %v720_v39 = vsel %vm9912_vm6, %v700_v40, %v719_v12  ;;  %v1200_v43 = vshrl.u32 %v10115_v31, 16  ;;  %v10137_v46 = vld [vmem:[%s11550_s2] ss:$0 sm:$0xff] }
  0x6b   : > { %688 = vst.msk [vmem:[#allocation2 + $0x38] sm:$0xf] %vm201_vm0, %v680_v38  ;;  %721 = vst [vmem:[#allocation2 + $0x3c] sm:$0x8] %v720_v39  ;;  %v704_v47 = vor.u32 %v703_v52, %v700_v40  ;;  %v709_v49 = vrot.slane %v707_v51, 5  ;;  %v713_v57 = vrot.slane %v711_v33, 4  ;;  %v393_v60 = vadd.f32 %v10137_v46, %v355_v30 }
  0x6c   : > { %v1198_v59 = vrot.slane %v1196_v37, 1  ;;  %v690_v54 = vsel %vm9918_vm9, %v681_v50, %v689_v28  ;;  %v394_v36 = vadd.f32 %v10137_v46, %v356_v34  ;;  %v7985_v44 = vunpack.c.h.bf16 %v8021_v19  ;;  %v10153_v19 = vld [vmem:[%s9814_s24 + $0x48] sm:$0xff]   ;;  %v755_v39 = vld [vmem:[#allocation2 + $0x50] sm:$0x1] }
  0x6d   : > { %691 = vst [vmem:[#allocation2 + $0x3c] sm:$0x7] %v690_v54  ;;  %v705_v24 = vrot.slane %v704_v47, 4  ;;  %v714_v0 = vor.u32 %v713_v57, %v709_v49  ;;  %v357_v1 = vmul.f32 %v10120_v32, %v7984_v35  ;;  %v425_v10 = vmax.f32 %v393_v60, 0.0  ;;  %v751_v51 = vld [vmem:[#allocation2 + $0x48] sm:$0xf] }
  0x6e   : > { %v1199_v4 = vsel %vm1147_vm1, %v1194_v25, %v1198_v59  ;;  %v1202_v7 = vor.u32 %v1200_v43, %v1198_v59  ;;  %v426_v3 = vmax.f32 %v394_v36, 0.0  ;;  %v358_v18 = vmul.f32 %v10120_v32, %v7985_v44 }
  0x6f   : > { %8346 = vmatmul.mubr.msk.bf16.gmra.mrb[8].mxu0 %vm11584_vm13, %v1199_v4  ;;  %v710_v12 = vsel %vm9925_vm10, %v705_v24, %v709_v49  ;;  %v715_v16 = vrot.slane %v714_v0, 4  ;;  %v395_v20 = vadd.f32 %v10137_v46, %v357_v1  ;;  %v7932_v11 = vpack.c.bf16 %v425_v10, %v425_v10  ;;  %vm11585_vm13 = vmmov %vm11578_vm11 }
  0x70   : > { %722 = vst.msk [vmem:[#allocation2 + $0x40] sm:$0xf] %vm201_vm0, %v710_v12  ;;  %v7933_v23 = vpack.c.bf16 %v426_v3, %v426_v3  ;;  %v4392_v53 = vshrl.u32 %v10086_v14, 16  ;;  %v4396_v6 = vshll.u32 %v10141_v2, 16  ;;  %v396_v28 = vadd.f32 %v10137_v46, %v358_v18  ;;  %v8023_v18 = vld [vmem:[%s9814_s24 + $0x50] sm:$0xff]  }
  0x71   : > { %v724_v25 = vsel %vm9935_vm8, %v715_v16, %v723_v45  ;;  %v427_v27 = vmax.f32 %v395_v20, 0.0  ;;  %v4400_v29 = vshrl.u32 %v10141_v2, 16  ;;  %v732_v62 = vshrl.u32 %v7932_v11, 16  ;;  %v785_v16 = vld [vmem:[#allocation2 + $0x50] sm:$0xe] }
  0x72   : > { %725 = vst [vmem:[#allocation2 + $0x44] sm:$0xf] %v724_v25  ;;  %v735_v40 = vshll.u32 %v7932_v11, 16  ;;  %v740_v52 = vshrl.u32 %v7933_v23, 16  ;;  %v743_v30 = vshll.u32 %v7933_v23, 16  ;;  %v428_v33 = vmax.f32 %v396_v28, 0.0 }
  0x73   : > { %v7934_v34 = vpack.c.bf16 %v427_v27, %v427_v27  ;;  %v4394_v14 = vor.u32 %v4392_v53, %v10108_v17  ;;  %v4398_v35 = vrot.slane %v4396_v6, 1  ;;  %v734_v38 = vrot.slane %v732_v62, 7 }
  0x74   : > { %v10163_v37 = vld [vmem:[#allocation2 + $0x38] sm:$0xff]   ;;  %v742_v50 = vrot.slane %v740_v52, 7  ;;  %v4404_v43 = vshll.u32 %v10145_v21, 16  ;;  %v7988_v47 = vunpack.c.l.bf16 %v10153_v19  ;;  %v7935_v49 = vpack.c.bf16 %v428_v33, %v428_v33 }
  0x75   : > { %v764_v57 = vshrl.u32 %v7934_v34, 16  ;;  %v767_v59 = vshll.u32 %v7934_v34, 16  ;;  %v4399_v54 = vsel %vm1147_vm1, %v4394_v14, %v4398_v35  ;;  %v1204_v45 = vshll.u32 %v10163_v37, 16  ;;  %v10187_v33 = vld [vmem:[#allocation2 + $0xd8] sm:$0xff]  }
  0x76   : > { %v1208_v17 = vshrl.u32 %v10163_v37, 16  ;;  %v737_v60 = vor.u32 %v735_v40, %v734_v38  ;;  %v738_v36 = vrot.slane %v734_v38, 4  ;;  %8659 = vmatprep.mubr.msk.bf16.mxu1 %vm11578_vm11, %v4399_v54  ;;  %v745_v24 = vor.u32 %v743_v30, %v742_v50  ;;  %v10191_v38 = vld [vmem:[#allocation2 + $0xe0] sm:$0xff]  }
  0x77   : > { %v747_v0 = vrot.slane %v742_v50, 4  ;;  %v766_v44 = vrot.slane %v764_v57, 6  ;;  %v769_v1 = vrot.slane %v767_v59, 7  ;;  %v1206_v4 = vrot.slane %v1204_v45, 1 }
  0x78   : > { %v752_v10 = vsel %vm9984_vm7, %v737_v60, %v751_v51  ;;  %v773_v3 = vshrl.u32 %v7935_v49, 16  ;;  %v776_v12 = vshll.u32 %v7935_v49, 16  ;;  %v746_v11 = vsel %vm9976_vm4, %v738_v36, %v745_v24 }
  0x79   : > { %v10174_v20 = vld [vmem:[#allocation2 + $0x40] sm:$0xff]   ;;  %753 = vst [vmem:[#allocation2 + $0x48] sm:$0xf] %v752_v10  ;;  %v756_v23 = vsel %vm10005_vm14, %v747_v0, %v755_v39  ;;  %v770_v53 = vor.u32 %v769_v1, %v766_v44  ;;  %v4402_v6 = vor.u32 %v4400_v29, %v4398_v35  ;;  %v1207_v25 = vsel %vm1147_vm1, %v1202_v7, %v1206_v4  ;;  %v789_v35 = vld [vmem:[#allocation2 + $0x58] sm:$0x3] }
  0x7a   : > { %v1210_v28 = vor.u32 %v1208_v17, %v1206_v4  ;;  %754 = vst.msk [vmem:[#allocation2 + $0x4c] sm:$0xf] %vm201_vm0, %v746_v11  ;;  %757 = vst [vmem:[#allocation2 + $0x50] sm:$0x1] %v756_v23  ;;  %v775_v27 = vrot.slane %v773_v3, 6  ;;  %v778_v62 = vrot.slane %v776_v12, 7  ;;  %8349 = vmatprep.mubr.msk.bf16.mxu0 %vm11585_vm13, %v1207_v25  ;;  %v7989_v34 = vunpack.c.h.bf16 %v10153_v19 }
  0x7b   : > { %v1212_v40 = vshll.u32 %v10174_v20, 16  ;;  %v1216_v52 = vshrl.u32 %v10174_v20, 16  ;;  %v771_v30 = vrot.slane %v770_v53, 4  ;;  %v786_v51 = vsel %vm9872_vm15, %v770_v53, %v785_v16  ;;  %vm11586_vm13 = vmmov %vm11578_vm11 }
  0x7c   : > { %v779_v29 = vor.u32 %v778_v62, %v775_v27  ;;  %787 = vst [vmem:[#allocation2 + $0x50] sm:$0xe] %v786_v51  ;;  %v4406_v7 = vrot.slane %v4404_v43, 1  ;;  %v359_v14 = vmul.f32 %v10120_v32, %v7988_v47  ;;  %v7992_v39 = vunpack.c.l.bf16 %v8023_v18  ;;  %v819_v51 = vld [vmem:[#allocation2 + $0x58] sm:$0xc] }
  0x7d   : > { %v1214_v50 = vrot.slane %v1212_v40, 1  ;;  %v7993_v49 = vunpack.c.h.bf16 %v8023_v18  ;;  %v4408_v57 = vshrl.u32 %v10145_v21, 16  ;;  %v360_v45 = vmul.f32 %v10120_v32, %v7989_v34 }
  0x7e   : > { %v780_v59 = vsel %vm9866_vm12, %v771_v30, %v779_v29  ;;  %v4407_v54 = vsel %vm1147_vm1, %v4402_v6, %v4406_v7  ;;  %v397_v43 = vadd.f32 %v10137_v46, %v359_v14  ;;  %v781_v17 = vrot.slane %v779_v29, 4 }
  0x7f   : > { %v1215_v19 = vsel %vm1147_vm1, %v1210_v28, %v1214_v50  ;;  %v1218_v47 = vor.u32 %v1216_v52, %v1214_v50  ;;  %788 = vst.msk [vmem:[#allocation2 + $0x54] sm:$0xf] %vm201_vm0, %v780_v59  ;;  %8660 = vmatmul.mubr.msk.bf16.gmra.mrb[16].mxu1 %vm11578_vm11, %v4407_v54  ;;  %v361_v60 = vmul.f32 %v10120_v32, %v7992_v39  ;;  %v4412_v3 = vshll.u32 %v10187_v33, 16 }
  0x80   : > { %8350 = vmatmul.mubr.msk.bf16.gmra.mrb[12].mxu0 %vm11586_vm13, %v1215_v19  ;;  %v398_v36 = vadd.f32 %v10137_v46, %v360_v45  ;;  %v429_v24 = vmax.f32 %v397_v43, 0.0  ;;  %v362_v0 = vmul.f32 %v10120_v32, %v7993_v49  ;;  %v4410_v44 = vor.u32 %v4408_v57, %v4406_v7  ;;  %v853_v57 = vld [vmem:[#allocation2 + $0x60] sm:$0x8]  ;;  %vm11587_vm13 = vmmov %vm11578_vm11 }
  0x81   : > { %v10206_v1 = vld [vmem:[#allocation2 + $0x48] sm:$0xff]   ;;  %v790_v4 = vsel %vm9884_vm3, %v781_v17, %v789_v35  ;;  %v399_v10 = vadd.f32 %v10137_v46, %v361_v60  ;;  %v4416_v12 = vshrl.u32 %v10187_v33, 16  ;;  %v4420_v23 = vshll.u32 %v10191_v38, 16 }
  0x82   : > { %v430_v16 = vmax.f32 %v398_v36, 0.0  ;;  %791 = vst [vmem:[#allocation2 + $0x58] sm:$0x3] %v790_v4  ;;  %v7936_v18 = vpack.c.bf16 %v429_v24, %v429_v24  ;;  %v400_v11 = vadd.f32 %v10137_v46, %v362_v0  ;;  %v1220_v53 = vshll.u32 %v10206_v1, 16  ;;  %v8024_v24 = vld [vmem:[%s9814_s24 + $0x58] sm:$0xff]  }
  0x83   : > { %v1224_v6 = vshrl.u32 %v10206_v1, 16  ;;  %v431_v25 = vmax.f32 %v399_v10, 0.0  ;;  %v4414_v28 = vrot.slane %v4412_v3, 1  ;;  %v8025_v3 = vld [vmem:[%s9814_s24 + $0x60] sm:$0xff]   ;;  %s11415_s24 = scalar_lea.vmem %s11552_s4, %s7917_s21 }
  0x84   : > { %v7937_v27 = vpack.c.bf16 %v430_v16, %v430_v16  ;;  %v798_v62 = vshrl.u32 %v7936_v18, 16  ;;  %v801_v40 = vshll.u32 %v7936_v18, 16  ;;  %v432_v52 = vmax.f32 %v400_v11, 0.0  ;;  %v823_v18 = vld [vmem:[#allocation2 + $0x60] sm:$0x7] }
  0x85   : > { %v1222_v30 = vrot.slane %v1220_v53, 1  ;;  %v7938_v29 = vpack.c.bf16 %v431_v25, %v431_v25  ;;  %v4415_v7 = vsel %vm1147_vm1, %v4410_v44, %v4414_v28  ;;  %v4418_v34 = vor.u32 %v4416_v12, %v4414_v28  ;;  %v10229_v53 = vld [vmem:[#allocation2 + $0xe8] sm:$0xff]  }
  0x86   : > { %v10218_v14 = vld [vmem:[#allocation2 + $0x50] sm:$0xff]   ;;  %v800_v35 = vrot.slane %v798_v62, 5  ;;  %v803_v50 = vrot.slane %v801_v40, 6  ;;  %v807_v39 = vshrl.u32 %v7937_v27, 16  ;;  %v7939_v49 = vpack.c.bf16 %v432_v52, %v432_v52  ;;  %8663 = vmatprep.mubr.msk.bf16.mxu1 %vm11578_vm11, %v4415_v7 }
  0x87   : > { %v1223_v59 = vsel %vm1147_vm1, %v1218_v47, %v1222_v30  ;;  %v1226_v54 = vor.u32 %v1224_v6, %v1222_v30  ;;  %v810_v45 = vshll.u32 %v7937_v27, 16  ;;  %v832_v43 = vshll.u32 %v7938_v29, 16 }
  0x88   : > { %8353 = vmatprep.mubr.msk.bf16.mxu0 %vm11587_vm13, %v1223_v59  ;;  %v1228_v19 = vshll.u32 %v10218_v14, 16  ;;  %v804_v17 = vor.u32 %v803_v50, %v800_v35  ;;  %v809_v60 = vrot.slane %v807_v39, 5  ;;  %v1232_v36 = vshrl.u32 %v10218_v14, 16  ;;  %vm11588_vm13 = vmmov %vm11578_vm11 }
  0x89   : > { %v812_v0 = vrot.slane %v810_v45, 6  ;;  %v834_v44 = vrot.slane %v832_v43, 5  ;;  %v835_v4 = vshrl.u32 %v7938_v29, 16  ;;  %v841_v10 = vshll.u32 %v7939_v49, 16 }
  0x8a   : > { %v1230_v12 = vrot.slane %v1228_v19, 1  ;;  %v805_v16 = vrot.slane %v804_v17, 4  ;;  %v820_v47 = vsel %vm9878_vm2, %v804_v17, %v819_v51  ;;  %v4422_v11 = vrot.slane %v4420_v23, 1  ;;  %v953_v17 = vld [vmem:[#allocation2 + $0x7c] sm:$0xc] }
  0x8b   : > { %v813_v6 = vor.u32 %v812_v0, %v809_v60  ;;  %821 = vst [vmem:[#allocation2 + $0x58] sm:$0xc] %v820_v47  ;;  %v837_v25 = vrot.slane %v835_v4, 4  ;;  %v843_v28 = vrot.slane %v841_v10, 5  ;;  %v854_v27 = vsel %vm9912_vm6, %v834_v44, %v853_v57 }
  0x8c   : > { %v1231_v62 = vsel %vm1147_vm1, %v1226_v54, %v1230_v12  ;;  %855 = vst [vmem:[#allocation2 + $0x60] sm:$0x8] %v854_v27  ;;  %v4423_v40 = vsel %vm1147_vm1, %v4418_v34, %v4422_v11  ;;  %v7996_v52 = vunpack.c.l.bf16 %v8024_v24  ;;  %v845_v29 = vshrl.u32 %v7939_v49, 16  ;;  %v10242_v34 = vld [vmem:[#allocation2 + $0xf0] sm:$0xff]   ;;  %v857_v54 = vld [vmem:[#allocation2 + $0x68] sm:$0xf] }
  0x8d   : > { %8354 = vmatmul.mubr.msk.bf16.gmra.mrb[16].mxu0 %vm11578_vm11, %v1231_v62  ;;  %v814_v23 = vsel %vm9892_vm5, %v805_v16, %v813_v6  ;;  %v815_v30 = vrot.slane %v813_v6, 4  ;;  %v838_v51 = vor.u32 %v837_v25, %v834_v44  ;;  %8664 = vmatmul.mubr.msk.bf16.gmra.mrb[20].mxu1 %vm11588_vm13, %v4423_v40  ;;  %v7997_v7 = vunpack.c.h.bf16 %v8024_v24  ;;  %vm11589_vm5 = vmmov %vm11578_vm11 }
  0x8e   : > { %822 = vst.msk [vmem:[#allocation2 + $0x5c] sm:$0xf] %vm201_vm0, %v814_v23  ;;  %v363_v42 = vmul.f32 %v10120_v32, %v7996_v52  ;;  %v8000_v35 = vunpack.c.l.bf16 %v8025_v3  ;;  %v4424_v50 = vshrl.u32 %v10191_v38, 16  ;;  %v847_v57 = vrot.slane %v845_v29, 4 }
  0x8f   : > { %v824_v39 = vsel %vm9918_vm9, %v815_v30, %v823_v18  ;;  %v839_v22 = vrot.slane %v838_v51, 4  ;;  %v4428_v59 = vshll.u32 %v10229_v53, 16  ;;  %v364_v45 = vmul.f32 %v10120_v32, %v7997_v7 }
  0x90   : > { %825 = vst [vmem:[#allocation2 + $0x60] sm:$0x7] %v824_v39  ;;  %v401_v49 = vadd.f32 %v10137_v46, %v363_v42  ;;  %v365_v43 = vmul.f32 %v10120_v32, %v8000_v35  ;;  %v4426_v19 = vor.u32 %v4424_v50, %v4422_v11  ;;  %v848_v24 = vor.u32 %v847_v57, %v843_v28  ;;  %v889_v57 = vld [vmem:[#allocation2 + $0x74] sm:$0x1] }
  0x91   : > { %v844_v60 = vsel %vm9925_vm10, %v839_v22, %v843_v28  ;;  %v4430_v48 = vrot.slane %v4428_v59, 1  ;;  %v4432_v0 = vshrl.u32 %v10229_v53, 16  ;;  %v402_v4 = vadd.f32 %v10137_v46, %v364_v45 }
  0x92   : > { %856 = vst.msk [vmem:[#allocation2 + $0x64] sm:$0xf] %vm201_vm0, %v844_v60  ;;  %v433_v44 = vmax.f32 %v401_v49, 0.0  ;;  %v403_v10 = vadd.f32 %v10137_v46, %v365_v43  ;;  %v4436_v16 = vshll.u32 %v10242_v34, 16  ;;  %v849_v47 = vrot.slane %v848_v24, 4 }
  0x93   : > { %v4431_v18 = vsel %vm1147_vm1, %v4426_v19, %v4430_v48  ;;  %v4434_v11 = vor.u32 %v4432_v0, %v4430_v48  ;;  %v8001_v6 = vunpack.c.h.bf16 %v8025_v3  ;;  %v434_v25 = vmax.f32 %v402_v4, 0.0  ;;  %v10280_v48 = vld [vmem:[#allocation2 + $0x100] ss:$0 sps:$4 sm:$0x11]  }
  0x94   : > { %v7940_v55 = vpack.c.bf16 %v433_v44, %v433_v44  ;;  %v435_v28 = vmax.f32 %v403_v10, 0.0  ;;  %8667 = vmatprep.mubr.msk.bf16.mxu1 %vm11589_vm5, %v4431_v18  ;;  %v4438_v27 = vrot.slane %v4436_v16, 1  ;;  %v1234_v40 = vor.u32 %v1232_v36, %v1230_v12  ;;  %v885_v36 = vld [vmem:[#allocation2 + $0x6c] sm:$0xf] }
  0x95   : > { %v10259_v62 = vld [vmem:[#allocation2 + $0x58] sm:$0xff]   ;;  %v858_v52 = vsel %vm9935_vm8, %v849_v47, %v857_v54  ;;  %v366_v23 = vmul.f32 %v10120_v32, %v8001_v6  ;;  %v954_v3 = vsel %vm9878_vm2, %v9929_v56, %v953_v17  ;;  %v7941_v29 = vpack.c.bf16 %v434_v25, %v434_v25  ;;  %vm11590_vm2 = vmmov %vm11589_vm5  ;;  %v919_v47 = vld [vmem:[#allocation2 + $0x74] sm:$0xe] }
  0x96   : > { %859 = vst [vmem:[#allocation2 + $0x68] sm:$0xf] %v858_v52  ;;  %v866_v30 = vshrl.u32 %v7940_v55, 16  ;;  %v869_v51 = vshll.u32 %v7940_v55, 16  ;;  %v7942_v42 = vpack.c.bf16 %v435_v28, %v435_v28  ;;  %955 = vst [vmem:[#allocation2 + $0x7c] sm:$0xc] %v954_v3  ;;  %v4439_v5 = vsel %vm1147_vm1, %v4434_v11, %v4438_v27 }
  0x97   : > { %v1236_v7 = vshll.u32 %v10259_v62, 16  ;;  %v1240_v35 = vshrl.u32 %v10259_v62, 16  ;;  %v404_v12 = vadd.f32 %v10137_v46, %v366_v23  ;;  %v874_v50 = vshrl.u32 %v7941_v29, 16  ;;  %8668 = vmatmul.mubr.msk.bf16.gmra.mrb[24].mxu1 %vm11590_vm2, %v4439_v5  ;;  %v10276_v17 = vld [vmem:[#allocation2 + $0xf8] sm:$0xff]   ;;  %vm11591_vm6 = vmmov %vm11590_vm2 }
  0x98   : > { %v868_v32 = vrot.slane %v866_v30, 7  ;;  %v877_v39 = vshll.u32 %v7941_v29, 16  ;;  %v898_v8 = vshrl.u32 %v7942_v42, 16  ;;  %v901_v59 = vshll.u32 %v7942_v42, 16  ;;  %vm11593_vm9 = vmmov %vm11590_vm2 }
  0x99   : > { %v1238_v56 = vrot.slane %v1236_v7, 1  ;;  %v10274_v22 = vld [vmem:[#allocation2 + $0x60] sm:$0xff]   ;;  %v436_v49 = vmax.f32 %v404_v12, 0.0  ;;  %v876_v43 = vrot.slane %v874_v50, 7  ;;  %v4440_v11 = vshrl.u32 %v10242_v34, 16  ;;  %vm11595_vm10 = vmmov %vm11590_vm2 }
  0x9a   : > { %v871_v54 = vor.u32 %v869_v51, %v868_v32  ;;  %v872_v45 = vrot.slane %v868_v32, 4  ;;  %v900_v19 = vrot.slane %v898_v8, 6  ;;  %v1244_v24 = vshll.u32 %v10274_v22, 16 }
  0x9b   : > { %v1239_v46 = vsel %vm1147_vm1, %v1234_v40, %v1238_v56  ;;  %v1242_v60 = vor.u32 %v1240_v35, %v1238_v56  ;;  %v879_v44 = vor.u32 %v877_v39, %v876_v43  ;;  %v881_v4 = vrot.slane %v876_v43, 4 }
  0x9c   : > { %8357 = vmatprep.mubr.msk.bf16.mxu0 %vm11591_vm6, %v1239_v46  ;;  %v886_v0 = vsel %vm9984_vm7, %v871_v54, %v885_v36  ;;  %v903_v10 = vrot.slane %v901_v59, 7  ;;  %v1246_v16 = vrot.slane %v1244_v24, 1  ;;  %v7943_v18 = vpack.c.bf16 %v436_v49, %v436_v49  ;;  %vm11592_vm7 = vmmov %vm11590_vm2  ;;  %v10316_v54 = vld [vmem:[#allocation2 + $0x80] ss:$0 sps:$4 sm:$0x11]   ;;  %v10328_v24 = vld [vmem:[#allocation2 + $0x88] sm:$0xff]  }
  0x9d   : > { %887 = vst [vmem:[#allocation2 + $0x6c] sm:$0xf] %v886_v0  ;;  %v880_v6 = vsel %vm9976_vm4, %v872_v45, %v879_v44  ;;  %v890_v55 = vsel %vm10005_vm14, %v881_v4, %v889_v57  ;;  %v4444_v28 = vshll.u32 %v10276_v17, 16  ;;  %v4442_v3 = vor.u32 %v4440_v11, %v4438_v27  ;;  %v923_v27 = vld [vmem:[#allocation2 + $0x7c] sm:$0x3]  ;;  %v9599_v4 = vld [vmem:[%s11551_s3 + $0x10] sm:$0xff]  }
  0x9e   : > { %v904_v25 = vor.u32 %v903_v10, %v900_v19  ;;  %v1247_v9 = vsel %vm1147_vm1, %v1242_v60, %v1246_v16  ;;  %888 = vst.msk [vmem:[#allocation2 + $0x70] sm:$0xf] %vm201_vm0, %v880_v6  ;;  %891 = vst [vmem:[#allocation2 + $0x74] sm:$0x1] %v890_v55  ;;  %v907_v40 = vshrl.u32 %v7943_v18, 16  ;;  %v910_v52 = vshll.u32 %v7943_v18, 16 }
  0x9f   : > { %8358 = vmatmul.mubr.msk.bf16.gmra.mrb[20].mxu0 %vm11592_vm7, %v1247_v9  ;;  %v4446_v30 = vrot.slane %v4444_v28, 1  ;;  %v4448_v29 = vshrl.u32 %v10276_v17, 16  ;;  %v4452_v42 = vshll.u32 %v10280_v48, 16  ;;  %v1248_v7 = vshrl.u32 %v10274_v22, 16  ;;  %v10339_v10 = vld [vmem:[#allocation2 + $0x90] sm:$0xff]   ;;  %v10348_v28 = vld [vmem:[#allocation2 + $0x98] sm:$0xff]  }
  0xa0   : > { %v920_v23 = vsel %vm9872_vm15, %v904_v25, %v919_v47  ;;  %v905_v61 = vrot.slane %v904_v25, 4  ;;  %v909_v41 = vrot.slane %v907_v40, 6  ;;  %v912_v51 = vrot.slane %v910_v52, 7  ;;  %vm11594_vm15 = vmmov %vm11590_vm2  ;;  %v10353_v40 = vld [vmem:[#allocation2 + $0xa0] sm:$0xff]   ;;  %v10360_v52 = vld [vmem:[#allocation2 + $0xa8] sm:$0xff]  }
  0xa1   : > { %921 = vst [vmem:[#allocation2 + $0x74] sm:$0xe] %v920_v23  ;;  %v4447_v35 = vsel %vm1147_vm1, %v4442_v3, %v4446_v30  ;;  %v4450_v5 = vor.u32 %v4448_v29, %v4446_v30  ;;  %v4454_v63 = vrot.slane %v4452_v42, 1  ;;  %v1250_v8 = vor.u32 %v1248_v7, %v1246_v16  ;;  %v10367_v23 = vld [vmem:[%s11551_s3 + $0x18] sm:$0xff]   ;;  %v10373_v3 = vld [vmem:[#allocation2 + $0x8] sm:$0xff]   ;;  %v10380_v30 = vld [vmem:[#allocation2 + $0x10] sm:$0xff]  }
  0xa2   : > { %v913_v36 = vor.u32 %v912_v51, %v909_v41  ;;  %8671 = vmatprep.mubr.msk.bf16.mxu1 %vm11593_vm9, %v4447_v35  ;;  %v1276_v44 = vshll.u32 %v10316_v54, 16  ;;  %v10385_v41 = vld [vmem:[#allocation2 + $0xb8] sm:$0xff]   ;;  %v10389_v51 = vld [vmem:[#allocation2 + $0xc0] sm:$0xff]   ;;  %v10405_v7 = vld [vmem:[#allocation2 + $0x28] sm:$0xff]  }
  0xa3   : > { %v4455_v39 = vsel %vm1147_vm1, %v4450_v5, %v4454_v63  ;;  %v10393_v29 = vld [vmem:[#allocation2 + $0x18] sm:$0xff]   ;;  %v10397_v42 = vld [vmem:[#allocation2 + $0x20] sm:$0xff]   ;;  %v4879_v63 = vrot.slane %v10339_v10, 1 }
  0xa4   : > { %v10301_v12 = vld [vmem:[#allocation2 + $0x68] sm:$0xff]   ;;  %v914_v32 = vsel %vm9866_vm12, %v905_v61, %v913_v36  ;;  %v915_v50 = vrot.slane %v913_v36, 4  ;;  %8672 = vmatmul.mubr.msk.bf16.gmra.mrb[28].mxu1 %vm11594_vm15, %v4455_v39  ;;  %v1278_v6 = vrot.slane %v1276_v44, 1  ;;  %v10369_v61 = vld [vmem:[#allocation2 + $0xb0] sm:$0xff]   ;;  %v4877_v36 = vrot.slane %v10328_v24, 1 }
  0xa5   : > { %v1252_v56 = vshll.u32 %v10301_v12, 16  ;;  %v1256_v57 = vshrl.u32 %v10301_v12, 16  ;;  %922 = vst.msk [vmem:[#allocation2 + $0x78] sm:$0xf] %vm201_vm0, %v914_v32  ;;  %8677 = vmatprep.mubr.msk.bf16.mxu1 %vm11595_vm10, %v9990_v15  ;;  %vm11596_vm0 = vmmov %vm11590_vm2  ;;  %v1695_v32 = vld [vmem:[#allocation2] sm:$0xe] }
  0xa6   : > { %v924_v59 = vsel %vm9884_vm3, %v915_v50, %v923_v27  ;;  %vm11597_vm12 = vmmov %vm11596_vm0  ;;  %v4881_v27 = vrot.slane %v10348_v28, 1  ;;  %v1708_v44 = vrot.slane %v10393_v29, 1 }
  0xa7   : > { %v1254_v58 = vrot.slane %v1252_v56, 1  ;;  %925 = vst [vmem:[#allocation2 + $0x7c] sm:$0x3] %v924_v59  ;;  %vm11598_vm3 = vmmov %vm11596_vm0  ;;  %v9614_v56 = vld [vmem:[#allocation2 + $0x4] sm:$0xf]  ;;  %v4883_v59 = vrot.slane %v10353_v40, 1 }
  0xa8   : > { %v10314_v49 = vld [vmem:[#allocation2 + $0x70] sm:$0xff]   ;;  %vm11599_vm8 = vmmov %vm11596_vm0 }
  0xa9   : > { %v1255_v45 = vsel %vm1147_vm1, %v1250_v8, %v1254_v58  ;;  %v1258_v43 = vor.u32 %v1256_v57, %v1254_v58  ;;  %v1260_v19 = vshll.u32 %v10314_v49, 16  ;;  %v1264_v15 = vshrl.u32 %v10314_v49, 16  ;;  %vm11600_vm4 = vmmov %vm11596_vm0  ;;  %v10443_v8 = vld [vmem:[%s11551_s3 + $0x20] sm:$0xff]  }
  0xaa   : > { %8361 = vmatprep.mubr.msk.bf16.mxu0 %vm11596_vm0, %v1255_v45  ;;  %vm11601_vm14 = vmmov %vm11596_vm0  ;;  %v7519_v57 = vcombine.low %v1695_v32, %v9614_v56  ;;  %v4885_v58 = vrot.slane %v10360_v52, 1  ;;  %v1724_v32 = vrot.slane %v10259_v62, 1 }
  0xab   : > { %v1262_v46 = vrot.slane %v1260_v19, 1  ;;  %vm11602_vm11 = vmmov %vm11596_vm0 }
  0xac   : > { %8678 = vmatmul.mubr.msk.bf16.vlgmr.msra.gmra.mrb[0].mxu1 %vm11597_vm12, %v10328_v24  ;;  %vm11603_vm13 = vmmov %vm11596_vm0  ;;  %v1703_v45 = vrot.slane %v7519_v57, 1  ;;  %v1706_v24 = vrot.slane %v10380_v30, 1 }
  0xad   : > { %v1263_v60 = vsel %vm1147_vm1, %v1258_v43, %v1262_v46  ;;  %8710 = vmatpush3.bf16.msra.mxu1 %v9599_v4  ;;  %8681 = vmatprep.mubr.msk.bf16.mxu1 %vm11599_vm8, %v10339_v10  ;;  %v1266_v16 = vor.u32 %v1264_v15, %v1262_v46  ;;  %vm11604_vm5 = vmmov %vm11596_vm0  ;;  %v1704_v43 = vrot.slane %v10373_v3, 1  ;;  %v4887_v15 = vrot.slane %v10369_v61, 1 }
  0xae   : > { %8362 = vmatmul.mubr.msk.bf16.gmra.mrb[24].mxu0 %vm11598_vm3, %v1263_v60  ;;  %v10333_v0 = vld [vmem:[#allocation2 + $0x78] sm:$0xff]   ;;  %8743 = vmatprep.subr.bf16.mxu1 %v10324_v13  ;;  %vm11605_vm2 = vmmov %vm11596_vm0  ;;  %v4889_v60 = vrot.slane %v10385_v41, 1 }
  0xaf   : > { %v1268_v47 = vshll.u32 %v10333_v0, 16  ;;  %v1272_v18 = vshrl.u32 %v10333_v0, 16  ;;  %vm11607_vm6 = vmmov %vm11596_vm0 }
  0xb0   : > { %vm11608_vm7 = vmmov %vm11596_vm0 }
  0xb1   : > { %v1270_v11 = vrot.slane %v1268_v47, 1  ;;  %vm11609_vm9 = vmmov %vm11596_vm0 }
  0xb2   : > { %vm11610_vm15 = vmmov %vm11596_vm0 }
  0xb3   : > { %v1271_v55 = vsel %vm1147_vm1, %v1266_v16, %v1270_v11  ;;  %v1274_v25 = vor.u32 %v1272_v18, %v1270_v11  ;;  %vm11611_vm10 = vmmov %vm11596_vm0  ;;  %v10476_v18 = vld [vmem:[%s11551_s3 + $0x20] sm:$0xff]   ;;  %v4891_v11 = vrot.slane %v10389_v51, 1 }
  0xb4   : > { %8365 = vmatprep.mubr.msk.bf16.mxu0 %vm11600_vm4, %v1271_v55  ;;  %8682 = vmatmul.mubr.msk.bf16.gmra.mrb[4].mxu1 %vm11601_vm14, %v10348_v28  ;;  %vm11612_vm12 = vmmov %vm11596_vm0  ;;  %v1712_v28 = vrot.slane %v10405_v7, 1 }
  0xb5   : > { %v1279_v9 = vsel %vm1147_vm1, %v1274_v25, %v1278_v6  ;;  %8685 = vmatprep.mubr.msk.bf16.mxu1 %vm11602_vm11, %v10353_v40  ;;  %vm11606_vm1 = vmmov %vm11596_vm0  ;;  %v9615_v6 = vld [vmem:[#allocation2 + $0xc8] sm:$0xff]   ;;  %v1710_v25 = vrot.slane %v10397_v42, 1 }
  0xb6   : > { %8366 = vmatmul.mubr.msk.bf16.gmra.mrb[28].mxu0 %vm11603_vm13, %v1279_v9  ;;  %vm11613_vm3 = vmmov %vm11596_vm0  ;;  %v4893_v55 = vrot.slane %v9615_v6, 1  ;;  %v10567_v6 = vld [vmem:[%s11551_s3 + $0x28] sm:$0xff]  }
  0xb7   : > { %8371 = vmatprep.mubr.msk.bf16.mxu0 %vm11604_vm5, %v9842_v26  ;;  %v9606_v26 = vld [vmem:[%s11551_s3 + $0x10] sm:$0xff]   ;;  %vm11614_vm8 = vmmov %vm11596_vm0 }
  0xb8   : > { %vm11615_vm4 = vmmov %vm11596_vm0 }
  0xb9   : > { %vm11616_vm14 = vmmov %vm11596_vm0 }
  0xba   : > { %vm11617_vm11 = vmmov %vm11596_vm0 }
  0xbb   : > { %vm11618_vm13 = vmmov %vm11596_vm0 }
  0xbc   : > { %8686 = vmatmul.mubr.msk.bf16.gmra.mrb[8].mxu1 %vm11605_vm2, %v10360_v52  ;;  %vm11619_vm5 = vmmov %vm11596_vm0 }
  0xbd   : > { %8689 = vmatprep.mubr.msk.bf16.mxu1 %vm11606_vm1, %v10369_v61  ;;  %vm11620_vm2 = vmmov %vm11596_vm0 }
  0xbe   : > { %8372 = vmatmul.mubr.msk.bf16.vlgmr.msra.gmra.mrb[0].mxu0 %vm11607_vm6, %v10373_v3  ;;  %vm11621_vm1 = vmmov %vm11596_vm0 }
  0xbf   : > { %8404 = vmatpush3.bf16.msra.mxu0 %v9606_v26  ;;  %8375 = vmatprep.mubr.msk.bf16.mxu0 %vm11608_vm7, %v10380_v30  ;;  %vm11622_vm6 = vmmov %vm11596_vm0  ;;  %v4897_v26 = vrot.slane %v10187_v33, 1  ;;  %v9617_v30 = vld [vmem:[#allocation2 + $0x30] sm:$0xff]  }
  0xc0   : > { %8437 = vmatprep.subr.bf16.mxu0 %v10367_v23  ;;  %vm11623_vm7 = vmmov %vm11596_vm0 }
  0xc4   : > { %8690 = vmatmul.mubr.msk.bf16.gmra.mrb[12].mxu1 %vm11609_vm9, %v10385_v41  ;;  %vm1702_vm9 = vcmask 1046528   ;;  %v1714_v41 = vrot.slane %v9617_v30, 1 }
  0xc5   : > { %8693 = vmatprep.mubr.msk.bf16.mxu1 %vm11610_vm15, %v10389_v51  ;;  %vm11624_vm15 = vmmov %vm11596_vm0  ;;  %v4880_v50 = vsel %vm1702_vm9, %v4877_v36, %v4879_v63  ;;  %v4882_v39 = vsel %vm1702_vm9, %v4879_v63, %v4881_v27  ;;  %v4884_v19 = vsel %vm1702_vm9, %v4881_v27, %v4883_v59  ;;  %v4886_v46 = vsel %vm1702_vm9, %v4883_v59, %v4885_v58  ;;  %v10519_v27 = vld [vmem:[#allocation2 + $0x8c] sm:$0xf] }
  0xc6   : > { %8376 = vmatmul.mubr.msk.bf16.gmra.mrb[4].mxu0 %vm11611_vm10, %v10393_v29  ;;  %vm11625_vm10 = vmmov %vm11596_vm0  ;;  %v4888_v4 = vsel %vm1702_vm9, %v4885_v58, %v4887_v15  ;;  %v4890_v10 = vsel %vm1702_vm9, %v4887_v15, %v4889_v60  ;;  %v1707_v16 = vsel %vm1702_vm9, %v1704_v43, %v1706_v24  ;;  %v1709_v47 = vsel %vm1702_vm9, %v1706_v24, %v1708_v44 }
  0xc7   : > { %8379 = vmatprep.mubr.msk.bf16.mxu0 %vm11596_vm0, %v10397_v42  ;;  %v4892_v9 = vsel %vm1702_vm9, %v4889_v60, %v4891_v11  ;;  %v4894_v40 = vsel %vm1702_vm9, %v4891_v11, %v4893_v55  ;;  %v1711_v52 = vsel %vm1702_vm9, %v1708_v44, %v1710_v25  ;;  %v1713_v61 = vsel %vm1702_vm9, %v1710_v25, %v1712_v28  ;;  %v1983_v44 = vld [vmem:[#allocation2 + $0x8] sm:$0xe]  ;;  %v10562_v11 = vld [vmem:[#allocation2 + $0xb0] sm:$0xff]  }
  0xc8   : > { %v1716_v51 = vrot.slane %v10163_v37, 1  ;;  %v1726_v58 = vrot.slane %v10274_v22, 1  ;;  %v1730_v60 = vrot.slane %v10314_v49, 1  ;;  %v1732_v24 = vrot.slane %v10333_v0, 1  ;;  %v10574_v25 = vld [vmem:[#allocation2 + $0x10] sm:$0xff]  }
  0xcc   : > { %8694 = vmatmul.mubr.msk.bf16.gmra.mrb[16].mxu1 %vm11612_vm12, %v10141_v2  ;;  %v4870_v2 = vld [vmem:[#allocation2 + $0x80] sm:$0xe]  ;;  %vm11626_vm12 = vmmov %vm11596_vm0 }
  0xcd   : > { %8697 = vmatprep.mubr.msk.bf16.mxu1 %vm11613_vm3, %v10145_v21  ;;  %v9613_v21 = vld [vmem:[#allocation2 + $0x84] sm:$0xf]  ;;  %vm11627_vm3 = vmmov %vm11596_vm0 }
  0xce   : > { %8380 = vmatmul.mubr.msk.bf16.gmra.mrb[8].mxu0 %vm11614_vm8, %v10405_v7  ;;  %v7744_v35 = vcombine.low %v4870_v2, %v9613_v21  ;;  %vm11628_vm8 = vmmov %vm11596_vm0  ;;  %v1715_v7 = vsel %vm1702_vm9, %v1712_v28, %v1714_v41  ;;  %v1717_v2 = vsel %vm1702_vm9, %v1714_v41, %v1716_v51  ;;  %v4901_v21 = vrot.slane %v10229_v53, 1  ;;  %v10594_v41 = vld [vmem:[#allocation2 + $0x18] sm:$0xff]  }
  0xcf   : > { %8383 = vmatprep.mubr.msk.bf16.mxu0 %vm11615_vm4, %v10115_v31  ;;  %vm11629_vm4 = vmmov %vm11596_vm0 }
  0xd0   : > { %v4876_v31 = vrot.slane %v7744_v35, 1  ;;  %v1720_v35 = vrot.slane %v10206_v1, 1 }
  0xd2   : > { %v4878_v5 = vsel %vm1702_vm9, %v4876_v31, %v4877_v36 }
  0xd4   : > { %8698 = vmatmul.mubr.msk.bf16.gmra.mrb[20].mxu1 %vm11616_vm14, %v10187_v33  ;;  %vm11630_vm14 = vmmov %vm11596_vm0  ;;  %v4899_v33 = vrot.slane %v10191_v38, 1 }
  0xd5   : > { %8701 = vmatprep.mubr.msk.bf16.mxu1 %vm11617_vm11, %v10191_v38  ;;  %vm11631_vm11 = vmmov %vm11596_vm0  ;;  %v4903_v38 = vrot.slane %v10242_v34, 1 }
  0xd6   : > { %8384 = vmatmul.mubr.msk.bf16.gmra.mrb[12].mxu0 %vm11618_vm13, %v10163_v37  ;;  %vm11632_vm13 = vmmov %vm11596_vm0  ;;  %v1718_v37 = vrot.slane %v10174_v20, 1  ;;  %v4900_v31 = vsel %vm1702_vm9, %v4897_v26, %v4899_v33  ;;  %v4902_v36 = vsel %vm1702_vm9, %v4899_v33, %v4901_v21 }
  0xd7   : > { %8387 = vmatprep.mubr.msk.bf16.mxu0 %vm11619_vm5, %v10174_v20  ;;  %vm11633_vm5 = vmmov %vm11596_vm0  ;;  %v4905_v20 = vrot.slane %v10276_v17, 1 }
  0xd8   : > { %v1721_v63 = vsel %vm1702_vm9, %v1718_v37, %v1720_v35 }
  0xdc   : > { %8702 = vmatmul.mubr.msk.bf16.gmra.mrb[24].mxu1 %vm11620_vm2, %v10229_v53  ;;  %vm11634_vm2 = vmmov %vm11596_vm0  ;;  %v5156_v53 = vld [vmem:[#allocation2 + $0x88] sm:$0xe] }
  0xdd   : > { %8705 = vmatprep.mubr.msk.bf16.mxu1 %vm11621_vm1, %v10242_v34  ;;  %vm11635_vm1 = vmmov %vm11596_vm0  ;;  %v10525_v56 = vcombine.low %v5156_v53, %v10519_v27  ;;  %v10527_v34 = vld [vmem:[#allocation2 + $0x90] sm:$0xff]  }
  0xde   : > { %8388 = vmatmul.mubr.msk.bf16.gmra.mrb[16].mxu0 %vm11622_vm6, %v10206_v1  ;;  %vm11636_vm6 = vmmov %vm11596_vm0  ;;  %v1722_v1 = vrot.slane %v10218_v14, 1  ;;  %v5275_v59 = vrot.slane %v10527_v34, 1 }
  0xdf   : > { %8391 = vmatprep.mubr.msk.bf16.mxu0 %vm11623_vm7, %v10218_v14  ;;  %vm11637_vm7 = vmmov %vm11596_vm0  ;;  %v4907_v14 = vrot.slane %v10280_v48, 1  ;;  %v1727_v48 = vsel %vm1702_vm9, %v1724_v32, %v1726_v58 }
  0xe0   : > { %v1725_v57 = vsel %vm1702_vm9, %v1722_v1, %v1724_v32 }
  0xe4   : > { %8706 = vmatmul.mubr.msk.bf16.gmra.mrb[28].mxu1 %vm11624_vm15, %v10276_v17  ;;  %vm11638_vm15 = vmmov %vm11596_vm0  ;;  %v1723_v17 = vsel %vm1702_vm9, %v1720_v35, %v1722_v1  ;;  %v10611_v35 = vld [vmem:[#allocation2 + $0xd0] sm:$0xff]  }
  0xe5   : > { %8711 = vmatprep.mubr.msk.bf16.mxu1 %vm11625_vm10, %v4878_v5  ;;  %vm11639_vm10 = vmmov %vm11596_vm0  ;;  %v1719_v5 = vsel %vm1702_vm9, %v1716_v51, %v1718_v37  ;;  %v5291_v1 = vrot.slane %v10611_v35, 1 }
  0xe6   : > { %8392 = vmatmul.mubr.msk.bf16.gmra.mrb[20].mxu0 %vm11596_vm0, %v10259_v62  ;;  %v5274_v62 = vrot.slane %v10525_v56, 1 }
  0xe7   : > { %8395 = vmatprep.mubr.msk.bf16.mxu0 %vm11626_vm12, %v10274_v22  ;;  %vm11640_vm12 = vmmov %vm11596_vm0 }
  0xec   : > { %8712 = vmatmul.mubr.msk.bf16.vlgmr.msra.gmra.mrb[0].mxu1 %vm11627_vm3, %v4880_v50  ;;  %vm11641_vm3 = vmmov %vm11596_vm0  ;;  %v4904_v50 = vsel %vm1702_vm9, %v4901_v21, %v4903_v38  ;;  %v10608_v21 = vld [vmem:[#allocation2 + $0xc8] sm:$0xff]  }
  0xed   : > { %8744 = vmatpush3.bf16.msra.mxu1 %v10324_v13  ;;  %8715 = vmatprep.mubr.msk.bf16.mxu1 %vm11628_vm8, %v4882_v39  ;;  %v1705_v13 = vsel %vm1702_vm9, %v1703_v45, %v1704_v43  ;;  %vm11642_vm8 = vmmov %vm11596_vm0  ;;  %v4906_v39 = vsel %vm1702_vm9, %v4903_v38, %v4905_v20  ;;  %v1728_v45 = vrot.slane %v10301_v12, 1  ;;  %v4908_v43 = vsel %vm1702_vm9, %v4905_v20, %v4907_v14  ;;  %v10623_v38 = vld [vmem:[%s11551_s3 + $0x28] sm:$0xff]  }
  0xee   : > { %8396 = vmatmul.mubr.msk.bf16.gmra.mrb[24].mxu0 %vm11629_vm4, %v10301_v12  ;;  %8777 = vmatprep.subr.bf16.mxu1 %v10443_v8  ;;  %vm11643_vm4 = vmmov %vm11596_vm0  ;;  %v5289_v20 = vrot.slane %v10608_v21, 1 }
  0xef   : > { %8399 = vmatprep.mubr.msk.bf16.mxu0 %vm11630_vm14, %v10314_v49  ;;  %vm11644_vm14 = vmmov %vm11596_vm0  ;;  %v1729_v15 = vsel %vm1702_vm9, %v1726_v58, %v1728_v45  ;;  %v1731_v49 = vsel %vm1702_vm9, %v1728_v45, %v1730_v60 }
  0xf4   : > { %8716 = vmatmul.mubr.msk.bf16.gmra.mrb[4].mxu1 %vm11631_vm11, %v4884_v19  ;;  %vm11645_vm11 = vmmov %vm11596_vm0  ;;  %v10541_v19 = vld [vmem:[#allocation2 + $0x98] sm:$0xff]  }
  0xf5   : > { %8719 = vmatprep.mubr.msk.bf16.mxu1 %vm11632_vm13, %v4886_v46  ;;  %vm11646_vm13 = vmmov %vm11596_vm0  ;;  %v5276_v46 = vsel %vm1702_vm9, %v5274_v62, %v5275_v59  ;;  %v5277_v22 = vrot.slane %v10541_v19, 1  ;;  %v10641_v62 = vld [vmem:[#allocation2 + $0x38] sm:$0xff]  }
  0xf6   : > { %8400 = vmatmul.mubr.msk.bf16.gmra.mrb[28].mxu0 %vm11633_vm5, %v10333_v0  ;;  %vm11647_vm5 = vmmov %vm11596_vm0  ;;  %v1733_v0 = vsel %vm1702_vm9, %v1730_v60, %v1732_v24 }
  0xf7   : > { %8405 = vmatprep.mubr.msk.bf16.mxu0 %vm11634_vm2, %v1705_v13  ;;  %vm11648_vm2 = vmmov %vm11596_vm0  ;;  %v10544_v13 = vld [vmem:[#allocation2 + $0xa0] sm:$0xff]  }
  0xf8   : > { %v5279_v12 = vrot.slane %v10544_v13, 1 }
  0xfc   : > { %8720 = vmatmul.mubr.msk.bf16.gmra.mrb[8].mxu1 %vm11635_vm1, %v4888_v4  ;;  %vm11649_vm1 = vmmov %vm11596_vm0  ;;  %v10556_v4 = vld [vmem:[#allocation2 + $0xc] sm:$0xf] }
  0xfd   : > { %8723 = vmatprep.mubr.msk.bf16.mxu1 %vm11636_vm6, %v4890_v10  ;;  %vm11650_vm6 = vmmov %vm11596_vm0  ;;  %v5278_v10 = vsel %vm1702_vm9, %v5275_v59, %v5277_v22  ;;  %v10644_v59 = vld [vmem:[#allocation2 + $0x40] sm:$0xff]  }
  0xfe   : > { %8406 = vmatmul.mubr.msk.bf16.vlgmr.msra.gmra.mrb[0].mxu0 %vm11637_vm7, %v1707_v16  ;;  %vm11651_vm7 = vmmov %vm11596_vm0  ;;  %v10559_v16 = vld [vmem:[#allocation2 + $0xa8] sm:$0xff]  }
  0xff   : > { %8438 = vmatpush3.bf16.msra.mxu0 %v10367_v23  ;;  %8409 = vmatprep.mubr.msk.bf16.mxu0 %vm11638_vm15, %v1709_v47  ;;  %v9616_v23 = vld [vmem:[#allocation2 + $0xd0] sm:$0xff]   ;;  %vm11652_vm15 = vmmov %vm11596_vm0  ;;  %v5280_v47 = vsel %vm1702_vm9, %v5277_v22, %v5279_v12  ;;  %v5281_v28 = vrot.slane %v10559_v16, 1 }
 0x100   : > { %8471 = vmatprep.subr.bf16.mxu0 %v10476_v18  ;;  %v4895_v3 = vrot.slane %v9616_v23, 1  ;;  %v10588_v23 = vld [vmem:[#allocation2 + $0xb8] sm:$0xff]  }
 0x102   : > { %v4896_v29 = vsel %vm1702_vm9, %v4893_v55, %v4895_v3  ;;  %v4898_v42 = vsel %vm1702_vm9, %v4895_v3, %v4897_v26  ;;  %v10572_v55 = vcombine.low %v1983_v44, %v10556_v4  ;;  %v10591_v26 = vld [vmem:[#allocation2 + $0xc0] sm:$0xff]  }
 0x104   : > { %8724 = vmatmul.mubr.msk.bf16.gmra.mrb[12].mxu1 %vm11639_vm10, %v4892_v9  ;;  %vm11653_vm10 = vmmov %vm11596_vm0  ;;  %v5283_v9 = vrot.slane %v10562_v11, 1 }
 0x105   : > { %8727 = vmatprep.mubr.msk.bf16.mxu1 %vm11596_vm0, %v4894_v40  ;;  %v1734_v40 = vrot.slane %v10316_v54, 1  ;;  %v5285_v54 = vrot.slane %v10588_v23, 1 }
 0x106   : > { %8410 = vmatmul.mubr.msk.bf16.gmra.mrb[4].mxu0 %vm11640_vm12, %v1711_v52  ;;  %vm11654_vm12 = vmmov %vm11596_vm0  ;;  %v2102_v52 = vrot.slane %v10572_v55, 1  ;;  %v5284_v3 = vsel %vm1702_vm9, %v5281_v28, %v5283_v9 }
 0x107   : > { %8413 = vmatprep.mubr.msk.bf16.mxu0 %vm11641_vm3, %v1713_v61  ;;  %vm11655_vm3 = vmmov %vm11596_vm0  ;;  %v2103_v61 = vrot.slane %v10574_v25, 1  ;;  %v1735_v30 = vsel %vm1702_vm9, %v1732_v24, %v1734_v40  ;;  %v5286_v33 = vsel %vm1702_vm9, %v5283_v9, %v5285_v54  ;;  %v10661_v24 = vld [vmem:[#allocation2 + $0x48] sm:$0xff]   ;;  %v10675_v40 = vld [vmem:[#allocation2 + $0xf8] sm:$0xff]  }
 0x109   : > { %v2104_v51 = vsel %vm1702_vm9, %v2102_v52, %v2103_v61  ;;  %v10677_v52 = vld [vmem:[#allocation2 + $0x100] sm:$0xff]  }
 0x10c   : > { %8728 = vmatmul.mubr.msk.bf16.gmra.mrb[16].mxu1 %vm11642_vm8, %v4896_v29  ;;  %vm11656_vm8 = vmmov %vm11596_vm0  ;;  %v10597_v29 = vld [vmem:[#allocation2 + $0x20] sm:$0xff]  }
 0x10d   : > { %8731 = vmatprep.mubr.msk.bf16.mxu1 %vm11643_vm4, %v4898_v42  ;;  %vm11657_vm4 = vmmov %vm11596_vm0  ;;  %v5287_v42 = vrot.slane %v10591_v26, 1 }
 0x10e   : > { %8414 = vmatmul.mubr.msk.bf16.gmra.mrb[8].mxu0 %vm11644_vm14, %v1715_v7  ;;  %vm11658_vm14 = vmmov %vm11596_vm0  ;;  %v2105_v7 = vrot.slane %v10594_v41, 1 }
 0x10f   : > { %8417 = vmatprep.mubr.msk.bf16.mxu0 %vm11645_vm11, %v1717_v2  ;;  %vm11659_vm11 = vmmov %vm11596_vm0  ;;  %v2107_v2 = vrot.slane %v10597_v29, 1  ;;  %v5288_v37 = vsel %vm1702_vm9, %v5285_v54, %v5287_v42  ;;  %v5301_v54 = vrot.slane %v10675_v40, 1 }
 0x114   : > { %8732 = vmatmul.mubr.msk.bf16.gmra.mrb[20].mxu1 %vm11646_vm13, %v4900_v31  ;;  %vm11660_vm13 = vmmov %vm11596_vm0  ;;  %v2106_v31 = vsel %vm1702_vm9, %v2103_v61, %v2105_v7 }
 0x115   : > { %8735 = vmatprep.mubr.msk.bf16.mxu1 %vm11647_vm5, %v4902_v36  ;;  %vm11661_vm5 = vmmov %vm11596_vm0  ;;  %v10614_v36 = vld [vmem:[#allocation2 + $0x28] sm:$0xff]  }
 0x116   : > { %8418 = vmatmul.mubr.msk.bf16.gmra.mrb[12].mxu0 %vm11648_vm2, %v1719_v5  ;;  %vm11662_vm2 = vmmov %vm11596_vm0  ;;  %v2108_v5 = vsel %vm1702_vm9, %v2105_v7, %v2107_v2  ;;  %v2109_v53 = vrot.slane %v10614_v36, 1  ;;  %v5561_v7 = vshrl.u32 %v10525_v56, 16 }
 0x117   : > { %8421 = vmatprep.mubr.msk.bf16.mxu0 %vm11649_vm1, %v1721_v63  ;;  %vm11663_vm1 = vmmov %vm11596_vm0  ;;  %v10617_v63 = vld [vmem:[#allocation2 + $0x30] sm:$0xff]  }
 0x118   : > { %v2111_v32 = vrot.slane %v10617_v63, 1  ;;  %v2110_v14 = vsel %vm1702_vm9, %v2107_v2, %v2109_v53  ;;  %v5564_v2 = vshll.u32 %v10525_v56, 16 }
 0x11c   : > { %8736 = vmatmul.mubr.msk.bf16.gmra.mrb[24].mxu1 %vm11650_vm6, %v4904_v50  ;;  %vm11664_vm6 = vmmov %vm11596_vm0  ;;  %v5290_v50 = vsel %vm1702_vm9, %v5287_v42, %v5289_v20  ;;  %v5303_v42 = vrot.slane %v10677_v52, 1 }
 0x11d   : > { %8739 = vmatprep.mubr.msk.bf16.mxu1 %vm11651_vm7, %v4906_v39  ;;  %vm11665_vm7 = vmmov %vm11596_vm0  ;;  %v10635_v39 = vld [vmem:[#allocation2 + $0xd8] sm:$0xff]  }
 0x11e   : > { %8422 = vmatmul.mubr.msk.bf16.gmra.mrb[16].mxu0 %vm11652_vm15, %v1723_v17  ;;  %vm11666_vm15 = vmmov %vm11596_vm0  ;;  %v5292_v17 = vsel %vm1702_vm9, %v5289_v20, %v5291_v1  ;;  %v5293_v58 = vrot.slane %v10635_v39, 1 }
 0x11f   : > { %8425 = vmatprep.mubr.msk.bf16.mxu0 %vm11653_vm10, %v1725_v57  ;;  %vm11667_vm10 = vmmov %vm11596_vm0  ;;  %v10638_v57 = vld [vmem:[#allocation2 + $0xe0] sm:$0xff]  }
 0x120   : > { %v5295_v45 = vrot.slane %v10638_v57, 1 }
 0x122   : > { %v5296_v22 = vsel %vm1702_vm9, %v5293_v58, %v5295_v45 }
 0x124   : > { %8740 = vmatmul.mubr.msk.bf16.gmra.mrb[28].mxu1 %vm11596_vm0, %v4908_v43  ;;  %v2113_v43 = vrot.slane %v10641_v62, 1 }
 0x125   : > { %8745 = vmatprep.mubr.msk.bf16.mxu1 %vm11654_vm12, %v5276_v46  ;;  %vm11668_vm12 = vmmov %vm11596_vm0  ;;  %v2115_v46 = vrot.slane %v10644_v59, 1 }
 0x126   : > { %8426 = vmatmul.mubr.msk.bf16.gmra.mrb[20].mxu0 %vm11655_vm3, %v1727_v48  ;;  %vm11669_vm3 = vmmov %vm11596_vm0  ;;  %v5294_v48 = vsel %vm1702_vm9, %v5291_v1, %v5293_v58  ;;  %v2114_v60 = vsel %vm1702_vm9, %v2111_v32, %v2113_v43  ;;  %v5304_v1 = vsel %vm1702_vm9, %v5301_v54, %v5303_v42 }
 0x127   : > { %8429 = vmatprep.mubr.msk.bf16.mxu0 %vm11656_vm8, %v1729_v15  ;;  %vm11670_vm8 = vmmov %vm11596_vm0  ;;  %v10655_v15 = vld [vmem:[#allocation2 + $0xe8] sm:$0xff]   ;;  %v2116_v44 = vsel %vm1702_vm9, %v2113_v43, %v2115_v46 }
 0x12c   : > { %8746 = vmatmul.mubr.msk.bf16.vlgmr.msra.gmra.mrb[0].mxu1 %vm11657_vm4, %v5278_v10  ;;  %vm11671_vm4 = vmmov %vm11596_vm0  ;;  %v10664_v10 = vld [vmem:[#allocation2 + $0x50] sm:$0xff]  }
 0x12d   : > { %8778 = vmatpush3.bf16.msra.mxu1 %v10443_v8  ;;  %8749 = vmatprep.mubr.msk.bf16.mxu1 %vm11658_vm14, %v5280_v47  ;;  %v5282_v8 = vsel %vm1702_vm9, %v5279_v12, %v5281_v28  ;;  %v10658_v12 = vld [vmem:[#allocation2 + $0xf0] sm:$0xff]   ;;  %vm11672_vm14 = vmmov %vm11596_vm0  ;;  %v5297_v47 = vrot.slane %v10655_v15, 1  ;;  %v2119_v28 = vrot.slane %v10664_v10, 1 }
 0x12e   : > { %8430 = vmatmul.mubr.msk.bf16.gmra.mrb[24].mxu0 %vm11659_vm11, %v1731_v49  ;;  %8811 = vmatprep.subr.bf16.mxu1 %v10567_v6  ;;  %vm11673_vm11 = vmmov %vm11596_vm0  ;;  %v5299_v49 = vrot.slane %v10658_v12, 1 }
 0x12f   : > { %8433 = vmatprep.mubr.msk.bf16.mxu0 %vm11660_vm13, %v1733_v0  ;;  %vm11674_vm13 = vmmov %vm11596_vm0  ;;  %v2117_v0 = vrot.slane %v10661_v24, 1  ;;  %v5298_v9 = vsel %vm1702_vm9, %v5295_v45, %v5297_v47  ;;  %v10704_v45 = vld [vmem:[#allocation2 + $0x70] sm:$0xff]  }
 0x130   : > { %v5300_v61 = vsel %vm1702_vm9, %v5297_v47, %v5299_v49  ;;  %v5302_v20 = vsel %vm1702_vm9, %v5299_v49, %v5301_v54  ;;  %v5590_v47 = vshll.u32 %v10544_v13, 16 }
 0x132   : > { %v5592_v54 = vrot.slane %v5590_v47, 2 }
 0x134   : > { %8750 = vmatmul.mubr.msk.bf16.gmra.mrb[4].mxu1 %vm11661_vm5, %v5282_v8  ;;  %vm11675_vm5 = vmmov %vm11596_vm0  ;;  %v2118_v8 = vsel %vm1702_vm9, %v2115_v46, %v2117_v0  ;;  %v5578_v46 = vshrl.u32 %v10541_v19, 16 }
 0x135   : > { %8753 = vmatprep.mubr.msk.bf16.mxu1 %vm11662_vm2, %v5284_v3  ;;  %v10681_v3 = vld [vmem:[#allocation2 + $0x58] sm:$0xff]   ;;  %vm11676_vm2 = vmmov %vm11596_vm0 }
 0x136   : > { %8434 = vmatmul.mubr.msk.bf16.gmra.mrb[28].mxu0 %vm11663_vm1, %v1735_v30  ;;  %v2120_v30 = vsel %vm1702_vm9, %v2117_v0, %v2119_v28  ;;  %vm11677_vm1 = vmmov %vm11596_vm0  ;;  %v2127_v0 = vrot.slane %v10704_v45, 1 }
 0x137   : > { %8439 = vmatprep.mubr.msk.bf16.mxu0 %vm11664_vm6, %v2104_v51  ;;  %v10684_v51 = vld [vmem:[#allocation2 + $0x60] sm:$0xff]   ;;  %vm11678_vm6 = vmmov %vm11596_vm0 }
 0x13c   : > { %8754 = vmatmul.mubr.msk.bf16.gmra.mrb[8].mxu1 %vm11665_vm7, %v5286_v33  ;;  %v5569_v33 = vshrl.u32 %v10527_v34, 16  ;;  %vm11679_vm7 = vmmov %vm11596_vm0 }
 0x13d   : > { %8757 = vmatprep.mubr.msk.bf16.mxu1 %vm11666_vm15, %v5288_v37  ;;  %v5572_v37 = vshll.u32 %v10527_v34, 16  ;;  %vm11680_vm15 = vmmov %vm11596_vm0 }
 0x13e   : > { %8440 = vmatmul.mubr.msk.bf16.vlgmr.msra.gmra.mrb[0].mxu0 %vm11667_vm10, %v2106_v31  ;;  %v2121_v31 = vrot.slane %v10681_v3, 1  ;;  %vm11681_vm10 = vmmov %vm11596_vm0 }
 0x13f   : > { %8472 = vmatpush3.bf16.msra.mxu0 %v10476_v18  ;;  %8443 = vmatprep.mubr.msk.bf16.mxu0 %vm11596_vm0, %v2108_v5  ;;  %v2112_v18 = vsel %vm1702_vm9, %v2109_v53, %v2111_v32  ;;  %v2123_v5 = vrot.slane %v10684_v51, 1  ;;  %v9545_v53 = vld [vmem:[#allocation2 + $0x108] ss:$0 sps:$4 sm:$0x11]   ;;  %v5563_v32 = vrot.slane %v5561_v7, 1 }
 0x140   : > { %8505 = vmatprep.subr.bf16.mxu0 %v10623_v38  ;;  %v2122_v56 = vsel %vm1702_vm9, %v2119_v28, %v2121_v31  ;;  %v5305_v43 = vrot.slane %v9545_v53, 1  ;;  %v5608_v53 = vshll.u32 %v10562_v11, 16 }
 0x141   : > { %v2124_v58 = vsel %vm1702_vm9, %v2121_v31, %v2123_v5  ;;  %v5596_v31 = vshrl.u32 %v10559_v16, 16 }
 0x142   : > { %v5306_v28 = vsel %vm1702_vm9, %v5303_v42, %v5305_v43  ;;  %v5610_v47 = vrot.slane %v5608_v53, 2 }
 0x144   : > { %8758 = vmatmul.mubr.msk.bf16.gmra.mrb[12].mxu1 %vm11668_vm12, %v5290_v50  ;;  %v5566_v50 = vrot.slane %v5564_v2, 2  ;;  %vm11682_vm12 = vmmov %vm11596_vm0  ;;  %v10719_v2 = vld [vmem:[#allocation2 + $0x78] sm:$0xff]  }
 0x145   : > { %8761 = vmatprep.mubr.msk.bf16.mxu1 %vm11669_vm3, %v5292_v17  ;;  %v5571_v17 = vrot.slane %v5569_v33, 1  ;;  %vm2389_vm3 = vsmask.f32 6400  ;;  %v10721_v33 = vld [vmem:[#allocation2 + $0x80] sm:$0xff]  }
 0x146   : > { %8444 = vmatmul.mubr.msk.bf16.gmra.mrb[4].mxu0 %vm11670_vm8, %v2110_v14  ;;  %v5574_v14 = vrot.slane %v5572_v37, 2  ;;  %vm11683_vm8 = vmmov %vm11596_vm0 }
 0x147   : > { %8447 = vmatprep.mubr.msk.bf16.mxu0 %vm11671_vm4, %v2112_v18  ;;  %v10701_v18 = vld [vmem:[#allocation2 + $0x68] sm:$0xff]   ;;  %vm11684_vm4 = vmmov %vm11596_vm0 }
 0x148   : > { %v2125_v49 = vrot.slane %v10701_v18, 1 }
 0x14a   : > { %v2126_v7 = vsel %vm1702_vm9, %v2123_v5, %v2125_v49  ;;  %v2128_v37 = vsel %vm1702_vm9, %v2125_v49, %v2127_v0  ;;  %v5605_v5 = vshrl.u32 %v10562_v11, 16  ;;  %v10743_v49 = vld [vmem:[%s11551_s3 + $0x30] sm:$0xff]  }
 0x14c   : > { %8762 = vmatmul.mubr.msk.bf16.gmra.mrb[16].mxu1 %vm11672_vm14, %v5294_v48  ;;  %v5581_v48 = vshll.u32 %v10541_v19, 16  ;;  %vm11685_vm14 = vmmov %vm11596_vm0 }
 0x14d   : > { %8765 = vmatprep.mubr.msk.bf16.mxu1 %vm11673_vm11, %v5296_v22  ;;  %v5567_v22 = vor.u32 %v5566_v50, %v5563_v32  ;;  %vm11686_vm11 = vmmov %vm11596_vm0  ;;  %v2129_v32 = vrot.slane %v10719_v2, 1  ;;  %v2131_v50 = vrot.slane %v10721_v33, 1 }
 0x14e   : > { %8448 = vmatmul.mubr.msk.bf16.gmra.mrb[8].mxu0 %vm11674_vm13, %v2114_v60  ;;  %v5575_v60 = vor.u32 %v5574_v14, %v5571_v17  ;;  %v2391_v17 = vshrl.u32 %v10572_v55, 16  ;;  %v2394_v14 = vshll.u32 %v10572_v55, 16  ;;  %vm11687_vm13 = vmmov %vm11596_vm0 }
 0x14f   : > { %8451 = vmatprep.mubr.msk.bf16.mxu0 %vm11675_vm5, %v2116_v44  ;;  %v5587_v44 = vshrl.u32 %v10544_v13, 16  ;;  %v2132_v55 = vsel %vm1702_vm9, %v2129_v32, %v2131_v50  ;;  %vm11688_vm5 = vmmov %vm11596_vm0 }
 0x154   : > { %8766 = vmatmul.mubr.msk.bf16.gmra.mrb[20].mxu1 %vm11676_vm2, %v5298_v9  ;;  %v5580_v9 = vrot.slane %v5578_v46, 1  ;;  %v5598_v46 = vrot.slane %v5596_v31, 1  ;;  %vm11689_vm2 = vmmov %vm11596_vm0  ;;  %v5626_v31 = vshll.u32 %v10591_v26, 16 }
 0x155   : > { %8769 = vmatprep.mubr.msk.bf16.mxu1 %vm11677_vm1, %v5300_v61  ;;  %v5583_v61 = vrot.slane %v5581_v48, 2  ;;  %vm11690_vm1 = vmmov %vm11596_vm0 }
 0x156   : > { %8452 = vmatmul.mubr.msk.bf16.gmra.mrb[12].mxu0 %vm11678_vm6, %v2118_v8  ;;  %v5576_v8 = vsel %vm2389_vm3, %v5567_v22, %v5575_v60  ;;  %vm11691_vm6 = vmmov %vm11596_vm0 }
 0x157   : > { %8455 = vmatprep.mubr.msk.bf16.mxu0 %vm11679_vm7, %v2120_v30  ;;  %v5589_v30 = vrot.slane %v5587_v44, 1  ;;  %v5584_v42 = vor.u32 %v5583_v61, %v5580_v9  ;;  %v5607_v44 = vrot.slane %v5605_v5, 1  ;;  %v9543_v9 = vld [vmem:[#allocation2 + $0x88] ss:$0 sps:$4 sm:$0x11]   ;;  %v2393_v61 = vrot.slane %v2391_v17, 1  ;;  %vm11692_vm7 = vmmov %vm11596_vm0 }
 0x158   : > { %v2411_v5 = vshll.u32 %v10594_v41, 16  ;;  %v2417_v17 = vshrl.u32 %v10597_v29, 16 }
 0x159   : > { %v5585_v43 = vsel %vm2389_vm3, %v5575_v60, %v5584_v42 }
 0x15c   : > { %8770 = vmatmul.mubr.msk.bf16.gmra.mrb[24].mxu1 %vm11680_vm15, %v5302_v20  ;;  %v5599_v20 = vshll.u32 %v10559_v16, 16  ;;  %vm11693_vm15 = vmmov %vm11596_vm0 }
 0x15d   : > { %8773 = vmatprep.mubr.msk.bf16.mxu1 %vm11681_vm10, %v5304_v1  ;;  %v5593_v1 = vor.u32 %v5592_v54, %v5589_v30  ;;  %vm11695_vm10 = vmmov %vm11596_vm0 }
 0x15e   : > { %8456 = vmatmul.mubr.msk.bf16.gmra.mrb[16].mxu0 %vm11596_vm0, %v2122_v56  ;;  %v2399_v56 = vshrl.u32 %v10574_v25, 16  ;;  %v5601_v48 = vrot.slane %v5599_v20, 2  ;;  %v2133_v20 = vrot.slane %v9543_v9, 1  ;;  %v2419_v9 = vrot.slane %v2417_v17, 1 }
 0x15f   : > { %8459 = vmatprep.mubr.msk.bf16.mxu0 %vm11682_vm12, %v2124_v58  ;;  %v2402_v58 = vshll.u32 %v10574_v25, 16  ;;  %v5594_v22 = vsel %vm2389_vm3, %v5584_v42, %v5593_v1  ;;  %v5623_v42 = vshrl.u32 %v10591_v26, 16  ;;  %vm11696_vm12 = vmmov %vm11596_vm0 }
 0x160   : > { %v2401_v30 = vrot.slane %v2399_v56, 1  ;;  %v5602_v54 = vor.u32 %v5601_v48, %v5598_v46 }
 0x161   : > { %v2404_v60 = vrot.slane %v2402_v58, 2  ;;  %v5625_v48 = vrot.slane %v5623_v42, 1  ;;  %v2429_v42 = vshll.u32 %v10614_v36, 16 }
 0x162   : > { %v5603_v56 = vsel %vm2389_vm3, %v5593_v1, %v5602_v54  ;;  %v5632_v1 = vshrl.u32 %v10608_v21, 16 }
 0x164   : > { %8774 = vmatmul.mubr.msk.bf16.gmra.mrb[28].mxu1 %vm11683_vm8, %v5306_v28  ;;  %v2130_v28 = vsel %vm1702_vm9, %v2127_v0, %v2129_v32  ;;  %v5611_v0 = vor.u32 %v5610_v47, %v5607_v44  ;;  %v2405_v32 = vor.u32 %v2404_v60, %v2401_v30  ;;  %v2134_v44 = vsel %vm1702_vm9, %v2131_v50, %v2133_v20  ;;  %vm11694_vm9 = vmmov %vm11596_vm0 }
 0x165   : > { %8779 = vmatprep.mubr.msk.bf16.mxu1 %vm11684_vm4, %v5576_v8  ;;  %v2396_v8 = vrot.slane %v2394_v14, 2  ;;  %v2420_v14 = vshll.u32 %v10597_v29, 16  ;;  %v5635_v30 = vshll.u32 %v10608_v21, 16  ;;  %v5641_v50 = vshrl.u32 %v10611_v35, 16  ;;  %vm11697_vm8 = vmmov %vm11596_vm0 }
 0x166   : > { %8460 = vmatmul.mubr.msk.bf16.gmra.mrb[20].mxu0 %vm11685_vm14, %v2126_v7  ;;  %v5614_v7 = vshrl.u32 %v10588_v23, 16  ;;  %v5612_v46 = vsel %vm2389_vm3, %v5602_v54, %v5611_v0  ;;  %v5644_v54 = vshll.u32 %v10611_v35, 16  ;;  %v2435_v20 = vshrl.u32 %v10617_v63, 16  ;;  %vm11698_vm4 = vmmov %vm11596_vm0 }
 0x167   : > { %8463 = vmatprep.mubr.msk.bf16.mxu0 %vm11686_vm11, %v2128_v37  ;;  %v5617_v37 = vshll.u32 %v10588_v23, 16  ;;  %v2397_v53 = vor.u32 %v2396_v8, %v2393_v61  ;;  %v2422_v61 = vrot.slane %v2420_v14, 2  ;;  %v5637_v17 = vrot.slane %v5635_v30, 2  ;;  %vm11699_vm14 = vmmov %vm11596_vm0 }
 0x168   : > { %v5616_v58 = vrot.slane %v5614_v7, 1  ;;  %v2444_v30 = vshrl.u32 %v10641_v62, 16  ;;  %vm11700_vm11 = vmmov %vm11596_vm0 }
 0x16c   : > { %8780 = vmatmul.mubr.msk.bf16.vlgmr.msra.gmra.mrb[0].mxu1 %vm11687_vm13, %v5585_v43  ;;  %v5619_v43 = vrot.slane %v5617_v37, 2  ;;  %v2426_v37 = vshrl.u32 %v10614_v36, 16  ;;  %vm11701_vm13 = vmmov %vm11596_vm0 }
 0x16d   : > { %8812 = vmatpush3.bf16.msra.mxu1 %v10567_v6  ;;  %8783 = vmatprep.mubr.msk.bf16.mxu1 %vm11688_vm5, %v5594_v22  ;;  %v2408_v6 = vshrl.u32 %v10594_v41, 16  ;;  %v5628_v22 = vrot.slane %v5626_v31, 2  ;;  %v2423_v31 = vor.u32 %v2422_v61, %v2419_v9  ;;  %v5659_v61 = vshrl.u32 %v10638_v57, 16  ;;  %vm11702_vm5 = vmmov %vm11596_vm0 }
 0x16e   : > { %8464 = vmatmul.mubr.msk.bf16.gmra.mrb[24].mxu0 %vm11689_vm2, %v2130_v28  ;;  %8845 = vmatprep.subr.bf16.mxu1 %v10743_v49  ;;  %v2413_v28 = vrot.slane %v2411_v5, 2  ;;  %v5620_v8 = vor.u32 %v5619_v43, %v5616_v58  ;;  %v5646_v58 = vrot.slane %v5644_v54, 2  ;;  %vm11703_vm2 = vmmov %vm11596_vm0 }
 0x16f   : > { %8467 = vmatprep.mubr.msk.bf16.mxu0 %vm11690_vm1, %v2132_v55  ;;  %v2410_v47 = vrot.slane %v2408_v6, 1  ;;  %v2406_v55 = vsel %vm2389_vm3, %v2397_v53, %v2405_v32  ;;  %v5629_v60 = vor.u32 %v5628_v22, %v5625_v48  ;;  %v2438_v6 = vshll.u32 %v10617_v63, 16  ;;  %vm11704_vm1 = vmmov %vm11596_vm0 }
 0x170   : > { %v5621_v5 = vsel %vm2389_vm3, %v5611_v0, %v5620_v8  ;;  %v5634_v53 = vrot.slane %v5632_v1, 1  ;;  %v2431_v48 = vrot.slane %v2429_v42, 2  ;;  %v10785_v0 = vld [vmem:[%s11551_s3 + $0x30] sm:$0xff]  }
 0x171   : > { %v2414_v7 = vor.u32 %v2413_v28, %v2410_v47  ;;  %v5630_v14 = vsel %vm2389_vm3, %v5620_v8, %v5629_v60  ;;  %v2440_v47 = vrot.slane %v2438_v6, 2  ;;  %v5662_v8 = vshll.u32 %v10638_v57, 16 }
 0x172   : > { %v5638_v28 = vor.u32 %v5637_v17, %v5634_v53 }
 0x173   : > { %v2415_v43 = vsel %vm2389_vm3, %v2405_v32, %v2414_v7  ;;  %v2424_v22 = vsel %vm2389_vm3, %v2414_v7, %v2423_v31  ;;  %v5653_v32 = vshll.u32 %v10635_v39, 16  ;;  %v2453_v7 = vshrl.u32 %v10644_v59, 16 }
 0x174   : > { %8784 = vmatmul.mubr.msk.bf16.gmra.mrb[4].mxu1 %vm11691_vm6, %v5603_v56  ;;  %v5643_v56 = vrot.slane %v5641_v50, 1  ;;  %v2447_v50 = vshll.u32 %v10641_v62, 16  ;;  %v5639_v42 = vsel %vm2389_vm3, %v5629_v60, %v5638_v28  ;;  %v5664_v53 = vrot.slane %v5662_v8, 2  ;;  %vm11705_vm6 = vmmov %vm11596_vm0 }
 0x175   : > { %8787 = vmatprep.mubr.msk.bf16.mxu1 %vm11692_vm7, %v5612_v46  ;;  %v2428_v46 = vrot.slane %v2426_v37, 1  ;;  %v2456_v37 = vshll.u32 %v10644_v59, 16  ;;  %v5655_v6 = vrot.slane %v5653_v32, 2  ;;  %v5668_v60 = vshrl.u32 %v10655_v15, 16  ;;  %vm11706_vm7 = vmmov %vm11596_vm0 }
 0x176   : > { %8468 = vmatmul.mubr.msk.bf16.gmra.mrb[28].mxu0 %vm11693_vm15, %v2134_v44  ;;  %v2437_v44 = vrot.slane %v2435_v20, 1  ;;  %v5647_v9 = vor.u32 %v5646_v58, %v5643_v56  ;;  %v2449_v56 = vrot.slane %v2447_v50, 2  ;;  %v2465_v32 = vshll.u32 %v10661_v24, 16  ;;  %vm11707_vm15 = vmmov %vm11596_vm0 }
 0x177   : > { %8473 = vmatprep.mubr.msk.bf16.mxu0 %vm11694_vm9, %v2406_v55  ;;  %v5650_v55 = vshrl.u32 %v10635_v39, 16  ;;  %v2432_v1 = vor.u32 %v2431_v48, %v2428_v46  ;;  %v2458_v46 = vrot.slane %v2456_v37, 2  ;;  %v2471_v8 = vshrl.u32 %v10664_v10, 16  ;;  %vm11708_vm9 = vmmov %vm11596_vm0 }
 0x178   : > { %v2441_v54 = vor.u32 %v2440_v47, %v2437_v44  ;;  %v5680_v47 = vshll.u32 %v10658_v12, 16  ;;  %v5670_v50 = vrot.slane %v5668_v60, 1  ;;  %v2480_v60 = vshrl.u32 %v10681_v3, 16 }
 0x179   : > { %v5652_v20 = vrot.slane %v5650_v55, 1  ;;  %v2433_v17 = vsel %vm2389_vm3, %v2423_v31, %v2432_v1  ;;  %v5677_v31 = vshrl.u32 %v10658_v12, 16  ;;  %v2462_v55 = vshrl.u32 %v10661_v24, 16 }
 0x17a   : > { %v2442_v58 = vsel %vm2389_vm3, %v2432_v1, %v2441_v54  ;;  %v2474_v1 = vshll.u32 %v10664_v10, 16 }
 0x17b   : > { %v5656_v48 = vor.u32 %v5655_v6, %v5652_v20  ;;  %v5682_v20 = vrot.slane %v5680_v47, 2  ;;  %v2489_v47 = vshrl.u32 %v10684_v51, 16 }
 0x17c   : > { %8788 = vmatmul.mubr.msk.bf16.gmra.mrb[8].mxu1 %vm11695_vm10, %v5621_v5  ;;  %v5661_v5 = vrot.slane %v5659_v61, 1  ;;  %vm11709_vm10 = vmmov %vm11596_vm0 }
 0x17d   : > { %8791 = vmatprep.mubr.msk.bf16.mxu1 %vm11596_vm0, %v5630_v14  ;;  %v2446_v14 = vrot.slane %v2444_v30, 1  ;;  %v5657_v30 = vsel %vm2389_vm3, %v5647_v9, %v5656_v48 }
 0x17e   : > { %8474 = vmatmul.mubr.msk.bf16.vlgmr.msra.gmra.mrb[0].mxu0 %vm11696_vm12, %v2415_v43  ;;  %v2455_v43 = vrot.slane %v2453_v7, 1  ;;  %v5665_v44 = vor.u32 %v5664_v53, %v5661_v5  ;;  %v2467_v5 = vrot.slane %v2465_v32, 2  ;;  %vm11710_vm12 = vmmov %vm11596_vm0 }
 0x17f   : > { %8506 = vmatpush3.bf16.msra.mxu0 %v10623_v38  ;;  %8477 = vmatprep.mubr.msk.bf16.mxu0 %vm11697_vm8, %v2424_v22  ;;  %v5648_v38 = vsel %vm2389_vm3, %v5638_v28, %v5647_v9  ;;  %v5671_v22 = vshll.u32 %v10655_v15, 16  ;;  %v2450_v28 = vor.u32 %v2449_v56, %v2446_v14  ;;  %v2476_v14 = vrot.slane %v2474_v1, 2  ;;  %v10833_v1 = vld [vmem:[#allocation2 + $0x108] ss:$0 sps:$4 sm:$0x33]   ;;  %vm11711_vm8 = vmmov %vm11596_vm0 }
 0x180   : > { %8539 = vmatprep.subr.bf16.mxu0 %v10785_v0  ;;  %v2459_v61 = vor.u32 %v2458_v46, %v2455_v43  ;;  %v5666_v37 = vsel %vm2389_vm3, %v5656_v48, %v5665_v44  ;;  %v5686_v9 = vshrl.u32 %v10675_v40, 16  ;;  %v5698_v46 = vshll.u32 %v10677_v52, 16 }
 0x181   : > { %v5673_v7 = vrot.slane %v5671_v22, 2  ;;  %v2451_v6 = vsel %vm2389_vm3, %v2441_v54, %v2450_v28  ;;  %v5695_v54 = vshrl.u32 %v10677_v52, 16  ;;  %v2483_v22 = vshll.u32 %v10681_v3, 16 }
 0x182   : > { %v2460_v53 = vsel %vm2389_vm3, %v2450_v28, %v2459_v61  ;;  %v2492_v28 = vshll.u32 %v10684_v51, 16  ;;  %v5688_v32 = vrot.slane %v5686_v9, 1  ;;  %v2501_v9 = vshll.u32 %v10701_v18, 16 }
 0x183   : > { %v5674_v56 = vor.u32 %v5673_v7, %v5670_v50  ;;  %v5697_v50 = vrot.slane %v5695_v54, 1  ;;  %v5700_v7 = vrot.slane %v5698_v46, 2  ;;  %v2507_v46 = vshrl.u32 %v10704_v45, 16 }
 0x184   : > { %8792 = vmatmul.mubr.msk.bf16.gmra.mrb[12].mxu1 %vm11698_vm4, %v5639_v42  ;;  %v5679_v42 = vrot.slane %v5677_v31, 1  ;;  %vm11712_vm4 = vmmov %vm11596_vm0 }
 0x185   : > { %8795 = vmatprep.mubr.msk.bf16.mxu1 %vm11699_vm14, %v5648_v38  ;;  %v2464_v38 = vrot.slane %v2462_v55, 1  ;;  %v5675_v55 = vsel %vm2389_vm3, %v5665_v44, %v5674_v56  ;;  %vm2796_vm14 = vcmask 1045504  }
 0x186   : > { %8478 = vmatmul.mubr.msk.bf16.gmra.mrb[4].mxu0 %vm11700_vm11, %v2433_v17  ;;  %v2473_v17 = vrot.slane %v2471_v8, 1  ;;  %v5683_v43 = vor.u32 %v5682_v20, %v5679_v42  ;;  %v2482_v42 = vrot.slane %v2480_v60, 1  ;;  %v2485_v20 = vrot.slane %v2483_v22, 2  ;;  %vm11713_vm11 = vmmov %vm11596_vm0 }
 0x187   : > { %8481 = vmatprep.mubr.msk.bf16.mxu0 %vm11701_vm13, %v2442_v58  ;;  %v5689_v58 = vshll.u32 %v10675_v40, 16  ;;  %v2468_v48 = vor.u32 %v2467_v5, %v2464_v38  ;;  %v2491_v38 = vrot.slane %v2489_v47, 1  ;;  %v2494_v5 = vrot.slane %v2492_v28, 2  ;;  %vm11714_vm13 = vmmov %vm11596_vm0 }
 0x188   : > { %v2477_v31 = vor.u32 %v2476_v14, %v2473_v17  ;;  %v5707_v17 = vshll.u32 %v10833_v1, 16  ;;  %v5701_v14 = vor.u32 %v5700_v7, %v5697_v50  ;;  %v2509_v7 = vrot.slane %v2507_v46, 1 }
 0x189   : > { %v5691_v8 = vrot.slane %v5689_v58, 2  ;;  %v5959_v58 = vld [vmem:[#allocation2 + $0x88] sm:$0xc]  ;;  %v2495_v54 = vor.u32 %v2494_v5, %v2491_v38  ;;  %v2525_v5 = vshrl.u32 %v10721_v33, 16 }
 0x18a   : > { %v5709_v47 = vrot.slane %v5707_v17, 2 }
 0x18b   : > { %v5692_v44 = vor.u32 %v5691_v8, %v5688_v32  ;;  %v2527_v46 = vrot.slane %v2525_v5, 1  ;;  %v2802_v5 = vrot.slane %v10597_v29, 2  ;;  %v2804_v29 = vrot.slane %v10614_v36, 2 }
 0x18c   : > { %8796 = vmatmul.mubr.msk.bf16.gmra.mrb[16].mxu1 %vm11702_vm5, %v5657_v30  ;;  %v5684_v30 = vsel %vm2389_vm3, %v5674_v56, %v5683_v43  ;;  %v2498_v56 = vshrl.u32 %v10701_v18, 16  ;;  %vm11715_vm5 = vmmov %vm11596_vm0  ;;  %v5986_v36 = vrot.slane %v10638_v57, 2  ;;  %v5990_v57 = vrot.slane %v10658_v12, 2 }
 0x18d   : > { %8799 = vmatprep.mubr.msk.bf16.mxu1 %vm11703_vm2, %v5666_v37  ;;  %v2469_v37 = vsel %vm2389_vm3, %v2459_v61, %v2468_v48  ;;  %v2486_v61 = vor.u32 %v2485_v20, %v2482_v42  ;;  %v5693_v60 = vsel %vm2389_vm3, %v5683_v43, %v5692_v44  ;;  %v5702_v28 = vsel %vm2389_vm3, %v5692_v44, %v5701_v14  ;;  %vm11716_vm2 = vmmov %vm11596_vm0 }
 0x18e   : > { %8482 = vmatmul.mubr.msk.bf16.gmra.mrb[8].mxu0 %vm11704_vm1, %v2451_v6  ;;  %v2478_v6 = vsel %vm2389_vm3, %v2468_v48, %v2477_v31  ;;  %v2510_v48 = vshll.u32 %v10704_v45, 16  ;;  %v2500_v8 = vrot.slane %v2498_v56, 1  ;;  %v5966_v20 = vrot.slane %v10527_v34, 2  ;;  %vm11717_vm1 = vmmov %vm11596_vm0 }
 0x18f   : > { %8485 = vmatprep.mubr.msk.bf16.mxu0 %vm11705_vm6, %v2460_v53  ;;  %v5704_v53 = vshrl.u32 %v10833_v1, 16  ;;  %v2487_v32 = vsel %vm2389_vm3, %v2477_v31, %v2486_v61  ;;  %v2496_v50 = vsel %vm2389_vm3, %v2486_v61, %v2495_v54  ;;  %v2516_v31 = vshrl.u32 %v10719_v2, 16  ;;  %vm11718_vm6 = vmmov %vm11596_vm0 }
 0x190   : > { %v2528_v44 = vshll.u32 %v10721_v33, 16  ;;  %v5994_v12 = vrot.slane %v10677_v52, 2 }
 0x191   : > { %v5706_v22 = vrot.slane %v5704_v53, 1  ;;  %v2518_v34 = vrot.slane %v2516_v31, 1 }
 0x193   : > { %v5710_v42 = vor.u32 %v5709_v47, %v5706_v22 }
 0x194   : > { %8800 = vmatmul.mubr.msk.bf16.gmra.mrb[20].mxu1 %vm11706_vm7, %v5675_v55  ;;  %v7820_v55 = vcombine.low %v5959_v58, %v10519_v27  ;;  %vm11719_vm7 = vmmov %vm11596_vm0 }
 0x195   : > { %8803 = vmatprep.mubr.msk.bf16.mxu1 %vm11707_vm15, %v5684_v30  ;;  %v2503_v30 = vrot.slane %v2501_v9, 2  ;;  %v5711_v53 = vsel %vm2389_vm3, %v5701_v14, %v5710_v42  ;;  %v10865_v9 = vld [vmem:[#allocation2 + $0x88] ss:$0 sps:$4 sm:$0x33]   ;;  %v5970_v14 = vrot.slane %v10544_v13, 2  ;;  %v5972_v42 = vrot.slane %v10559_v16, 2  ;;  %vm11720_vm15 = vmmov %vm11596_vm0 }
 0x196   : > { %8486 = vmatmul.mubr.msk.bf16.gmra.mrb[12].mxu0 %vm11708_vm9, %v2469_v37  ;;  %v2512_v37 = vrot.slane %v2510_v48, 2  ;;  %v5965_v43 = vrot.slane %v7820_v55, 2  ;;  %v2530_v48 = vrot.slane %v2528_v44, 2  ;;  %v2534_v22 = vshrl.u32 %v10865_v9, 16  ;;  %v2789_v55 = vld [vmem:[#allocation2 + $0x8] sm:$0xc]  ;;  %vm11721_vm9 = vmmov %vm11596_vm0 }
 0x197   : > { %8489 = vmatprep.mubr.msk.bf16.mxu0 %vm11709_vm10, %v2478_v6  ;;  %v2504_v27 = vor.u32 %v2503_v30, %v2500_v8  ;;  %v2519_v6 = vshll.u32 %v10719_v2, 16  ;;  %v2537_v47 = vshll.u32 %v10865_v9, 16  ;;  %v5973_v31 = vsel %vm2796_vm14, %v5970_v14, %v5972_v42  ;;  %vm11722_vm10 = vmmov %vm11596_vm0 }
 0x198   : > { %v2513_v38 = vor.u32 %v2512_v37, %v2509_v7  ;;  %v5967_v17 = vsel %vm2796_vm14, %v5965_v43, %v5966_v20  ;;  %v2536_v30 = vrot.slane %v2534_v22, 1  ;;  %v7595_v37 = vcombine.low %v2789_v55, %v10556_v4 }
 0x199   : > { %v2505_v61 = vsel %vm2389_vm3, %v2495_v54, %v2504_v27  ;;  %v2521_v56 = vrot.slane %v2519_v6, 2  ;;  %v5974_v43 = vrot.slane %v10562_v11, 2  ;;  %v2798_v4 = vrot.slane %v10574_v25, 2 }
 0x19a   : > { %v2514_v58 = vsel %vm2389_vm3, %v2504_v27, %v2513_v38  ;;  %v2797_v27 = vrot.slane %v7595_v37, 2  ;;  %v5976_v11 = vrot.slane %v10588_v23, 2  ;;  %v2800_v25 = vrot.slane %v10594_v41, 2  ;;  %v10915_v23 = vld [vmem:[%s11551_s3 + $0x38] sm:$0xff]  }
 0x19b   : > { %v2522_v54 = vor.u32 %v2521_v56, %v2518_v34  ;;  %v5982_v41 = vrot.slane %v10611_v35, 2  ;;  %v2806_v34 = vrot.slane %v10617_v63, 2  ;;  %v5984_v35 = vrot.slane %v10635_v39, 2 }
 0x19c   : > { %8804 = vmatmul.mubr.msk.bf16.gmra.mrb[24].mxu1 %vm11596_vm0, %v5693_v60  ;;  %v5968_v60 = vrot.slane %v10541_v19, 2  ;;  %v10881_v19 = vld [vmem:[%s11551_s3 + $0x38] sm:$0xff]   ;;  %v2799_v16 = vsel %vm2796_vm14, %v2797_v27, %v2798_v4  ;;  %v5977_v44 = vsel %vm2796_vm14, %v5974_v43, %v5976_v11  ;;  %v2808_v63 = vrot.slane %v10641_v62, 2  ;;  %v10983_v27 = vld [vmem:[#allocation2 + $0xa0] sm:$0xff]  }
 0x19d   : > { %8807 = vmatprep.mubr.msk.bf16.mxu1 %vm11710_vm12, %v5702_v28  ;;  %v2531_v28 = vor.u32 %v2530_v48, %v2527_v46  ;;  %v2523_v13 = vsel %vm2389_vm3, %v2513_v38, %v2522_v54  ;;  %v5978_v38 = vrot.slane %v10591_v26, 2  ;;  %vm11723_vm12 = vmmov %vm11596_vm0  ;;  %v5980_v26 = vrot.slane %v10608_v21, 2 }
 0x19e   : > { %8490 = vmatmul.mubr.msk.bf16.gmra.mrb[16].mxu0 %vm11711_vm8, %v2487_v32  ;;  %v5969_v32 = vsel %vm2796_vm14, %v5966_v20, %v5968_v60  ;;  %v5971_v8 = vsel %vm2796_vm14, %v5968_v60, %v5970_v14  ;;  %vm11725_vm8 = vmmov %vm11596_vm0  ;;  %v2805_v21 = vsel %vm2796_vm14, %v2802_v5, %v2804_v29  ;;  %v2807_v46 = vsel %vm2796_vm14, %v2804_v29, %v2806_v34 }
 0x19f   : > { %8493 = vmatprep.mubr.msk.bf16.mxu0 %vm11712_vm4, %v2496_v50  ;;  %v2539_v50 = vrot.slane %v2537_v47, 2  ;;  %v2532_v7 = vsel %vm2389_vm3, %v2522_v54, %v2531_v28  ;;  %vm11726_vm4 = vmmov %vm11596_vm0  ;;  %v5981_v56 = vsel %vm2796_vm14, %v5978_v38, %v5980_v26  ;;  %v5985_v48 = vsel %vm2796_vm14, %v5982_v41, %v5984_v35 }
 0x1a0   : > { %v5987_v60 = vsel %vm2796_vm14, %v5984_v35, %v5986_v36  ;;  %v2809_v14 = vsel %vm2796_vm14, %v2806_v34, %v2808_v63  ;;  %v5988_v39 = vrot.slane %v10655_v15, 2  ;;  %v2812_v62 = vrot.slane %v10661_v24, 2  ;;  %v11033_v35 = vld [vmem:[#allocation2 + $0xc8] sm:$0xff]  }
 0x1a1   : > { %v2540_v20 = vor.u32 %v2539_v50, %v2536_v30  ;;  %v5992_v15 = vrot.slane %v10675_v40, 2  ;;  %v2816_v24 = vrot.slane %v10681_v3, 2  ;;  %v10969_v40 = vld [vmem:[#allocation2 + $0x98] sm:$0xff]   ;;  %v5996_v3 = vrot.slane %v10833_v1, 2 }
 0x1a2   : > { %v5989_v22 = vsel %vm2796_vm14, %v5986_v36, %v5988_v39  ;;  %v5991_v47 = vsel %vm2796_vm14, %v5988_v39, %v5990_v57  ;;  %v6364_v37 = vrot.slane %v10969_v40, 2  ;;  %v2828_v34 = vrot.slane %v10865_v9, 2 }
 0x1a3   : > { %v2541_v6 = vsel %vm2389_vm3, %v2531_v28, %v2540_v20  ;;  %vm11724_vm3 = vmmov %vm11596_vm0  ;;  %v5995_v30 = vsel %vm2796_vm14, %v5992_v15, %v5994_v12  ;;  %v5997_v20 = vsel %vm2796_vm14, %v5994_v12, %v5996_v3 }
 0x1a4   : > { %8808 = vmatmul.mubr.msk.bf16.gmra.mrb[28].mxu1 %vm11713_vm11, %v5711_v53  ;;  %v5979_v53 = vsel %vm2796_vm14, %v5976_v11, %v5978_v38  ;;  %vm11727_vm11 = vmmov %vm11596_vm0  ;;  %v3077_v11 = vld [vmem:[#allocation2 + $0x10] sm:$0xc]  ;;  %v10998_v38 = vld [vmem:[#allocation2 + $0x14] sm:$0xf] }
 0x1a5   : > { %8813 = vmatprep.mubr.msk.bf16.mxu1 %vm11714_vm13, %v5967_v17  ;;  %v2801_v17 = vsel %vm2796_vm14, %v2798_v4, %v2800_v25  ;;  %vm11728_vm13 = vmmov %vm11596_vm0 }
 0x1a6   : > { %8494 = vmatmul.mubr.msk.bf16.gmra.mrb[20].mxu0 %vm11715_vm5, %v2505_v61  ;;  %v2803_v61 = vsel %vm2796_vm14, %v2800_v25, %v2802_v5  ;;  %vm11729_vm5 = vmmov %vm11596_vm0  ;;  %v11001_v5 = vld [vmem:[#allocation2 + $0xb0] sm:$0xff]  }
 0x1a7   : > { %8497 = vmatprep.mubr.msk.bf16.mxu0 %vm11716_vm2, %v2514_v58  ;;  %v5983_v58 = vsel %vm2796_vm14, %v5980_v26, %v5982_v41  ;;  %vm11730_vm2 = vmmov %vm11596_vm0  ;;  %v11016_v26 = vld [vmem:[#allocation2 + $0x18] sm:$0xff]   ;;  %v6370_v41 = vrot.slane %v11001_v5, 2 }
 0x1ac   : > { %8814 = vmatmul.mubr.msk.bf16.vlgmr.msra.gmra.mrb[0].mxu1 %vm11717_vm1, %v5969_v32  ;;  %vm11731_vm1 = vmmov %vm11596_vm0  ;;  %v10961_v32 = vld [vmem:[#allocation2 + $0x94] sm:$0xf] }
 0x1ad   : > { %8846 = vmatpush3.bf16.msra.mxu1 %v10743_v49  ;;  %8817 = vmatprep.mubr.msk.bf16.mxu1 %vm11718_vm6, %v5971_v8  ;;  %v5975_v49 = vsel %vm2796_vm14, %v5972_v42, %v5974_v43  ;;  %vm11732_vm6 = vmmov %vm11596_vm0  ;;  %v2818_v8 = vrot.slane %v10684_v51, 2  ;;  %v2820_v42 = vrot.slane %v10701_v18, 2  ;;  %v2822_v43 = vrot.slane %v10704_v45, 2 }
 0x1ae   : > { %8498 = vmatmul.mubr.msk.bf16.gmra.mrb[24].mxu0 %vm11719_vm7, %v2523_v13  ;;  %8879 = vmatprep.subr.bf16.mxu1 %v10881_v19  ;;  %vm11733_vm7 = vmmov %vm11596_vm0  ;;  %v5993_v13 = vsel %vm2796_vm14, %v5990_v57, %v5992_v15  ;;  %v6366_v18 = vrot.slane %v10983_v27, 2  ;;  %v11050_v57 = vld [vmem:[#allocation2 + $0xd0] sm:$0xff]   ;;  %v11065_v15 = vld [vmem:[%s11551_s3 + $0x40] sm:$0xff]  }
 0x1af   : > { %8501 = vmatprep.mubr.msk.bf16.mxu0 %vm11720_vm15, %v2532_v7  ;;  %vm11734_vm15 = vmmov %vm11596_vm0  ;;  %v2819_v7 = vsel %vm2796_vm14, %v2816_v24, %v2818_v8  ;;  %v2821_v1 = vsel %vm2796_vm14, %v2818_v8, %v2820_v42  ;;  %v6378_v12 = vrot.slane %v11050_v57, 2 }
 0x1b0   : > { %v6367_v25 = vsel %vm2796_vm14, %v6364_v37, %v6366_v18 }
 0x1b4   : > { %8818 = vmatmul.mubr.msk.bf16.gmra.mrb[4].mxu1 %vm11721_vm9, %v5973_v31  ;;  %vm11735_vm9 = vmmov %vm11596_vm0  ;;  %v10986_v31 = vld [vmem:[#allocation2 + $0xa8] sm:$0xff]  }
 0x1b5   : > { %8821 = vmatprep.mubr.msk.bf16.mxu1 %vm11722_vm10, %v5975_v49  ;;  %vm11736_vm10 = vmmov %vm11596_vm0  ;;  %v2823_v49 = vsel %vm2796_vm14, %v2820_v42, %v2822_v43  ;;  %v6368_v45 = vrot.slane %v10986_v31, 2 }
 0x1b6   : > { %8502 = vmatmul.mubr.msk.bf16.gmra.mrb[28].mxu0 %vm11596_vm0, %v2541_v6  ;;  %v2824_v6 = vrot.slane %v10719_v2, 2 }
 0x1b7   : > { %8507 = vmatprep.mubr.msk.bf16.mxu0 %vm11723_vm12, %v2799_v16  ;;  %vm11737_vm12 = vmmov %vm11596_vm0  ;;  %v2826_v16 = vrot.slane %v10721_v33, 2 }
 0x1b8   : > { %v2825_v2 = vsel %vm2796_vm14, %v2822_v43, %v2824_v6 }
 0x1b9   : > { %v2827_v33 = vsel %vm2796_vm14, %v2824_v6, %v2826_v16  ;;  %v2829_v36 = vsel %vm2796_vm14, %v2826_v16, %v2828_v34  ;;  %v11103_v16 = vld [vmem:[#allocation2 + $0x50] sm:$0xff]   ;;  %v11117_v34 = vld [vmem:[#allocation2 + $0x100] sm:$0xff]  }
 0x1bc   : > { %8822 = vmatmul.mubr.msk.bf16.gmra.mrb[8].mxu1 %vm11724_vm3, %v5977_v44  ;;  %vm11738_vm3 = vmmov %vm11596_vm0  ;;  %v6369_v44 = vsel %vm2796_vm14, %v6366_v18, %v6368_v45 }
 0x1bd   : > { %8825 = vmatprep.mubr.msk.bf16.mxu1 %vm11725_vm8, %v5979_v53  ;;  %vm11739_vm8 = vmmov %vm11596_vm0  ;;  %v11004_v53 = vld [vmem:[#allocation2 + $0xb8] sm:$0xff]  }
 0x1be   : > { %8508 = vmatmul.mubr.msk.bf16.vlgmr.msra.gmra.mrb[0].mxu0 %vm11726_vm4, %v2801_v17  ;;  %vm11740_vm4 = vmmov %vm11596_vm0  ;;  %v11009_v17 = vld [vmem:[%s11551_s3 + $0x40] sm:$0xff]   ;;  %v6372_v29 = vrot.slane %v11004_v53, 2 }
 0x1bf   : > { %8540 = vmatpush3.bf16.msra.mxu0 %v10785_v0  ;;  %8511 = vmatprep.mubr.msk.bf16.mxu0 %vm11727_vm11, %v2803_v61  ;;  %v2810_v0 = vrot.slane %v10644_v59, 2  ;;  %v2814_v59 = vrot.slane %v10664_v10, 2  ;;  %v6245_v10 = vld [vmem:[#allocation2 + $0x90] sm:$0xc]  ;;  %vm11741_vm11 = vmmov %vm11596_vm0  ;;  %v11014_v61 = vcombine.low %v3077_v11, %v10998_v38 }
 0x1c0   : > { %8573 = vmatprep.subr.bf16.mxu0 %v10915_v23  ;;  %v10967_v50 = vcombine.low %v6245_v10, %v10961_v32 }
 0x1c1   : > { %v2811_v54 = vsel %vm2796_vm14, %v2808_v63, %v2810_v0  ;;  %v2813_v28 = vsel %vm2796_vm14, %v2810_v0, %v2812_v62  ;;  %v2815_v55 = vsel %vm2796_vm14, %v2812_v62, %v2814_v59  ;;  %v2817_v52 = vsel %vm2796_vm14, %v2814_v59, %v2816_v24  ;;  %v11036_v63 = vld [vmem:[#allocation2 + $0x20] sm:$0xff]   ;;  %v11053_v59 = vld [vmem:[#allocation2 + $0xd8] sm:$0xff]  }
 0x1c2   : > { %v6363_v51 = vrot.slane %v10967_v50, 2  ;;  %v6380_v24 = vrot.slane %v11053_v59, 2 }
 0x1c4   : > { %8826 = vmatmul.mubr.msk.bf16.gmra.mrb[12].mxu1 %vm11728_vm13, %v5981_v56  ;;  %vm11742_vm13 = vmmov %vm11596_vm0  ;;  %v6365_v4 = vsel %vm2796_vm14, %v6363_v51, %v6364_v37  ;;  %v3196_v56 = vrot.slane %v11014_v61, 2  ;;  %v11083_v51 = vld [vmem:[#allocation2 + $0x40] sm:$0xff]   ;;  %v11086_v37 = vld [vmem:[#allocation2 + $0x48] sm:$0xff]  }
 0x1c5   : > { %8829 = vmatprep.mubr.msk.bf16.mxu1 %vm11729_vm5, %v5983_v58  ;;  %vm11743_vm5 = vmmov %vm11596_vm0  ;;  %v3197_v58 = vrot.slane %v11016_v26, 2 }
 0x1c6   : > { %8512 = vmatmul.mubr.msk.bf16.gmra.mrb[4].mxu0 %vm11730_vm2, %v2805_v21  ;;  %vm11744_vm2 = vmmov %vm11596_vm0  ;;  %v11030_v21 = vld [vmem:[#allocation2 + $0xc0] sm:$0xff]  }
 0x1c7   : > { %8515 = vmatprep.mubr.msk.bf16.mxu0 %vm11731_vm1, %v2807_v46  ;;  %vm11745_vm1 = vmmov %vm11596_vm0  ;;  %v6373_v46 = vsel %vm2796_vm14, %v6370_v41, %v6372_v29  ;;  %v3198_v0 = vsel %vm2796_vm14, %v3196_v56, %v3197_v58  ;;  %v6374_v9 = vrot.slane %v11030_v21, 2  ;;  %v11119_v56 = vld [vmem:[#allocation2 + $0x108] sm:$0xff]  }
 0x1c9   : > { %v6375_v39 = vsel %vm2796_vm14, %v6372_v29, %v6374_v9 }
 0x1cc   : > { %8830 = vmatmul.mubr.msk.bf16.gmra.mrb[16].mxu1 %vm11732_vm6, %v5985_v48  ;;  %vm11746_vm6 = vmmov %vm11596_vm0  ;;  %v11039_v48 = vld [vmem:[#allocation2 + $0x28] sm:$0xff]  }
 0x1cd   : > { %8833 = vmatprep.mubr.msk.bf16.mxu1 %vm11733_vm7, %v5987_v60  ;;  %vm11747_vm7 = vmmov %vm11596_vm0  ;;  %v6376_v60 = vrot.slane %v11033_v35, 2 }
 0x1ce   : > { %8516 = vmatmul.mubr.msk.bf16.gmra.mrb[8].mxu0 %vm11734_vm15, %v2809_v14  ;;  %vm11748_vm15 = vmmov %vm11596_vm0  ;;  %v3199_v14 = vrot.slane %v11036_v63, 2 }
 0x1cf   : > { %8519 = vmatprep.mubr.msk.bf16.mxu0 %vm11735_vm9, %v2811_v54  ;;  %vm11749_vm9 = vmmov %vm11596_vm0  ;;  %v3201_v54 = vrot.slane %v11039_v48, 2  ;;  %v6377_v62 = vsel %vm2796_vm14, %v6374_v9, %v6376_v60  ;;  %v6390_v9 = vrot.slane %v11117_v34, 2 }
 0x1d4   : > { %8834 = vmatmul.mubr.msk.bf16.gmra.mrb[20].mxu1 %vm11736_vm10, %v5989_v22  ;;  %vm11750_vm10 = vmmov %vm11596_vm0  ;;  %v3200_v22 = vsel %vm2796_vm14, %v3197_v58, %v3199_v14 }
 0x1d5   : > { %8837 = vmatprep.mubr.msk.bf16.mxu1 %vm11596_vm0, %v5991_v47  ;;  %v11056_v47 = vld [vmem:[#allocation2 + $0x30] sm:$0xff]  }
 0x1d6   : > { %8520 = vmatmul.mubr.msk.bf16.gmra.mrb[12].mxu0 %vm11737_vm12, %v2813_v28  ;;  %vm11751_vm12 = vmmov %vm11596_vm0  ;;  %v3202_v28 = vsel %vm2796_vm14, %v3199_v14, %v3201_v54  ;;  %v3203_v10 = vrot.slane %v11056_v47, 2  ;;  %v6650_v14 = vshrl.u32 %v10967_v50, 16 }
 0x1d7   : > { %8523 = vmatprep.mubr.msk.bf16.mxu0 %vm11738_vm3, %v2815_v55  ;;  %vm11752_vm3 = vmmov %vm11596_vm0  ;;  %v11059_v55 = vld [vmem:[#allocation2 + $0x38] sm:$0xff]  }
 0x1d8   : > { %v3205_v8 = vrot.slane %v11059_v55, 2  ;;  %v3204_v3 = vsel %vm2796_vm14, %v3201_v54, %v3203_v10  ;;  %v6653_v54 = vshll.u32 %v10967_v50, 16 }
 0x1dc   : > { %8838 = vmatmul.mubr.msk.bf16.gmra.mrb[24].mxu1 %vm11739_vm8, %v5993_v13  ;;  %vm11753_vm8 = vmmov %vm11596_vm0  ;;  %v6379_v13 = vsel %vm2796_vm14, %v6376_v60, %v6378_v12  ;;  %v6392_v60 = vrot.slane %v11119_v56, 2 }
 0x1dd   : > { %8841 = vmatprep.mubr.msk.bf16.mxu1 %vm11740_vm4, %v5995_v30  ;;  %vm11754_vm4 = vmmov %vm11596_vm0  ;;  %v11077_v30 = vld [vmem:[#allocation2 + $0xe0] sm:$0xff]  }
 0x1de   : > { %8524 = vmatmul.mubr.msk.bf16.gmra.mrb[16].mxu0 %vm11741_vm11, %v2817_v52  ;;  %vm11755_vm11 = vmmov %vm11596_vm0  ;;  %v6381_v52 = vsel %vm2796_vm14, %v6378_v12, %v6380_v24  ;;  %v6382_v42 = vrot.slane %v11077_v30, 2 }
 0x1df   : > { %8527 = vmatprep.mubr.msk.bf16.mxu0 %vm11742_vm13, %v2819_v7  ;;  %vm11756_vm13 = vmmov %vm11596_vm0  ;;  %v11080_v7 = vld [vmem:[#allocation2 + $0xe8] sm:$0xff]  }
 0x1e0   : > { %v6384_v43 = vrot.slane %v11080_v7, 2 }
 0x1e2   : > { %v6385_v18 = vsel %vm2796_vm14, %v6382_v42, %v6384_v43 }
 0x1e4   : > { %8842 = vmatmul.mubr.msk.bf16.gmra.mrb[28].mxu1 %vm11743_vm5, %v5997_v20  ;;  %vm11757_vm5 = vmmov %vm11596_vm0  ;;  %v3207_v20 = vrot.slane %v11083_v51, 2 }
 0x1e5   : > { %8847 = vmatprep.mubr.msk.bf16.mxu1 %vm11744_vm2, %v6365_v4  ;;  %vm11758_vm2 = vmmov %vm11596_vm0  ;;  %v3209_v4 = vrot.slane %v11086_v37, 2 }
 0x1e6   : > { %8528 = vmatmul.mubr.msk.bf16.gmra.mrb[20].mxu0 %vm11745_vm1, %v2821_v1  ;;  %vm11759_vm1 = vmmov %vm11596_vm0  ;;  %v6383_v1 = vsel %vm2796_vm14, %v6380_v24, %v6382_v42  ;;  %v3208_v6 = vsel %vm2796_vm14, %v3205_v8, %v3207_v20  ;;  %v6393_v24 = vsel %vm2796_vm14, %v6390_v9, %v6392_v60 }
 0x1e7   : > { %8531 = vmatprep.mubr.msk.bf16.mxu0 %vm11746_vm6, %v2823_v49  ;;  %vm11760_vm6 = vmmov %vm11596_vm0  ;;  %v11097_v49 = vld [vmem:[#allocation2 + $0xf0] sm:$0xff]   ;;  %v3210_v11 = vsel %vm2796_vm14, %v3207_v20, %v3209_v4 }
 0x1ec   : > { %8848 = vmatmul.mubr.msk.bf16.vlgmr.msra.gmra.mrb[0].mxu1 %vm11747_vm7, %v6367_v25  ;;  %vm11761_vm7 = vmmov %vm11596_vm0  ;;  %v11106_v25 = vld [vmem:[#allocation2 + $0x58] sm:$0xff]  }
 0x1ed   : > { %8880 = vmatpush3.bf16.msra.mxu1 %v10881_v19  ;;  %8851 = vmatprep.mubr.msk.bf16.mxu1 %vm11748_vm15, %v6369_v44  ;;  %v6371_v19 = vsel %vm2796_vm14, %v6368_v45, %v6370_v41  ;;  %v11100_v45 = vld [vmem:[#allocation2 + $0xf8] sm:$0xff]   ;;  %vm11762_vm15 = vmmov %vm11596_vm0  ;;  %v6386_v44 = vrot.slane %v11097_v49, 2  ;;  %v3213_v41 = vrot.slane %v11106_v25, 2 }
 0x1ee   : > { %8532 = vmatmul.mubr.msk.bf16.gmra.mrb[24].mxu0 %vm11749_vm9, %v2825_v2  ;;  %8913 = vmatprep.subr.bf16.mxu1 %v11009_v17  ;;  %vm11763_vm9 = vmmov %vm11596_vm0  ;;  %v6388_v2 = vrot.slane %v11100_v45, 2 }
 0x1ef   : > { %8535 = vmatprep.mubr.msk.bf16.mxu0 %vm11750_vm10, %v2827_v33  ;;  %vm11764_vm10 = vmmov %vm11596_vm0  ;;  %v3211_v33 = vrot.slane %v11103_v16, 2  ;;  %v6387_v29 = vsel %vm2796_vm14, %v6384_v43, %v6386_v44  ;;  %v11146_v43 = vld [vmem:[#allocation2 + $0x78] sm:$0xff]  }
 0x1f0   : > { %v6389_v58 = vsel %vm2796_vm14, %v6386_v44, %v6388_v2  ;;  %v6391_v12 = vsel %vm2796_vm14, %v6388_v2, %v6390_v9  ;;  %v6679_v44 = vshll.u32 %v10986_v31, 16 }
 0x1f2   : > { %v6681_v9 = vrot.slane %v6679_v44, 3 }
 0x1f4   : > { %8852 = vmatmul.mubr.msk.bf16.gmra.mrb[4].mxu1 %vm11596_vm0, %v6371_v19  ;;  %v3212_v19 = vsel %vm2796_vm14, %v3209_v4, %v3211_v33  ;;  %v6667_v4 = vshrl.u32 %v10983_v27, 16 }
 0x1f5   : > { %8855 = vmatprep.mubr.msk.bf16.mxu1 %vm11751_vm12, %v6373_v46  ;;  %v11123_v46 = vld [vmem:[#allocation2 + $0x60] sm:$0xff]   ;;  %vm11765_vm12 = vmmov %vm11596_vm0 }
 0x1f6   : > { %8536 = vmatmul.mubr.msk.bf16.gmra.mrb[28].mxu0 %vm11752_vm3, %v2829_v36  ;;  %v3214_v36 = vsel %vm2796_vm14, %v3211_v33, %v3213_v41  ;;  %vm11766_vm3 = vmmov %vm11596_vm0  ;;  %v3221_v33 = vrot.slane %v11146_v43, 2 }
 0x1f7   : > { %8541 = vmatprep.mubr.msk.bf16.mxu0 %vm11753_vm8, %v3198_v0  ;;  %v11126_v0 = vld [vmem:[#allocation2 + $0x68] sm:$0xff]   ;;  %vm11767_vm8 = vmmov %vm11596_vm0 }
 0x1fc   : > { %8856 = vmatmul.mubr.msk.bf16.gmra.mrb[8].mxu1 %vm11754_vm4, %v6375_v39  ;;  %v6658_v39 = vshrl.u32 %v10969_v40, 16  ;;  %vm11768_vm4 = vmmov %vm11596_vm0 }
 0x1fd   : > { %8859 = vmatprep.mubr.msk.bf16.mxu1 %vm11755_vm11, %v6377_v62  ;;  %v6661_v62 = vshll.u32 %v10969_v40, 16  ;;  %vm11769_vm11 = vmmov %vm11596_vm0 }
 0x1fe   : > { %8542 = vmatmul.mubr.msk.bf16.vlgmr.msra.gmra.mrb[0].mxu0 %vm11756_vm13, %v3200_v22  ;;  %v3215_v22 = vrot.slane %v11123_v46, 2  ;;  %vm11770_vm13 = vmmov %vm11596_vm0 }
 0x1ff   : > { %8574 = vmatpush3.bf16.msra.mxu0 %v10915_v23  ;;  %8545 = vmatprep.mubr.msk.bf16.mxu0 %vm11757_vm5, %v3202_v28  ;;  %v3206_v23 = vsel %vm2796_vm14, %v3203_v10, %v3205_v8  ;;  %v3217_v28 = vrot.slane %v11126_v0, 2  ;;  %v9589_v10 = vld [vmem:[#allocation2 + $0x110] ss:$0 sps:$4 sm:$0x33]   ;;  %v6652_v8 = vrot.slane %v6650_v14, 2  ;;  %vm11771_vm5 = vmmov %vm11596_vm0 }
 0x200   : > { %8607 = vmatprep.subr.bf16.mxu0 %v11065_v15  ;;  %v3216_v50 = vsel %vm2796_vm14, %v3213_v41, %v3215_v22  ;;  %v6394_v20 = vrot.slane %v9589_v10, 2  ;;  %v6697_v10 = vshll.u32 %v11004_v53, 16 }
 0x201   : > { %v3218_v42 = vsel %vm2796_vm14, %v3215_v22, %v3217_v28  ;;  %v6685_v22 = vshrl.u32 %v11001_v5, 16 }
 0x202   : > { %v6395_v41 = vsel %vm2796_vm14, %v6392_v60, %v6394_v20  ;;  %v9587_v20 = vld [vmem:[#allocation2 + $0x90] ss:$0 sps:$4 sm:$0x33]  }
 0x204   : > { %8860 = vmatmul.mubr.msk.bf16.gmra.mrb[12].mxu1 %vm11758_vm2, %v6379_v13  ;;  %v6655_v13 = vrot.slane %v6653_v54, 3  ;;  %vm11772_vm2 = vmmov %vm11596_vm0  ;;  %v11161_v54 = vld [vmem:[#allocation2 + $0x80] sm:$0xff]  }
 0x205   : > { %8863 = vmatprep.mubr.msk.bf16.mxu1 %vm11759_vm1, %v6381_v52  ;;  %v6660_v52 = vrot.slane %v6658_v39, 2  ;;  %vm3483_vm1 = vsmask.f32 5376 }
 0x206   : > { %8546 = vmatmul.mubr.msk.bf16.gmra.mrb[4].mxu0 %vm11760_vm6, %v3204_v3  ;;  %v6663_v3 = vrot.slane %v6661_v62, 3  ;;  %v11164_v62 = vld [vmem:[#allocation2 + $0x88] sm:$0xff]   ;;  %vm11773_vm6 = vmmov %vm11596_vm0 }
 0x207   : > { %8549 = vmatprep.mubr.msk.bf16.mxu0 %vm11761_vm7, %v3206_v23  ;;  %v11143_v23 = vld [vmem:[#allocation2 + $0x70] sm:$0xff]   ;;  %vm11774_vm7 = vmmov %vm11596_vm0 }
 0x208   : > { %v3219_v2 = vrot.slane %v11143_v23, 2 }
 0x20a   : > { %v3220_v14 = vsel %vm2796_vm14, %v3217_v28, %v3219_v2  ;;  %v3222_v39 = vsel %vm2796_vm14, %v3219_v2, %v3221_v33  ;;  %v6694_v28 = vshrl.u32 %v11004_v53, 16  ;;  %v6699_v2 = vrot.slane %v6697_v10, 3 }
 0x20b   : > { %v3502_v10 = vshrl.u32 %v11036_v63, 16 }
 0x20c   : > { %8864 = vmatmul.mubr.msk.bf16.gmra.mrb[16].mxu1 %vm11762_vm15, %v6383_v1  ;;  %v6670_v1 = vshll.u32 %v10983_v27, 16  ;;  %vm11775_vm15 = vmmov %vm11596_vm0  ;;  %v6696_v44 = vrot.slane %v6694_v28, 2  ;;  %v3920_v28 = vrot.slane %v11164_v62, 3 }
 0x20d   : > { %8867 = vmatprep.mubr.msk.bf16.mxu1 %vm11763_vm9, %v6385_v18  ;;  %v6656_v18 = vor.u32 %v6655_v13, %v6652_v8  ;;  %vm11776_vm9 = vmmov %vm11596_vm0  ;;  %v3223_v8 = vrot.slane %v11161_v54, 2  ;;  %v3485_v13 = vshrl.u32 %v11014_v61, 16 }
 0x20e   : > { %8550 = vmatmul.mubr.msk.bf16.gmra.mrb[8].mxu0 %vm11764_vm10, %v3208_v6  ;;  %v6664_v6 = vor.u32 %v6663_v3, %v6660_v52  ;;  %v3488_v52 = vshll.u32 %v11014_v61, 16  ;;  %v3225_v3 = vrot.slane %v11164_v62, 2  ;;  %vm11777_vm10 = vmmov %vm11596_vm0 }
 0x20f   : > { %8553 = vmatprep.mubr.msk.bf16.mxu0 %vm11596_vm0, %v3210_v11  ;;  %v6676_v11 = vshrl.u32 %v10986_v31, 16 }
 0x210   : > { %v3226_v61 = vsel %vm2796_vm14, %v3223_v8, %v3225_v3 }
 0x214   : > { %8868 = vmatmul.mubr.msk.bf16.gmra.mrb[20].mxu1 %vm11765_vm12, %v6387_v29  ;;  %v6669_v29 = vrot.slane %v6667_v4, 2  ;;  %vm11778_vm12 = vmmov %vm11596_vm0 }
 0x215   : > { %8871 = vmatprep.mubr.msk.bf16.mxu1 %vm11766_vm3, %v6389_v58  ;;  %v6672_v58 = vrot.slane %v6670_v1, 3  ;;  %v6687_v1 = vrot.slane %v6685_v22, 2  ;;  %v6712_v22 = vshrl.u32 %v11033_v35, 16  ;;  %vm11779_vm3 = vmmov %vm11596_vm0 }
 0x216   : > { %8554 = vmatmul.mubr.msk.bf16.gmra.mrb[12].mxu0 %vm11767_vm8, %v3212_v19  ;;  %v6665_v19 = vsel %vm3483_vm1, %v6656_v18, %v6664_v6  ;;  %vm3890_vm8 = vcmask 1044480  }
 0x217   : > { %8557 = vmatprep.mubr.msk.bf16.mxu0 %vm11768_vm4, %v3214_v36  ;;  %v6678_v36 = vrot.slane %v6676_v11, 2  ;;  %v6673_v60 = vor.u32 %v6672_v58, %v6669_v29  ;;  %v3487_v29 = vrot.slane %v3485_v13, 2  ;;  %v3490_v58 = vrot.slane %v3488_v52, 3  ;;  %vm11780_vm4 = vmmov %vm11596_vm0 }
 0x219   : > { %v6674_v4 = vsel %vm3483_vm1, %v6664_v6, %v6673_v60 }
 0x21c   : > { %8872 = vmatmul.mubr.msk.bf16.gmra.mrb[24].mxu1 %vm11769_vm11, %v6391_v12  ;;  %v6688_v12 = vshll.u32 %v11001_v5, 16  ;;  %vm11781_vm11 = vmmov %vm11596_vm0 }
 0x21d   : > { %8875 = vmatprep.mubr.msk.bf16.mxu1 %vm11770_vm13, %v6393_v24  ;;  %v6682_v24 = vor.u32 %v6681_v9, %v6678_v36  ;;  %v3227_v9 = vrot.slane %v9587_v20, 2  ;;  %vm11782_vm13 = vmmov %vm11596_vm0 }
 0x21e   : > { %8558 = vmatmul.mubr.msk.bf16.gmra.mrb[16].mxu0 %vm11771_vm5, %v3216_v50  ;;  %v3493_v50 = vshrl.u32 %v11016_v26, 16  ;;  %v6690_v18 = vrot.slane %v6688_v12, 3  ;;  %v6715_v12 = vshll.u32 %v11033_v35, 16  ;;  %vm11784_vm5 = vmmov %vm11596_vm0 }
 0x21f   : > { %8561 = vmatprep.mubr.msk.bf16.mxu0 %vm11772_vm2, %v3218_v42  ;;  %v3496_v42 = vshll.u32 %v11016_v26, 16  ;;  %v6683_v11 = vsel %vm3483_vm1, %v6673_v60, %v6682_v24  ;;  %v11189_v60 = vld [vmem:[#allocation2 + $0x90] ss:$0 sps:$4 sm:$0x77]   ;;  %vm11785_vm2 = vmmov %vm11596_vm0 }
 0x220   : > { %v6691_v6 = vor.u32 %v6690_v18, %v6687_v1  ;;  %v3922_v13 = vrot.slane %v11189_v60, 3 }
 0x221   : > { %v3498_v36 = vrot.slane %v3496_v42, 3  ;;  %v3514_v42 = vshll.u32 %v11039_v48, 16 }
 0x222   : > { %v6692_v20 = vsel %vm3483_vm1, %v6682_v24, %v6691_v6  ;;  %v11205_v18 = vsel %vm3890_vm8, %v3920_v28, %v3922_v13  ;;  %v3532_v13 = vshll.u32 %v11059_v55, 16 }
 0x224   : > { %8876 = vmatmul.mubr.msk.bf16.gmra.mrb[28].mxu1 %vm11773_vm6, %v6395_v41  ;;  %v3224_v41 = vsel %vm2796_vm14, %v3221_v33, %v3223_v8  ;;  %v6700_v33 = vor.u32 %v6699_v2, %v6696_v44  ;;  %v3505_v8 = vshll.u32 %v11036_v63, 16  ;;  %v6714_v44 = vrot.slane %v6712_v22, 2  ;;  %vm11786_vm6 = vmmov %vm11596_vm0 }
 0x225   : > { %8881 = vmatprep.mubr.msk.bf16.mxu1 %vm11774_vm7, %v6665_v19  ;;  %v3495_v19 = vrot.slane %v3493_v50, 2  ;;  %v3511_v50 = vshrl.u32 %v11039_v48, 16  ;;  %v6717_v2 = vrot.slane %v6715_v12, 3  ;;  %v3520_v12 = vshrl.u32 %v11056_v47, 16  ;;  %vm11787_vm7 = vmmov %vm11596_vm0 }
 0x226   : > { %8562 = vmatmul.mubr.msk.bf16.gmra.mrb[20].mxu0 %vm11775_vm15, %v3220_v14  ;;  %v6703_v14 = vshrl.u32 %v11030_v21, 16  ;;  %vm11788_vm15 = vmmov %vm11596_vm0 }
 0x227   : > { %8565 = vmatprep.mubr.msk.bf16.mxu0 %vm11776_vm9, %v3222_v39  ;;  %v6706_v39 = vshll.u32 %v11030_v21, 16  ;;  %v3499_v52 = vor.u32 %v3498_v36, %v3495_v19  ;;  %v3513_v19 = vrot.slane %v3511_v50, 2  ;;  %v3516_v36 = vrot.slane %v3514_v42, 3  ;;  %vm11789_vm9 = vmmov %vm11596_vm0 }
 0x229   : > { %v6708_v1 = vrot.slane %v6706_v39, 3  ;;  %v6724_v39 = vshll.u32 %v11050_v57, 16 }
 0x22c   : > { %8882 = vmatmul.mubr.msk.bf16.vlgmr.msra.gmra.mrb[0].mxu1 %vm11777_vm10, %v6674_v4  ;;  %v6705_v4 = vrot.slane %v6703_v14, 2  ;;  %v6721_v14 = vshrl.u32 %v11050_v57, 16  ;;  %vm11790_vm10 = vmmov %vm11596_vm0 }
 0x22d   : > { %8914 = vmatpush3.bf16.msra.mxu1 %v11009_v17  ;;  %8885 = vmatprep.mubr.msk.bf16.mxu1 %vm11596_vm0, %v6683_v11  ;;  %v3491_v17 = vor.u32 %v3490_v58, %v3487_v29  ;;  %v6701_v11 = vsel %vm3483_vm1, %v6691_v6, %v6700_v33  ;;  %v3504_v29 = vrot.slane %v3502_v10, 2  ;;  %v3507_v58 = vrot.slane %v3505_v8, 3 }
 0x22e   : > { %8566 = vmatmul.mubr.msk.bf16.gmra.mrb[24].mxu0 %vm11778_vm12, %v3224_v41  ;;  %v3228_v41 = vsel %vm2796_vm14, %v3225_v3, %v3227_v9  ;;  %v6709_v24 = vor.u32 %v6708_v1, %v6705_v4  ;;  %v6718_v6 = vor.u32 %v6717_v2, %v6714_v44  ;;  %v6730_v3 = vshrl.u32 %v11053_v59, 16  ;;  %vm11783_vm14 = vmmov %vm11596_vm0 }
 0x22f   : > { %8569 = vmatprep.mubr.msk.bf16.mxu0 %vm11779_vm3, %v3226_v61  ;;  %v3500_v61 = vsel %vm3483_vm1, %v3491_v17, %v3499_v52  ;;  %v6733_v9 = vshll.u32 %v11053_v59, 16  ;;  %v3508_v22 = vor.u32 %v3507_v58, %v3504_v29  ;;  %v3523_v17 = vshll.u32 %v11056_v47, 16  ;;  %vm11791_vm12 = vmmov %vm11596_vm0 }
 0x230   : > { %v3517_v10 = vor.u32 %v3516_v36, %v3513_v19  ;;  %v3529_v8 = vshrl.u32 %v11059_v55, 16  ;;  %v6710_v50 = vsel %vm3483_vm1, %v6700_v33, %v6709_v24  ;;  %v6723_v42 = vrot.slane %v6721_v14, 2  ;;  %vm11792_vm3 = vmmov %vm11596_vm0 }
 0x231   : > { %v6719_v4 = vsel %vm3483_vm1, %v6709_v24, %v6718_v6  ;;  %v6732_v1 = vrot.slane %v6730_v3, 2  ;;  %v3509_v44 = vsel %vm3483_vm1, %v3499_v52, %v3508_v22  ;;  %v3522_v2 = vrot.slane %v3520_v12, 2 }
 0x232   : > { %v3518_v29 = vsel %vm3483_vm1, %v3508_v22, %v3517_v10  ;;  %v3531_v58 = vrot.slane %v3529_v8, 2  ;;  %v6739_v33 = vshrl.u32 %v11077_v30, 16  ;;  %v6742_v36 = vshll.u32 %v11077_v30, 16 }
 0x233   : > { %v6748_v52 = vshrl.u32 %v11080_v7, 16  ;;  %v6751_v14 = vshll.u32 %v11080_v7, 16  ;;  %v3538_v3 = vshrl.u32 %v11083_v51, 16  ;;  %v3547_v12 = vshrl.u32 %v11086_v37, 16 }
 0x234   : > { %8886 = vmatmul.mubr.msk.bf16.gmra.mrb[4].mxu1 %vm11780_vm4, %v6692_v20  ;;  %v6726_v20 = vrot.slane %v6724_v39, 3  ;;  %vm11793_vm4 = vmmov %vm11596_vm0 }
 0x235   : > { %8889 = vmatprep.mubr.msk.bf16.mxu1 %vm11781_vm11, %v6701_v11  ;;  %v6735_v11 = vrot.slane %v6733_v9, 3  ;;  %v3541_v9 = vshll.u32 %v11083_v51, 16  ;;  %vm11794_vm11 = vmmov %vm11596_vm0 }
 0x236   : > { %8570 = vmatmul.mubr.msk.bf16.gmra.mrb[28].mxu0 %vm11782_vm13, %v3228_v41  ;;  %v3525_v41 = vrot.slane %v3523_v17, 3  ;;  %v6727_v19 = vor.u32 %v6726_v20, %v6723_v42  ;;  %v3550_v17 = vshll.u32 %v11086_v37, 16  ;;  %v6750_v20 = vrot.slane %v6748_v52, 2  ;;  %vm11795_vm13 = vmmov %vm11596_vm0 }
 0x237   : > { %8575 = vmatprep.mubr.msk.bf16.mxu0 %vm11783_vm14, %v3500_v61  ;;  %v3534_v61 = vrot.slane %v3532_v13, 3  ;;  %v6736_v24 = vor.u32 %v6735_v11, %v6732_v1  ;;  %v6741_v13 = vrot.slane %v6739_v33, 2  ;;  %v3540_v1 = vrot.slane %v3538_v3, 2  ;;  %vm11796_vm14 = vmmov %vm11596_vm0 }
 0x238   : > { %v3526_v39 = vor.u32 %v3525_v41, %v3522_v2  ;;  %v6728_v8 = vsel %vm3483_vm1, %v6718_v6, %v6727_v19  ;;  %v3543_v11 = vrot.slane %v3541_v9, 3  ;;  %v3549_v2 = vrot.slane %v3547_v12, 2 }
 0x239   : > { %v3535_v22 = vor.u32 %v3534_v61, %v3531_v58  ;;  %v6737_v42 = vsel %vm3483_vm1, %v6727_v19, %v6736_v24  ;;  %v3552_v41 = vrot.slane %v3550_v17, 3  ;;  %v6757_v6 = vshrl.u32 %v11097_v49, 16 }
 0x23a   : > { %v6760_v58 = vshll.u32 %v11097_v49, 16  ;;  %v6769_v19 = vshll.u32 %v11100_v45, 16  ;;  %v3544_v33 = vor.u32 %v3543_v11, %v3540_v1  ;;  %v3559_v52 = vshll.u32 %v11103_v16, 16 }
 0x23b   : > { %v3568_v3 = vshll.u32 %v11106_v25, 16  ;;  %v6759_v12 = vrot.slane %v6757_v6, 2 }
 0x23c   : > { %8890 = vmatmul.mubr.msk.bf16.gmra.mrb[8].mxu1 %vm11784_vm5, %v6710_v50  ;;  %v6744_v50 = vrot.slane %v6742_v36, 3  ;;  %v3556_v36 = vshrl.u32 %v11103_v16, 16  ;;  %v6762_v17 = vrot.slane %v6760_v58, 3  ;;  %v3574_v58 = vshrl.u32 %v11123_v46, 16  ;;  %vm11797_vm5 = vmmov %vm11596_vm0 }
 0x23d   : > { %8893 = vmatprep.mubr.msk.bf16.mxu1 %vm11785_vm2, %v6719_v4  ;;  %v3527_v4 = vsel %vm3483_vm1, %v3517_v10, %v3526_v39  ;;  %v6766_v10 = vshrl.u32 %v11100_v45, 16  ;;  %v3570_v11 = vrot.slane %v3568_v3, 3  ;;  %vm11798_vm2 = vmmov %vm11596_vm0 }
 0x23e   : > { %8576 = vmatmul.mubr.msk.bf16.vlgmr.msra.gmra.mrb[0].mxu0 %vm11786_vm6, %v3509_v44  ;;  %v3536_v44 = vsel %vm3483_vm1, %v3526_v39, %v3535_v22  ;;  %v3565_v39 = vshrl.u32 %v11106_v25, 16  ;;  %vm11799_vm6 = vmmov %vm11596_vm0 }
 0x23f   : > { %8608 = vmatpush3.bf16.msra.mxu0 %v11065_v15  ;;  %8579 = vmatprep.mubr.msk.bf16.mxu0 %vm11787_vm7, %v3518_v29  ;;  %v6753_v15 = vrot.slane %v6751_v14, 3  ;;  %v6745_v29 = vor.u32 %v6744_v50, %v6741_v13  ;;  %v3553_v14 = vor.u32 %v3552_v41, %v3549_v2  ;;  %v6768_v13 = vrot.slane %v6766_v10, 2  ;;  %vm11800_vm7 = vmmov %vm11596_vm0 }
 0x240   : > { %v6771_v50 = vrot.slane %v6769_v19, 3  ;;  %v3567_v1 = vrot.slane %v3565_v39, 2  ;;  %v6778_v2 = vshll.u32 %v11117_v34, 16  ;;  %v3577_v10 = vshll.u32 %v11123_v46, 16 }
 0x241   : > { %v6754_v61 = vor.u32 %v6753_v15, %v6750_v20  ;;  %v6746_v9 = vsel %vm3483_vm1, %v6736_v24, %v6745_v29  ;;  %v3558_v20 = vrot.slane %v3556_v36, 2  ;;  %v3561_v15 = vrot.slane %v3559_v52, 3 }
 0x242   : > { %v6775_v24 = vshrl.u32 %v11117_v34, 16  ;;  %v6772_v41 = vor.u32 %v6771_v50, %v6768_v13  ;;  %v3571_v19 = vor.u32 %v3570_v11, %v3567_v1  ;;  %v3586_v36 = vshll.u32 %v11126_v0, 16 }
 0x243   : > { %v3562_v6 = vor.u32 %v3561_v15, %v3558_v20  ;;  %v6780_v3 = vrot.slane %v6778_v2, 3  ;;  %v3576_v50 = vrot.slane %v3574_v58, 2  ;;  %v3595_v2 = vshll.u32 %v11143_v23, 16 }
 0x244   : > { %8894 = vmatmul.mubr.msk.bf16.gmra.mrb[12].mxu1 %vm11788_vm15, %v6728_v8  ;;  %v6755_v8 = vsel %vm3483_vm1, %v6745_v29, %v6754_v61  ;;  %v6787_v29 = vshll.u32 %v11119_v56, 16  ;;  %v6777_v39 = vrot.slane %v6775_v24, 2  ;;  %v3592_v24 = vshrl.u32 %v11143_v23, 16  ;;  %vm11801_vm15 = vmmov %vm11596_vm0 }
 0x245   : > { %8897 = vmatprep.mubr.msk.bf16.mxu1 %vm11789_vm9, %v6737_v42  ;;  %v3545_v42 = vsel %vm3483_vm1, %v3535_v22, %v3544_v33  ;;  %v6784_v22 = vshrl.u32 %v11119_v56, 16  ;;  %v3563_v13 = vsel %vm3483_vm1, %v3553_v14, %v3562_v6  ;;  %v3572_v20 = vsel %vm3483_vm1, %v3562_v6, %v3571_v19  ;;  %vm11802_vm9 = vmmov %vm11596_vm0 }
 0x246   : > { %8580 = vmatmul.mubr.msk.bf16.gmra.mrb[4].mxu0 %vm11790_vm10, %v3527_v4  ;;  %v3554_v4 = vsel %vm3483_vm1, %v3544_v33, %v3553_v14  ;;  %v3583_v33 = vshrl.u32 %v11126_v0, 16  ;;  %v3601_v6 = vshrl.u32 %v11146_v43, 16  ;;  %v3604_v58 = vshll.u32 %v11146_v43, 16  ;;  %vm11803_vm10 = vmmov %vm11596_vm0 }
 0x247   : > { %8583 = vmatprep.mubr.msk.bf16.mxu0 %vm11596_vm0, %v3536_v44  ;;  %v6763_v44 = vor.u32 %v6762_v17, %v6759_v12  ;;  %v6786_v17 = vrot.slane %v6784_v22, 2  ;;  %v7048_v22 = vld [vmem:[#allocation2 + $0x90] sm:$0x8] }
 0x248   : > { %v3585_v15 = vrot.slane %v3583_v33, 2 }
 0x249   : > { %v6764_v52 = vsel %vm3483_vm1, %v6754_v61, %v6763_v44  ;;  %v6773_v12 = vsel %vm3483_vm1, %v6763_v44, %v6772_v41  ;;  %v6781_v61 = vor.u32 %v6780_v3, %v6777_v39  ;;  %v7896_v39 = vcombine.low %v7048_v22, %v10961_v32 }
 0x24c   : > { %8898 = vmatmul.mubr.msk.bf16.gmra.mrb[16].mxu1 %vm11791_vm12, %v6746_v9  ;;  %v11272_v9 = vld [vmem:[#allocation2 + $0x110] ss:$0 sps:$4 sm:$0x77]   ;;  %vm11804_vm12 = vmmov %vm11596_vm0 }
 0x24d   : > { %8901 = vmatprep.mubr.msk.bf16.mxu1 %vm11792_vm3, %v6755_v8  ;;  %v6789_v8 = vrot.slane %v6787_v29, 3  ;;  %v6793_v1 = vshrl.u32 %v11272_v9, 16  ;;  %v6796_v11 = vshll.u32 %v11272_v9, 16  ;;  %vm11805_vm3 = vmmov %vm11596_vm0 }
 0x24e   : > { %8584 = vmatmul.mubr.msk.bf16.gmra.mrb[8].mxu0 %vm11793_vm4, %v3545_v42  ;;  %v3579_v42 = vrot.slane %v3577_v10, 3  ;;  %v6782_v10 = vsel %vm3483_vm1, %v6772_v41, %v6781_v61  ;;  %v7054_v41 = vrot.slane %v7896_v39, 3  ;;  %v3883_v39 = vld [vmem:[#allocation2 + $0x10] sm:$0x8]  ;;  %vm11806_vm4 = vmmov %vm11596_vm0 }
 0x24f   : > { %8587 = vmatprep.mubr.msk.bf16.mxu0 %vm11794_vm11, %v3554_v4  ;;  %v3588_v4 = vrot.slane %v3586_v36, 3  ;;  %v6790_v44 = vor.u32 %v6789_v8, %v6786_v17  ;;  %v6795_v33 = vrot.slane %v6793_v1, 2  ;;  %v6798_v36 = vrot.slane %v6796_v11, 3  ;;  %vm11807_vm11 = vmmov %vm11596_vm0 }
 0x250   : > { %v3580_v14 = vor.u32 %v3579_v42, %v3576_v50  ;;  %v3597_v17 = vrot.slane %v3595_v2, 3  ;;  %v3606_v50 = vrot.slane %v3604_v58, 3  ;;  %v3622_v1 = vshll.u32 %v11164_v62, 16 }
 0x251   : > { %v3589_v29 = vor.u32 %v3588_v4, %v3585_v15  ;;  %v6799_v42 = vor.u32 %v6798_v36, %v6795_v33  ;;  %v3613_v15 = vshll.u32 %v11161_v54, 16  ;;  %v3631_v36 = vshll.u32 %v11189_v60, 16 }
 0x252   : > { %v3581_v3 = vsel %vm3483_vm1, %v3571_v19, %v3580_v14  ;;  %v3610_v19 = vshrl.u32 %v11161_v54, 16  ;;  %v3624_v58 = vrot.slane %v3622_v1, 3 }
 0x253   : > { %v3590_v8 = vsel %vm3483_vm1, %v3580_v14, %v3589_v29  ;;  %v6800_v11 = vsel %vm3483_vm1, %v6790_v44, %v6799_v42 }
 0x254   : > { %8902 = vmatmul.mubr.msk.bf16.gmra.mrb[20].mxu1 %vm11795_vm13, %v6764_v52  ;;  %v6791_v52 = vsel %vm3483_vm1, %v6781_v61, %v6790_v44  ;;  %v3619_v61 = vshrl.u32 %v11164_v62, 16  ;;  %v3612_v2 = vrot.slane %v3610_v19, 2  ;;  %v7059_v44 = vrot.slane %v10986_v31, 3  ;;  %vm11808_vm13 = vmmov %vm11596_vm0 }
 0x255   : > { %8905 = vmatprep.mubr.msk.bf16.mxu1 %vm11796_vm14, %v6773_v12  ;;  %v3594_v12 = vrot.slane %v3592_v24, 2  ;;  %v7671_v31 = vcombine.low %v3883_v39, %v10998_v38  ;;  %vm11809_vm14 = vmmov %vm11596_vm0 }
 0x256   : > { %8588 = vmatmul.mubr.msk.bf16.gmra.mrb[12].mxu0 %vm11797_vm5, %v3563_v13  ;;  %v3603_v13 = vrot.slane %v3601_v6, 2  ;;  %v3621_v6 = vrot.slane %v3619_v61, 2  ;;  %vm11810_vm5 = vmmov %vm11596_vm0 }
 0x257   : > { %8591 = vmatprep.mubr.msk.bf16.mxu0 %vm11798_vm2, %v3572_v20  ;;  %v7055_v20 = vrot.slane %v10969_v40, 3  ;;  %v3598_v32 = vor.u32 %v3597_v17, %v3594_v12  ;;  %v3615_v40 = vrot.slane %v3613_v15, 3  ;;  %vm11811_vm2 = vmmov %vm11596_vm0 }
 0x258   : > { %v3607_v4 = vor.u32 %v3606_v50, %v3603_v13  ;;  %v7063_v50 = vrot.slane %v11004_v53, 3  ;;  %v7067_v53 = vrot.slane %v11033_v35, 3  ;;  %v7071_v35 = vrot.slane %v11053_v59, 3 }
 0x259   : > { %v7056_v14 = vsel %vm3890_vm8, %v7054_v41, %v7055_v20  ;;  %v3599_v24 = vsel %vm3483_vm1, %v3589_v29, %v3598_v32  ;;  %v3616_v33 = vor.u32 %v3615_v40, %v3612_v2  ;;  %v3628_v29 = vshrl.u32 %v11189_v60, 16 }
 0x25a   : > { %v3608_v22 = vsel %vm3483_vm1, %v3598_v32, %v3607_v4  ;;  %v7061_v60 = vrot.slane %v11001_v5, 3  ;;  %v3891_v41 = vrot.slane %v7671_v31, 3  ;;  %v7065_v5 = vrot.slane %v11030_v21, 3 }
 0x25b   : > { %v3617_v17 = vsel %vm3483_vm1, %v3607_v4, %v3616_v33  ;;  %v3896_v4 = vrot.slane %v11039_v48, 3  ;;  %v7069_v21 = vrot.slane %v11050_v57, 3  ;;  %v3900_v48 = vrot.slane %v11059_v55, 3 }
 0x25c   : > { %8906 = vmatmul.mubr.msk.bf16.gmra.mrb[24].mxu1 %vm11799_vm6, %v6782_v10  ;;  %v7057_v10 = vrot.slane %v10983_v27, 3  ;;  %v3630_v27 = vrot.slane %v3628_v29, 2  ;;  %v7062_v32 = vsel %vm3890_vm8, %v7059_v44, %v7061_v60  ;;  %v7064_v38 = vsel %vm3890_vm8, %v7061_v60, %v7063_v50  ;;  %vm11812_vm6 = vmmov %vm11596_vm0 }
 0x25d   : > { %8909 = vmatprep.mubr.msk.bf16.mxu1 %vm11800_vm7, %v6791_v52  ;;  %v3625_v52 = vor.u32 %v3624_v58, %v3621_v6  ;;  %vm11813_vm7 = vmmov %vm11596_vm0  ;;  %v7066_v61 = vsel %vm3890_vm8, %v7063_v50, %v7065_v5  ;;  %v7068_v1 = vsel %vm3890_vm8, %v7065_v5, %v7067_v53  ;;  %v7072_v2 = vsel %vm3890_vm8, %v7069_v21, %v7071_v35 }
 0x25e   : > { %8592 = vmatmul.mubr.msk.bf16.gmra.mrb[16].mxu0 %vm11801_vm15, %v3581_v3  ;;  %v7058_v3 = vsel %vm3890_vm8, %v7055_v20, %v7057_v10  ;;  %v7060_v12 = vsel %vm3890_vm8, %v7057_v10, %v7059_v44  ;;  %v3892_v20 = vrot.slane %v11016_v26, 3  ;;  %v3894_v26 = vrot.slane %v11036_v63, 3  ;;  %vm11815_vm15 = vmmov %vm11596_vm0 }
 0x25f   : > { %8595 = vmatprep.mubr.msk.bf16.mxu0 %vm11802_vm9, %v3590_v8  ;;  %v3633_v8 = vrot.slane %v3631_v36, 3  ;;  %v3626_v13 = vsel %vm3483_vm1, %v3616_v33, %v3625_v52  ;;  %vm11816_vm9 = vmmov %vm11596_vm0  ;;  %v3898_v63 = vrot.slane %v11056_v47, 3  ;;  %v7073_v57 = vrot.slane %v11077_v30, 3 }
 0x260   : > { %v3893_v15 = vsel %vm3890_vm8, %v3891_v41, %v3892_v20  ;;  %v7075_v59 = vrot.slane %v11080_v7, 3  ;;  %v3902_v47 = vrot.slane %v11083_v51, 3  ;;  %v3904_v55 = vrot.slane %v11086_v37, 3 }
 0x261   : > { %v3634_v42 = vor.u32 %v3633_v8, %v3630_v27  ;;  %v3899_v40 = vsel %vm3890_vm8, %v3896_v4, %v3898_v63  ;;  %v7074_v6 = vsel %vm3890_vm8, %v7071_v35, %v7073_v57  ;;  %v7077_v30 = vrot.slane %v11097_v49, 3 }
 0x262   : > { %v7076_v58 = vsel %vm3890_vm8, %v7073_v57, %v7075_v59  ;;  %v3903_v10 = vsel %vm3890_vm8, %v3900_v48, %v3902_v47  ;;  %v3905_v44 = vsel %vm3890_vm8, %v3902_v47, %v3904_v55  ;;  %v7079_v7 = vrot.slane %v11100_v45, 3 }
 0x263   : > { %v3635_v19 = vsel %vm3483_vm1, %v3625_v52, %v3634_v42  ;;  %vm11814_vm1 = vmmov %vm11596_vm0  ;;  %v3906_v51 = vrot.slane %v11103_v16, 3  ;;  %v3908_v37 = vrot.slane %v11106_v25, 3  ;;  %v7078_v33 = vsel %vm3890_vm8, %v7075_v59, %v7077_v30 }
 0x264   : > { %8910 = vmatmul.mubr.msk.bf16.gmra.mrb[28].mxu1 %vm11803_vm10, %v6800_v11  ;;  %v3895_v11 = vsel %vm3890_vm8, %v3892_v20, %v3894_v26  ;;  %vm11817_vm10 = vmmov %vm11596_vm0  ;;  %v7080_v29 = vsel %vm3890_vm8, %v7077_v30, %v7079_v7  ;;  %v7081_v49 = vrot.slane %v11117_v34, 3  ;;  %v7083_v45 = vrot.slane %v11119_v56, 3 }
 0x265   : > { %8915 = vmatprep.mubr.msk.bf16.mxu1 %vm11596_vm0, %v7056_v14  ;;  %v3897_v14 = vsel %vm3890_vm8, %v3894_v26, %v3896_v4  ;;  %v3907_v36 = vsel %vm3890_vm8, %v3904_v55, %v3906_v51  ;;  %v3909_v52 = vsel %vm3890_vm8, %v3906_v51, %v3908_v37  ;;  %v3910_v16 = vrot.slane %v11123_v46, 3 }
 0x266   : > { %8596 = vmatmul.mubr.msk.bf16.gmra.mrb[20].mxu0 %vm11804_vm12, %v3599_v24  ;;  %v7070_v24 = vsel %vm3890_vm8, %v7067_v53, %v7069_v21  ;;  %vm11818_vm12 = vmmov %vm11596_vm0  ;;  %v3912_v25 = vrot.slane %v11126_v0, 3  ;;  %v7082_v39 = vsel %vm3890_vm8, %v7079_v7, %v7081_v49  ;;  %v7085_v34 = vrot.slane %v11272_v9, 3 }
 0x267   : > { %8599 = vmatprep.mubr.msk.bf16.mxu0 %vm11805_vm3, %v3608_v22  ;;  %v3901_v22 = vsel %vm3890_vm8, %v3898_v63, %v3900_v48  ;;  %vm11819_vm3 = vmmov %vm11596_vm0  ;;  %v3914_v56 = vrot.slane %v11143_v23, 3  ;;  %v3916_v46 = vrot.slane %v11146_v43, 3  ;;  %v3918_v9 = vrot.slane %v11161_v54, 3 }
 0x268   : > { %v7086_v0 = vsel %vm3890_vm8, %v7083_v45, %v7085_v34 }
 0x269   : > { %v3915_v27 = vsel %vm3890_vm8, %v3912_v25, %v3914_v56  ;;  %v3917_v8 = vsel %vm3890_vm8, %v3914_v56, %v3916_v46  ;;  %v3921_v23 = vsel %vm3890_vm8, %v3918_v9, %v3920_v28 }
 0x26c   : > { %8916 = vmatmul.mubr.msk.bf16.vlgmr.msra.gmra.mrb[0].mxu1 %vm11806_vm4, %v7058_v3  ;;  %vm11820_vm4 = vmmov %vm11596_vm0  ;;  %v7084_v3 = vsel %vm3890_vm8, %v7081_v49, %v7083_v45 }
 0x26d   : > { %8919 = vmatprep.mubr.msk.bf16.mxu1 %vm11807_vm11, %v7060_v12  ;;  %vm11821_vm11 = vmmov %vm11596_vm0  ;;  %v3911_v12 = vsel %vm3890_vm8, %v3908_v37, %v3910_v16 }
 0x26e   : > { %8600 = vmatmul.mubr.msk.bf16.gmra.mrb[24].mxu0 %vm11808_vm13, %v3617_v17  ;;  %vm11822_vm13 = vmmov %vm11596_vm0  ;;  %v3913_v17 = vsel %vm3890_vm8, %v3910_v16, %v3912_v25 }
 0x26f   : > { %8603 = vmatprep.mubr.msk.bf16.mxu0 %vm11809_vm14, %v3626_v13  ;;  %vm11823_vm14 = vmmov %vm11596_vm0  ;;  %v3919_v13 = vsel %vm3890_vm8, %v3916_v46, %v3918_v9  ;;  %vm4171_vm8 = vcmask 31744  }
 0x274   : > { %8920 = vmatmul.mubr.msk.bf16.gmra.mrb[4].mxu1 %vm11810_vm5, %v7062_v32  ;;  %vm11824_vm5 = vmmov %vm11596_vm0 }
 0x275   : > { %8923 = vmatprep.mubr.msk.bf16.mxu1 %vm11811_vm2, %v7064_v38  ;;  %vm11825_vm2 = vmmov %vm11596_vm0 }
 0x276   : > { %8604 = vmatmul.mubr.msk.bf16.gmra.mrb[28].mxu0 %vm11812_vm6, %v3635_v19  ;;  %vm11826_vm6 = vmmov %vm11596_vm0 }
 0x277   : > { %8609 = vmatprep.mubr.msk.bf16.mxu0 %vm11813_vm7, %v3893_v15  ;;  %vm11827_vm7 = vmmov %vm11596_vm0 }
 0x27c   : > { %8924 = vmatmul.mubr.msk.bf16.gmra.mrb[8].mxu1 %vm11814_vm1, %v7066_v61  ;;  %vm11828_vm1 = vmmov %vm11596_vm0 }
 0x27d   : > { %8927 = vmatprep.mubr.msk.bf16.mxu1 %vm11815_vm15, %v7068_v1  ;;  %vm11829_vm15 = vmmov %vm11596_vm0 }
 0x27e   : > { %8610 = vmatmul.mubr.msk.bf16.vlgmr.msra.gmra.mrb[0].mxu0 %vm11816_vm9, %v3895_v11  ;;  %vm11830_vm9 = vmmov %vm11596_vm0 }
 0x27f   : > { %8613 = vmatprep.mubr.msk.bf16.mxu0 %vm11817_vm10, %v3897_v14  ;;  %vm11831_vm10 = vmmov %vm11596_vm0 }
 0x284   : > { %8928 = vmatmul.mubr.msk.bf16.gmra.mrb[12].mxu1 %vm11596_vm0, %v7070_v24 }
 0x285   : > { %8931 = vmatprep.mubr.msk.bf16.mxu1 %vm11818_vm12, %v7072_v2  ;;  %vm11832_vm12 = vmmov %vm11596_vm0 }
 0x286   : > { %8614 = vmatmul.mubr.msk.bf16.gmra.mrb[4].mxu0 %vm11819_vm3, %v3899_v40  ;;  %vm11833_vm3 = vmmov %vm11596_vm0 }
 0x287   : > { %8617 = vmatprep.mubr.msk.bf16.mxu0 %vm11820_vm4, %v3901_v22  ;;  %vm11834_vm4 = vmmov %vm11596_vm0 }
 0x28c   : > { %8932 = vmatmul.mubr.msk.bf16.gmra.mrb[16].mxu1 %vm11821_vm11, %v7074_v6  ;;  %vm11835_vm11 = vmmov %vm11596_vm0 }
 0x28d   : > { %8935 = vmatprep.mubr.msk.bf16.mxu1 %vm11822_vm13, %v7076_v58  ;;  %vm11836_vm13 = vmmov %vm11596_vm0 }
 0x28e   : > { %8618 = vmatmul.mubr.msk.bf16.gmra.mrb[8].mxu0 %vm11823_vm14, %v3903_v10  ;;  %vm11837_vm14 = vmmov %vm11596_vm0 }
 0x28f   : > { %8621 = vmatprep.mubr.msk.bf16.mxu0 %vm11824_vm5, %v3905_v44 }
 0x294   : > { %8936 = vmatmul.mubr.msk.bf16.gmra.mrb[20].mxu1 %vm11825_vm2, %v7078_v33 }
 0x295   : > { %8939 = vmatprep.mubr.msk.bf16.mxu1 %vm11826_vm6, %v7080_v29 }
 0x296   : > { %8622 = vmatmul.mubr.msk.bf16.gmra.mrb[12].mxu0 %vm11827_vm7, %v3907_v36 }
 0x297   : > { %8625 = vmatprep.mubr.msk.bf16.mxu0 %vm11828_vm1, %v3909_v52 }
 0x29c   : > { %8940 = vmatmul.mubr.msk.bf16.gmra.mrb[24].mxu1 %vm11829_vm15, %v7082_v39 }
 0x29d   : > { %8943 = vmatprep.mubr.msk.bf16.mxu1 %vm11830_vm9, %v7084_v3 }
 0x29e   : > { %8626 = vmatmul.mubr.msk.bf16.gmra.mrb[16].mxu0 %vm11831_vm10, %v3911_v12 }
 0x29f   : > { %8629 = vmatprep.mubr.msk.bf16.mxu0 %vm11596_vm0, %v3913_v17 }
 0x2a4   : > { %8944 = vmatmul.mubr.msk.bf16.gmra.mrb[28].mxu1 %vm11832_vm12, %v7086_v0 }
 0x2a6   : > { %8630 = vmatmul.mubr.msk.bf16.gmra.mrb[20].mxu0 %vm11833_vm3, %v3915_v27 }
 0x2a7   : > { %8633 = vmatprep.mubr.msk.bf16.mxu0 %vm11834_vm4, %v3917_v8 }
 0x2ae   : > { %8634 = vmatmul.mubr.msk.bf16.gmra.mrb[24].mxu0 %vm11835_vm11, %v3919_v13 }
 0x2af   : > { %8637 = vmatprep.mubr.msk.bf16.mxu0 %vm11836_vm13, %v3921_v23 }
 0x2b6   : > { %8638 = vmatmul.mubr.msk.bf16.gmra.mrb[28].mxu0 %vm11837_vm14, %v11205_v18 }
 0x33f   : > { %v8917_v43 = vpop.f32.mrb[0].mxu1 }
 0x340   : > { %7336 = vst.msk [vmem:[%s11415_s24 + $0x110] sm:$0xff] %vm4171_vm8, %v8917_v43  ;;  %v7175_v54 = vpop.f32.mrb[1].mxu1 }
 0x341   : > { %7334 = vst.msk [vmem:[%s11415_s24 + $0x100] sm:$0xff] %vm4171_vm8, %v7175_v54  ;;  %v8918_v62 = vpop.f32.mrb[2].mxu1 }
 0x342   : > { %7337 = vst.msk [vmem:[%s11415_s24 + $0x118] sm:$0xff] %vm4171_vm8, %v8918_v62  ;;  %v7178_v28 = vpop.f32.mrb[3].mxu1 }
 0x343   : > { %7335 = vst.msk [vmem:[%s11415_s24 + $0x108] sm:$0xff] %vm4171_vm8, %v7178_v28 }
 0x347   : > { %v8921_v18 = vpop.f32.mrb[4].mxu1 }
 0x348   : > { %7340 = vst.msk [vmem:[%s11415_s24 + $0x130] sm:$0xff] %vm4171_vm8, %v8921_v18  ;;  %v7191_v31 = vpop.f32.mrb[5].mxu1 }
 0x349   : > { %7338 = vst.msk [vmem:[%s11415_s24 + $0x120] sm:$0xff] %vm4171_vm8, %v7191_v31  ;;  %v8922_v60 = vpop.f32.mrb[6].mxu1 }
 0x34a   : > { %7341 = vst.msk [vmem:[%s11415_s24 + $0x138] sm:$0xff] %vm4171_vm8, %v8922_v60  ;;  %v7194_v50 = vpop.f32.mrb[7].mxu1 }
 0x34b   : > { %7339 = vst.msk [vmem:[%s11415_s24 + $0x128] sm:$0xff] %vm4171_vm8, %v7194_v50 }
 0x34f   : > { %v8925_v42 = vpop.f32.mrb[8].mxu1 }
 0x350   : > { %7344 = vst.msk [vmem:[%s11415_s24 + $0x150] sm:$0xff] %vm4171_vm8, %v8925_v42  ;;  %v7207_v41 = vpop.f32.mrb[9].mxu1 }
 0x351   : > { %v8611_v20 = vpop.f32.mrb[0].mxu0  ;;  %7342 = vst.msk [vmem:[%s11415_s24 + $0x140] sm:$0xff] %vm4171_vm8, %v7207_v41  ;;  %v8926_v32 = vpop.f32.mrb[10].mxu1 }
 0x352   : > { %4174 = vst.msk [vmem:[%s11415_s24 + $0x10] sm:$0xff] %vm4171_vm8, %v8611_v20  ;;  %v4012_v38 = vpop.f32.mrb[1].mxu0  ;;  %7345 = vst.msk [vmem:[%s11415_s24 + $0x158] sm:$0xff] %vm4171_vm8, %v8926_v32  ;;  %v7210_v19 = vpop.f32.mrb[11].mxu1 }
 0x353   : > { %4172 = vst.msk [vmem:[%s11415_s24] sm:$0xff] %vm4171_vm8, %v4012_v38  ;;  %v8612_v15 = vpop.f32.mrb[2].mxu0  ;;  %7343 = vst.msk [vmem:[%s11415_s24 + $0x148] sm:$0xff] %vm4171_vm8, %v7210_v19 }
 0x354   : > { %4175 = vst.msk [vmem:[%s11415_s24 + $0x18] sm:$0xff] %vm4171_vm8, %v8612_v15  ;;  %v4015_v5 = vpop.f32.mrb[3].mxu0 }
 0x355   : > { %4173 = vst.msk [vmem:[%s11415_s24 + $0x8] sm:$0xff] %vm4171_vm8, %v4015_v5 }
 0x357   : > { %v8929_v53 = vpop.f32.mrb[12].mxu1 }
 0x358   : > { %7348 = vst.msk [vmem:[%s11415_s24 + $0x170] sm:$0xff] %vm4171_vm8, %v8929_v53  ;;  %v7223_v26 = vpop.f32.mrb[13].mxu1 }
 0x359   : > { %v8615_v4 = vpop.f32.mrb[4].mxu0  ;;  %7346 = vst.msk [vmem:[%s11415_s24 + $0x160] sm:$0xff] %vm4171_vm8, %v7223_v26  ;;  %v8930_v61 = vpop.f32.mrb[14].mxu1 }
 0x35a   : > { %4178 = vst.msk [vmem:[%s11415_s24 + $0x30] sm:$0xff] %vm4171_vm8, %v8615_v4  ;;  %v4028_v1 = vpop.f32.mrb[5].mxu0  ;;  %7349 = vst.msk [vmem:[%s11415_s24 + $0x178] sm:$0xff] %vm4171_vm8, %v8930_v61  ;;  %v7226_v11 = vpop.f32.mrb[15].mxu1 }
 0x35b   : > { %4176 = vst.msk [vmem:[%s11415_s24 + $0x20] sm:$0xff] %vm4171_vm8, %v4028_v1  ;;  %v8616_v14 = vpop.f32.mrb[6].mxu0  ;;  %7347 = vst.msk [vmem:[%s11415_s24 + $0x168] sm:$0xff] %vm4171_vm8, %v7226_v11 }
 0x35c   : > { %4179 = vst.msk [vmem:[%s11415_s24 + $0x38] sm:$0xff] %vm4171_vm8, %v8616_v14  ;;  %v4031_v21 = vpop.f32.mrb[7].mxu0 }
 0x35d   : > { %4177 = vst.msk [vmem:[%s11415_s24 + $0x28] sm:$0xff] %vm4171_vm8, %v4031_v21 }
 0x35f   : > { %v8933_v35 = vpop.f32.mrb[16].mxu1 }
 0x360   : > { %7352 = vst.msk [vmem:[%s11415_s24 + $0x190] sm:$0xff] %vm4171_vm8, %v8933_v35  ;;  %v7239_v63 = vpop.f32.mrb[17].mxu1 }
 0x361   : > { %v8619_v48 = vpop.f32.mrb[8].mxu0  ;;  %7350 = vst.msk [vmem:[%s11415_s24 + $0x180] sm:$0xff] %vm4171_vm8, %v7239_v63  ;;  %v8934_v24 = vpop.f32.mrb[18].mxu1 }
 0x362   : > { %4182 = vst.msk [vmem:[%s11415_s24 + $0x50] sm:$0xff] %vm4171_vm8, %v8619_v48  ;;  %v4044_v2 = vpop.f32.mrb[9].mxu0  ;;  %7353 = vst.msk [vmem:[%s11415_s24 + $0x198] sm:$0xff] %vm4171_vm8, %v8934_v24  ;;  %v7242_v40 = vpop.f32.mrb[19].mxu1 }
 0x363   : > { %4180 = vst.msk [vmem:[%s11415_s24 + $0x40] sm:$0xff] %vm4171_vm8, %v4044_v2  ;;  %v8620_v22 = vpop.f32.mrb[10].mxu0  ;;  %7351 = vst.msk [vmem:[%s11415_s24 + $0x188] sm:$0xff] %vm4171_vm8, %v7242_v40 }
 0x364   : > { %4183 = vst.msk [vmem:[%s11415_s24 + $0x58] sm:$0xff] %vm4171_vm8, %v8620_v22  ;;  %v4047_v57 = vpop.f32.mrb[11].mxu0 }
 0x365   : > { %4181 = vst.msk [vmem:[%s11415_s24 + $0x48] sm:$0xff] %vm4171_vm8, %v4047_v57 }
 0x367   : > { %v8937_v59 = vpop.f32.mrb[20].mxu1 }
 0x368   : > { %7356 = vst.msk [vmem:[%s11415_s24 + $0x1b0] sm:$0xff] %vm4171_vm8, %v8937_v59  ;;  %v7255_v47 = vpop.f32.mrb[21].mxu1 }
 0x369   : > { %v8623_v55 = vpop.f32.mrb[12].mxu0  ;;  %7354 = vst.msk [vmem:[%s11415_s24 + $0x1a0] sm:$0xff] %vm4171_vm8, %v7255_v47  ;;  %v8938_v6 = vpop.f32.mrb[22].mxu1 }
 0x36a   : > { %4186 = vst.msk [vmem:[%s11415_s24 + $0x70] sm:$0xff] %vm4171_vm8, %v8623_v55  ;;  %v4060_v58 = vpop.f32.mrb[13].mxu0  ;;  %7357 = vst.msk [vmem:[%s11415_s24 + $0x1b8] sm:$0xff] %vm4171_vm8, %v8938_v6  ;;  %v7258_v10 = vpop.f32.mrb[23].mxu1 }
 0x36b   : > { %4184 = vst.msk [vmem:[%s11415_s24 + $0x60] sm:$0xff] %vm4171_vm8, %v4060_v58  ;;  %v8624_v44 = vpop.f32.mrb[14].mxu0  ;;  %7355 = vst.msk [vmem:[%s11415_s24 + $0x1a8] sm:$0xff] %vm4171_vm8, %v7258_v10 }
 0x36c   : > { %4187 = vst.msk [vmem:[%s11415_s24 + $0x78] sm:$0xff] %vm4171_vm8, %v8624_v44  ;;  %v4063_v30 = vpop.f32.mrb[15].mxu0 }
 0x36d   : > { %4185 = vst.msk [vmem:[%s11415_s24 + $0x68] sm:$0xff] %vm4171_vm8, %v4063_v30 }
 0x36f   : > { %v8941_v7 = vpop.f32.mrb[24].mxu1 }
 0x370   : > { %7360 = vst.msk [vmem:[%s11415_s24 + $0x1d0] sm:$0xff] %vm4171_vm8, %v8941_v7  ;;  %v7271_v51 = vpop.f32.mrb[25].mxu1 }
 0x371   : > { %v8627_v37 = vpop.f32.mrb[16].mxu0  ;;  %7358 = vst.msk [vmem:[%s11415_s24 + $0x1c0] sm:$0xff] %vm4171_vm8, %v7271_v51  ;;  %v8942_v33 = vpop.f32.mrb[26].mxu1 }
 0x372   : > { %4190 = vst.msk [vmem:[%s11415_s24 + $0x90] sm:$0xff] %vm4171_vm8, %v8627_v37  ;;  %v4076_v29 = vpop.f32.mrb[17].mxu0  ;;  %7361 = vst.msk [vmem:[%s11415_s24 + $0x1d8] sm:$0xff] %vm4171_vm8, %v8942_v33  ;;  %v7274_v36 = vpop.f32.mrb[27].mxu1 }
 0x373   : > { %4188 = vst.msk [vmem:[%s11415_s24 + $0x80] sm:$0xff] %vm4171_vm8, %v4076_v29  ;;  %v8628_v52 = vpop.f32.mrb[18].mxu0  ;;  %7359 = vst.msk [vmem:[%s11415_s24 + $0x1c8] sm:$0xff] %vm4171_vm8, %v7274_v36 }
 0x374   : > { %4191 = vst.msk [vmem:[%s11415_s24 + $0x98] sm:$0xff] %vm4171_vm8, %v8628_v52  ;;  %v4079_v49 = vpop.f32.mrb[19].mxu0 }
 0x375   : > { %4189 = vst.msk [vmem:[%s11415_s24 + $0x88] sm:$0xff] %vm4171_vm8, %v4079_v49 }
 0x377   : > { %v8945_v45 = vpop.f32.mrb[28].mxu1 }
 0x378   : > { %7364 = vst.msk [vmem:[%s11415_s24 + $0x1f0] sm:$0xff] %vm4171_vm8, %v8945_v45  ;;  %v7287_v16 = vpop.f32.mrb[29].mxu1 }
 0x379   : > { %v8631_v25 = vpop.f32.mrb[20].mxu0  ;;  %7362 = vst.msk [vmem:[%s11415_s24 + $0x1e0] sm:$0xff] %vm4171_vm8, %v7287_v16  ;;  %v8946_v39 = vpop.f32.mrb[30].mxu1 }
 0x37a   : > { %4194 = vst.msk [vmem:[%s11415_s24 + $0xb0] sm:$0xff] %vm4171_vm8, %v8631_v25  ;;  %v4092_v3 = vpop.f32.mrb[21].mxu0  ;;  %7365 = vst.msk [vmem:[%s11415_s24 + $0x1f8] sm:$0xff] %vm4171_vm8, %v8946_v39  ;;  %v7290_v12 = vpop.f32.mrb[31].mxu1 }
 0x37b   : > { %4192 = vst.msk [vmem:[%s11415_s24 + $0xa0] sm:$0xff] %vm4171_vm8, %v4092_v3  ;;  %v8632_v17 = vpop.f32.mrb[22].mxu0  ;;  %7363 = vst.msk [vmem:[%s11415_s24 + $0x1e8] sm:$0xff] %vm4171_vm8, %v7290_v12 }
 0x37c   : > { %4195 = vst.msk [vmem:[%s11415_s24 + $0xb8] sm:$0xff] %vm4171_vm8, %v8632_v17  ;;  %v4095_v34 = vpop.f32.mrb[23].mxu0 }
 0x37d   : > { %4193 = vst.msk [vmem:[%s11415_s24 + $0xa8] sm:$0xff] %vm4171_vm8, %v4095_v34 }
 0x381   : > { %v8635_v56 = vpop.f32.mrb[24].mxu0 }
 0x382   : > { %4198 = vst.msk [vmem:[%s11415_s24 + $0xd0] sm:$0xff] %vm4171_vm8, %v8635_v56  ;;  %v4108_v46 = vpop.f32.mrb[25].mxu0 }
 0x383   : > { %4196 = vst.msk [vmem:[%s11415_s24 + $0xc0] sm:$0xff] %vm4171_vm8, %v4108_v46  ;;  %v8636_v0 = vpop.f32.mrb[26].mxu0 }
 0x384   : > { %4199 = vst.msk [vmem:[%s11415_s24 + $0xd8] sm:$0xff] %vm4171_vm8, %v8636_v0  ;;  %v4111_v27 = vpop.f32.mrb[27].mxu0 }
 0x385   : > { %4197 = vst.msk [vmem:[%s11415_s24 + $0xc8] sm:$0xff] %vm4171_vm8, %v4111_v27 }
 0x389   : > { %v8639_v8 = vpop.f32.mrb[28].mxu0 }
 0x38a   : > { %4202 = vst.msk [vmem:[%s11415_s24 + $0xf0] sm:$0xff] %vm4171_vm8, %v8639_v8  ;;  %v4124_v9 = vpop.f32.mrb[29].mxu0 }
 0x38b   : > { %4200 = vst.msk [vmem:[%s11415_s24 + $0xe0] sm:$0xff] %vm4171_vm8, %v4124_v9  ;;  %v8640_v13 = vpop.f32.mrb[30].mxu0 }
 0x38c   : > { %4203 = vst.msk [vmem:[%s11415_s24 + $0xf8] sm:$0xff] %vm4171_vm8, %v8640_v13  ;;  %v4127_v23 = vpop.f32.mrb[31].mxu0 }
 0x38d   : > { %4201 = vst.msk [vmem:[%s11415_s24 + $0xe8] sm:$0xff] %vm4171_vm8, %v4127_v23 }
 0x38e PF: > { %s14_s15 = sadd.s32 1, %s9624_s15  }
 0x38f   : > { %p11_p4 = scmp.ge.s32.totalorder %s14_s15, 4  }
 0x391   :  { %13 = sbr.rel (!%p11_p4) target bundleno = 1 (0x1), region = 74 }

</bundles_post_ra>
